<compile_context>
chip_gen: v5e
topology: v5e:2x2
jax: 0.10.0
libtpu: 0.0.40
codegen_flags: <defaults>
</compile_context>

<pallas_src>
import functools
import math

import jax
import jax.numpy as jnp
from jax import lax
from jax.experimental import pallas as pl
from jax.experimental.pallas import tpu as pltpu

LANE_COLS = 512          # lane-dense slab width (multiple of 128, power of 2)
LOG2_COLS = 9            # log2(LANE_COLS) -> index math uses shifts, no i32 vector mul
MAX_EVENTS_CAP = 64      # hard cap on the race depth
# TODO(synk): torch.poisson supports unbounded counts; the fixed event cap truncates the
#             (astronomically unlikely) far tail for lam approaching the cap.  For lam > ~40
#             a normal/transformed-rejection approximation would be needed.


def _threefry2x32(key0, key1, x0, x1):
    """Standard Threefry-2x32 (20 rounds). Only add/xor/shift/or -> pure VALU on TPU."""
    rot = (13, 15, 26, 6, 17, 29, 16, 24)
    ks2 = key0 ^ key1 ^ jnp.uint32(0x1BD11BDA)
    ks = (key0, key1, ks2)
    x0 = x0 + key0
    x1 = x1 + key1
    for block in range(5):
        for j in range(4):
            r = rot[(block % 2) * 4 + j]
            x0 = x0 + x1
            x1 = ((x1 << r) | (x1 >> (32 - r))) ^ x0
        x0 = x0 + ks[(block + 1) % 3]
        x1 = x1 + ks[(block + 2) % 3] + jnp.uint32(block + 1)
    return x0, x1


def _bits_to_unit(bits):
    """uint32 -> float32 uniform in (0, 1].  Goes through int32 (value < 2^24) for safe sitofp."""
    return ((bits >> 8).astype(jnp.int32).astype(jnp.float32) + 1.0) * (1.0 / 16777216.0)


def _poisson_noise_kernel(seed_ref, gain_ref, x_ref, o_ref, *,
                          normalize, clip_positive, n_pairs, block_rows, log2_cols):
    gain = gain_ref[0]
    inv_gain = 1.0 / gain
    lam = x_ref[...].astype(jnp.float32) * inv_gain
    if clip_positive:
        lam = jnp.maximum(lam, 0.0)

    # One transcendental per element (vs. one log per race step in the old kernel).
    t = jnp.exp(-lam)
    shape = lam.shape

    # Globally unique per-element counter (works for any grid step / megacore split).
    r_idx = lax.broadcasted_iota(jnp.int32, shape, 0).astype(jnp.uint32)
    c_idx = lax.broadcasted_iota(jnp.int32, shape, 1).astype(jnp.uint32)
    row0 = (pl.program_id(0) * block_rows).astype(jnp.uint32)
    gidx = ((row0 + r_idx) << log2_cols) | c_idx

    key0 = seed_ref[0].astype(jnp.uint32)
    key1 = jnp.uint32(0x3C6EF372)

    def body(pair, carry):
        p, k = carry
        b0, b1 = _threefry2x32(key0, key1, gidx, pair.astype(jnp.uint32))
        u0 = _bits_to_unit(b0)
        u1 = _bits_to_unit(b1)
        # Knuth: count draws while the running product stays above exp(-lam).
        # f32 underflow of p only matters when t itself underflows (lam > ~87),
        # which is beyond the event cap anyway.
        p = p * u0
        k = k + (p > t).astype(jnp.float32)
        p = p * u1
        k = k + (p > t).astype(jnp.float32)
        return p, k

    p0 = jnp.ones(shape, jnp.float32)
    k0 = jnp.zeros(shape, jnp.float32)
    unroll = True if n_pairs <= 8 else 4
    _, k = lax.fori_loop(0, n_pairs, body, (p0, k0), unroll=unroll)

    y = k * gain if normalize else k
    o_ref[...] = y.astype(o_ref.dtype)


def poisson_noise(x, gain=1.0, normalize=True, clip_positive=False, seed=0, max_events=None):
    """Pallas TPU implementation of PoissonNoise.forward (any shape, scalar gain)."""
    # TODO(synk): tensor-valued (per-batch) gain as in the torch module is not supported;
    #             only a scalar gain is handled here.
    orig_shape = x.shape
    orig_dtype = x.dtype
    total = int(math.prod(orig_shape))
    gain_f = float(gain)

    # Data-dependent race depth: enough draws to cover max(lam) + 6 sigma (capped).
    if max_events is None:
        lam_max = float(jnp.max(x)) / gain_f
        lam_max = max(lam_max, 0.0)
        max_events = int(math.ceil(lam_max + 6.0 * math.sqrt(lam_max) + 4.0))
    n_iters = max(2, min(int(max_events), MAX_EVENTS_CAP))
    n_pairs = (n_iters + 1) // 2      # threefry yields 2 uniforms per call

    # Lane-dense layout: flatten, pad to (R, 512) with R a multiple of the row tile.
    rows_needed = -(-total // LANE_COLS)
    block_rows = 8 if rows_needed <= 64 else 64       # 64x512 f32 block = 128 KiB (v7x-safe)
    R = -(-rows_needed // block_rows) * block_rows
    padded = R * LANE_COLS

    x_flat = x.reshape(-1)
    if padded != total:
        x_flat = jnp.pad(x_flat, (0, padded - total))   # lam=0 for padding -> k=0, sliced off
    x2d = x_flat.reshape(R, LANE_COLS)

    seed_arr = jnp.asarray([seed], dtype=jnp.int32)
    gain_arr = jnp.asarray([gain_f], dtype=jnp.float32)

    kernel = functools.partial(
        _poisson_noise_kernel,
        normalize=normalize, clip_positive=clip_positive,
        n_pairs=n_pairs, block_rows=block_rows, log2_cols=LOG2_COLS,
    )

    cost = pl.CostEstimate(
        flops=padded * (n_pairs * 150 + 12),
        transcendentals=padded,
        bytes_accessed=2 * padded * 4,
    )

    out2d = pl.pallas_call(
        kernel,
        out_shape=jax.ShapeDtypeStruct((R, LANE_COLS), orig_dtype),
        grid=(R // block_rows,),
        in_specs=[
            pl.BlockSpec(memory_space=pltpu.SMEM),                      # seed (scalar)
            pl.BlockSpec(memory_space=pltpu.SMEM),                      # gain (scalar)
            pl.BlockSpec((block_rows, LANE_COLS), lambda i: (i, 0)),    # x tile
        ],
        out_specs=pl.BlockSpec((block_rows, LANE_COLS), lambda i: (i, 0)),
        compiler_params=pltpu.CompilerParams(dimension_semantics=("parallel",)),
        cost_estimate=cost,
    )(seed_arr, gain_arr, x2d)

    y = out2d.reshape(-1)
    if padded != total:
        y = y[:total]
    return y.reshape(orig_shape)


if __name__ == "__main__":
    key = jax.random.PRNGKey(0)
    x = jax.random.uniform(key, (2, 4, 16, 16), dtype=jnp.float32)  # x >= 0, like torch.rand

    gain = 1.0
    y = poisson_noise(x, gain=gain, normalize=True, clip_positive=False, seed=0)
    y = jax.block_until_ready(y)

    # Sanity checks: correct shape/dtype, non-negative, integer multiples of gain,
    # and roughly unbiased (E[gain * Poisson(x/gain)] = x).
    assert y.shape == x.shape and y.dtype == x.dtype
    assert bool(jnp.all(y >= 0))
    assert bool(jnp.all(jnp.abs(y / gain - jnp.round(y / gain)) < 1e-5))
    mean_err = abs(float(jnp.mean(y)) - float(jnp.mean(x)))
    assert mean_err < 0.1, f"mean mismatch: {mean_err}"

    print("KERNEL_OK")
</pallas_src>

<mosaic_0001>
module attributes {stable_mosaic.version = 11 : i64} {
  func.func @_poisson_noise_kernel(%arg0: i32, %arg1: memref<1xi32, #tpu.memory_space<smem>>, %arg2: memref<1xf32, #tpu.memory_space<smem>>, %arg3: memref<8x512xf32, #tpu.memory_space<vmem>>, %arg4: memref<8x512xf32, #tpu.memory_space<vmem>>) attributes {dimension_semantics = [#tpu.dimension_semantics<parallel>], iteration_bounds = array<i64: 1>, scalar_prefetch = 0 : i64, scratch_operands = 0 : i64, tpu.core_type = #tpu.core_type<tc>, window_params = [{transform_indices = @transform_0, window_bounds = array<i64: 1>}, {transform_indices = @transform_1, window_bounds = array<i64: 1>}, {transform_indices = @transform_2, window_bounds = array<i64: 8, 512>}, {transform_indices = @transform_3, window_bounds = array<i64: 8, 512>}]} {
    %c0 = arith.constant 0 : index
    %0 = memref.load %arg2[%c0] : memref<1xf32, #tpu.memory_space<smem>>
    %cst = arith.constant 1.000000e+00 : f32
    %1 = arith.divf %cst, %0 : f32
    %c0_0 = arith.constant 0 : index
    %c0_1 = arith.constant 0 : index
    %2 = vector.load %arg3[%c0_0, %c0_1] : memref<8x512xf32, #tpu.memory_space<vmem>>, vector<8x512xf32>
    %3 = vector.broadcast %1 : f32 to vector<8x512xf32>
    %4 = arith.mulf %2, %3 : vector<8x512xf32>
    %cst_2 = arith.constant 0.000000e+00 : f32
    %5 = vector.broadcast %cst_2 : f32 to vector<8x512xf32>
    %6 = arith.subf %5, %4 : vector<8x512xf32>
    %7 = math.exp %6 : vector<8x512xf32>
    %8 = tpu.iota {dimensions = array<i32: 0>} : vector<8x512xi32>
    %9 = tpu.iota {dimensions = array<i32: 1>} : vector<8x512xi32>
    %c8_i32 = arith.constant 8 : i32
    %10 = arith.muli %arg0, %c8_i32 : i32
    %11 = vector.broadcast %10 : i32 to vector<8x512xi32>
    %12 = arith.addi %11, %8 : vector<8x512xi32>
    %c9_i32 = arith.constant 9 : i32
    %13 = vector.broadcast %c9_i32 : i32 to vector<8x512xi32>
    %14 = arith.shli %12, %13 : vector<8x512xi32>
    %15 = arith.ori %14, %9 : vector<8x512xi32>
    %c0_3 = arith.constant 0 : index
    %16 = memref.load %arg1[%c0_3] : memref<1xi32, #tpu.memory_space<smem>>
    %cst_4 = arith.constant 1.000000e+00 : f32
    %17 = vector.broadcast %cst_4 : f32 to vector<8x512xf32>
    %cst_5 = arith.constant 0.000000e+00 : f32
    %18 = vector.broadcast %cst_5 : f32 to vector<8x512xf32>
    %c1013904242_i32 = arith.constant 1013904242 : i32
    %c0_i32 = arith.constant 0 : i32
    %19 = arith.xori %16, %c1013904242_i32 : i32
    %c466688986_i32 = arith.constant 466688986 : i32
    %20 = arith.xori %19, %c466688986_i32 : i32
    %21 = vector.broadcast %16 : i32 to vector<8x512xi32>
    %22 = arith.addi %15, %21 : vector<8x512xi32>
    %23 = arith.addi %c0_i32, %c1013904242_i32 : i32
    %24 = vector.broadcast %23 : i32 to vector<8x512xi32>
    %25 = arith.addi %22, %24 : vector<8x512xi32>
    %c13_i32 = arith.constant 13 : i32
    %26 = arith.shli %23, %c13_i32 : i32
    %c19_i32 = arith.constant 19 : i32
    %27 = arith.shrui %23, %c19_i32 : i32
    %28 = arith.ori %26, %27 : i32
    %29 = vector.broadcast %28 : i32 to vector<8x512xi32>
    %30 = arith.xori %29, %25 : vector<8x512xi32>
    %31 = arith.addi %25, %30 : vector<8x512xi32>
    %c15_i32 = arith.constant 15 : i32
    %32 = vector.broadcast %c15_i32 : i32 to vector<8x512xi32>
    %33 = arith.shli %30, %32 : vector<8x512xi32>
    %c17_i32 = arith.constant 17 : i32
    %34 = vector.broadcast %c17_i32 : i32 to vector<8x512xi32>
    %35 = arith.shrui %30, %34 : vector<8x512xi32>
    %36 = arith.ori %33, %35 : vector<8x512xi32>
    %37 = arith.xori %36, %31 : vector<8x512xi32>
    %38 = arith.addi %31, %37 : vector<8x512xi32>
    %c26_i32 = arith.constant 26 : i32
    %39 = vector.broadcast %c26_i32 : i32 to vector<8x512xi32>
    %40 = arith.shli %37, %39 : vector<8x512xi32>
    %c6_i32 = arith.constant 6 : i32
    %41 = vector.broadcast %c6_i32 : i32 to vector<8x512xi32>
    %42 = arith.shrui %37, %41 : vector<8x512xi32>
    %43 = arith.ori %40, %42 : vector<8x512xi32>
    %44 = arith.xori %43, %38 : vector<8x512xi32>
    %45 = arith.addi %38, %44 : vector<8x512xi32>
    %c6_i32_6 = arith.constant 6 : i32
    %46 = vector.broadcast %c6_i32_6 : i32 to vector<8x512xi32>
    %47 = arith.shli %44, %46 : vector<8x512xi32>
    %c26_i32_7 = arith.constant 26 : i32
    %48 = vector.broadcast %c26_i32_7 : i32 to vector<8x512xi32>
    %49 = arith.shrui %44, %48 : vector<8x512xi32>
    %50 = arith.ori %47, %49 : vector<8x512xi32>
    %51 = arith.xori %50, %45 : vector<8x512xi32>
    %52 = vector.broadcast %c1013904242_i32 : i32 to vector<8x512xi32>
    %53 = arith.addi %45, %52 : vector<8x512xi32>
    %54 = vector.broadcast %20 : i32 to vector<8x512xi32>
    %55 = arith.addi %51, %54 : vector<8x512xi32>
    %c1_i32 = arith.constant 1 : i32
    %56 = vector.broadcast %c1_i32 : i32 to vector<8x512xi32>
    %57 = arith.addi %55, %56 : vector<8x512xi32>
    %58 = arith.addi %53, %57 : vector<8x512xi32>
    %c17_i32_8 = arith.constant 17 : i32
    %59 = vector.broadcast %c17_i32_8 : i32 to vector<8x512xi32>
    %60 = arith.shli %57, %59 : vector<8x512xi32>
    %c15_i32_9 = arith.constant 15 : i32
    %61 = vector.broadcast %c15_i32_9 : i32 to vector<8x512xi32>
    %62 = arith.shrui %57, %61 : vector<8x512xi32>
    %63 = arith.ori %60, %62 : vector<8x512xi32>
    %64 = arith.xori %63, %58 : vector<8x512xi32>
    %65 = arith.addi %58, %64 : vector<8x512xi32>
    %c29_i32 = arith.constant 29 : i32
    %66 = vector.broadcast %c29_i32 : i32 to vector<8x512xi32>
    %67 = arith.shli %64, %66 : vector<8x512xi32>
    %c3_i32 = arith.constant 3 : i32
    %68 = vector.broadcast %c3_i32 : i32 to vector<8x512xi32>
    %69 = arith.shrui %64, %68 : vector<8x512xi32>
    %70 = arith.ori %67, %69 : vector<8x512xi32>
    %71 = arith.xori %70, %65 : vector<8x512xi32>
    %72 = arith.addi %65, %71 : vector<8x512xi32>
    %c16_i32 = arith.constant 16 : i32
    %73 = vector.broadcast %c16_i32 : i32 to vector<8x512xi32>
    %74 = arith.shli %71, %73 : vector<8x512xi32>
    %c16_i32_10 = arith.constant 16 : i32
    %75 = vector.broadcast %c16_i32_10 : i32 to vector<8x512xi32>
    %76 = arith.shrui %71, %75 : vector<8x512xi32>
    %77 = arith.ori %74, %76 : vector<8x512xi32>
    %78 = arith.xori %77, %72 : vector<8x512xi32>
    %79 = arith.addi %72, %78 : vector<8x512xi32>
    %c24_i32 = arith.constant 24 : i32
    %80 = vector.broadcast %c24_i32 : i32 to vector<8x512xi32>
    %81 = arith.shli %78, %80 : vector<8x512xi32>
    %c8_i32_11 = arith.constant 8 : i32
    %82 = vector.broadcast %c8_i32_11 : i32 to vector<8x512xi32>
    %83 = arith.shrui %78, %82 : vector<8x512xi32>
    %84 = arith.ori %81, %83 : vector<8x512xi32>
    %85 = arith.xori %84, %79 : vector<8x512xi32>
    %86 = vector.broadcast %20 : i32 to vector<8x512xi32>
    %87 = arith.addi %79, %86 : vector<8x512xi32>
    %88 = vector.broadcast %16 : i32 to vector<8x512xi32>
    %89 = arith.addi %85, %88 : vector<8x512xi32>
    %c2_i32 = arith.constant 2 : i32
    %90 = vector.broadcast %c2_i32 : i32 to vector<8x512xi32>
    %91 = arith.addi %89, %90 : vector<8x512xi32>
    %92 = arith.addi %87, %91 : vector<8x512xi32>
    %c13_i32_12 = arith.constant 13 : i32
    %93 = vector.broadcast %c13_i32_12 : i32 to vector<8x512xi32>
    %94 = arith.shli %91, %93 : vector<8x512xi32>
    %c19_i32_13 = arith.constant 19 : i32
    %95 = vector.broadcast %c19_i32_13 : i32 to vector<8x512xi32>
    %96 = arith.shrui %91, %95 : vector<8x512xi32>
    %97 = arith.ori %94, %96 : vector<8x512xi32>
    %98 = arith.xori %97, %92 : vector<8x512xi32>
    %99 = arith.addi %92, %98 : vector<8x512xi32>
    %c15_i32_14 = arith.constant 15 : i32
    %100 = vector.broadcast %c15_i32_14 : i32 to vector<8x512xi32>
    %101 = arith.shli %98, %100 : vector<8x512xi32>
    %c17_i32_15 = arith.constant 17 : i32
    %102 = vector.broadcast %c17_i32_15 : i32 to vector<8x512xi32>
    %103 = arith.shrui %98, %102 : vector<8x512xi32>
    %104 = arith.ori %101, %103 : vector<8x512xi32>
    %105 = arith.xori %104, %99 : vector<8x512xi32>
    %106 = arith.addi %99, %105 : vector<8x512xi32>
    %c26_i32_16 = arith.constant 26 : i32
    %107 = vector.broadcast %c26_i32_16 : i32 to vector<8x512xi32>
    %108 = arith.shli %105, %107 : vector<8x512xi32>
    %c6_i32_17 = arith.constant 6 : i32
    %109 = vector.broadcast %c6_i32_17 : i32 to vector<8x512xi32>
    %110 = arith.shrui %105, %109 : vector<8x512xi32>
    %111 = arith.ori %108, %110 : vector<8x512xi32>
    %112 = arith.xori %111, %106 : vector<8x512xi32>
    %113 = arith.addi %106, %112 : vector<8x512xi32>
    %c6_i32_18 = arith.constant 6 : i32
    %114 = vector.broadcast %c6_i32_18 : i32 to vector<8x512xi32>
    %115 = arith.shli %112, %114 : vector<8x512xi32>
    %c26_i32_19 = arith.constant 26 : i32
    %116 = vector.broadcast %c26_i32_19 : i32 to vector<8x512xi32>
    %117 = arith.shrui %112, %116 : vector<8x512xi32>
    %118 = arith.ori %115, %117 : vector<8x512xi32>
    %119 = arith.xori %118, %113 : vector<8x512xi32>
    %120 = vector.broadcast %16 : i32 to vector<8x512xi32>
    %121 = arith.addi %113, %120 : vector<8x512xi32>
    %122 = vector.broadcast %c1013904242_i32 : i32 to vector<8x512xi32>
    %123 = arith.addi %119, %122 : vector<8x512xi32>
    %c3_i32_20 = arith.constant 3 : i32
    %124 = vector.broadcast %c3_i32_20 : i32 to vector<8x512xi32>
    %125 = arith.addi %123, %124 : vector<8x512xi32>
    %126 = arith.addi %121, %125 : vector<8x512xi32>
    %c17_i32_21 = arith.constant 17 : i32
    %127 = vector.broadcast %c17_i32_21 : i32 to vector<8x512xi32>
    %128 = arith.shli %125, %127 : vector<8x512xi32>
    %c15_i32_22 = arith.constant 15 : i32
    %129 = vector.broadcast %c15_i32_22 : i32 to vector<8x512xi32>
    %130 = arith.shrui %125, %129 : vector<8x512xi32>
    %131 = arith.ori %128, %130 : vector<8x512xi32>
    %132 = arith.xori %131, %126 : vector<8x512xi32>
    %133 = arith.addi %126, %132 : vector<8x512xi32>
    %c29_i32_23 = arith.constant 29 : i32
    %134 = vector.broadcast %c29_i32_23 : i32 to vector<8x512xi32>
    %135 = arith.shli %132, %134 : vector<8x512xi32>
    %c3_i32_24 = arith.constant 3 : i32
    %136 = vector.broadcast %c3_i32_24 : i32 to vector<8x512xi32>
    %137 = arith.shrui %132, %136 : vector<8x512xi32>
    %138 = arith.ori %135, %137 : vector<8x512xi32>
    %139 = arith.xori %138, %133 : vector<8x512xi32>
    %140 = arith.addi %133, %139 : vector<8x512xi32>
    %c16_i32_25 = arith.constant 16 : i32
    %141 = vector.broadcast %c16_i32_25 : i32 to vector<8x512xi32>
    %142 = arith.shli %139, %141 : vector<8x512xi32>
    %c16_i32_26 = arith.constant 16 : i32
    %143 = vector.broadcast %c16_i32_26 : i32 to vector<8x512xi32>
    %144 = arith.shrui %139, %143 : vector<8x512xi32>
    %145 = arith.ori %142, %144 : vector<8x512xi32>
    %146 = arith.xori %145, %140 : vector<8x512xi32>
    %147 = arith.addi %140, %146 : vector<8x512xi32>
    %c24_i32_27 = arith.constant 24 : i32
    %148 = vector.broadcast %c24_i32_27 : i32 to vector<8x512xi32>
    %149 = arith.shli %146, %148 : vector<8x512xi32>
    %c8_i32_28 = arith.constant 8 : i32
    %150 = vector.broadcast %c8_i32_28 : i32 to vector<8x512xi32>
    %151 = arith.shrui %146, %150 : vector<8x512xi32>
    %152 = arith.ori %149, %151 : vector<8x512xi32>
    %153 = arith.xori %152, %147 : vector<8x512xi32>
    %154 = vector.broadcast %c1013904242_i32 : i32 to vector<8x512xi32>
    %155 = arith.addi %147, %154 : vector<8x512xi32>
    %156 = vector.broadcast %20 : i32 to vector<8x512xi32>
    %157 = arith.addi %153, %156 : vector<8x512xi32>
    %c4_i32 = arith.constant 4 : i32
    %158 = vector.broadcast %c4_i32 : i32 to vector<8x512xi32>
    %159 = arith.addi %157, %158 : vector<8x512xi32>
    %160 = arith.addi %155, %159 : vector<8x512xi32>
    %c13_i32_29 = arith.constant 13 : i32
    %161 = vector.broadcast %c13_i32_29 : i32 to vector<8x512xi32>
    %162 = arith.shli %159, %161 : vector<8x512xi32>
    %c19_i32_30 = arith.constant 19 : i32
    %163 = vector.broadcast %c19_i32_30 : i32 to vector<8x512xi32>
    %164 = arith.shrui %159, %163 : vector<8x512xi32>
    %165 = arith.ori %162, %164 : vector<8x512xi32>
    %166 = arith.xori %165, %160 : vector<8x512xi32>
    %167 = arith.addi %160, %166 : vector<8x512xi32>
    %c15_i32_31 = arith.constant 15 : i32
    %168 = vector.broadcast %c15_i32_31 : i32 to vector<8x512xi32>
    %169 = arith.shli %166, %168 : vector<8x512xi32>
    %c17_i32_32 = arith.constant 17 : i32
    %170 = vector.broadcast %c17_i32_32 : i32 to vector<8x512xi32>
    %171 = arith.shrui %166, %170 : vector<8x512xi32>
    %172 = arith.ori %169, %171 : vector<8x512xi32>
    %173 = arith.xori %172, %167 : vector<8x512xi32>
    %174 = arith.addi %167, %173 : vector<8x512xi32>
    %c26_i32_33 = arith.constant 26 : i32
    %175 = vector.broadcast %c26_i32_33 : i32 to vector<8x512xi32>
    %176 = arith.shli %173, %175 : vector<8x512xi32>
    %c6_i32_34 = arith.constant 6 : i32
    %177 = vector.broadcast %c6_i32_34 : i32 to vector<8x512xi32>
    %178 = arith.shrui %173, %177 : vector<8x512xi32>
    %179 = arith.ori %176, %178 : vector<8x512xi32>
    %180 = arith.xori %179, %174 : vector<8x512xi32>
    %181 = arith.addi %174, %180 : vector<8x512xi32>
    %c6_i32_35 = arith.constant 6 : i32
    %182 = vector.broadcast %c6_i32_35 : i32 to vector<8x512xi32>
    %183 = arith.shli %180, %182 : vector<8x512xi32>
    %c26_i32_36 = arith.constant 26 : i32
    %184 = vector.broadcast %c26_i32_36 : i32 to vector<8x512xi32>
    %185 = arith.shrui %180, %184 : vector<8x512xi32>
    %186 = arith.ori %183, %185 : vector<8x512xi32>
    %187 = arith.xori %186, %181 : vector<8x512xi32>
    %188 = vector.broadcast %20 : i32 to vector<8x512xi32>
    %189 = arith.addi %181, %188 : vector<8x512xi32>
    %190 = vector.broadcast %16 : i32 to vector<8x512xi32>
    %191 = arith.addi %187, %190 : vector<8x512xi32>
    %c5_i32 = arith.constant 5 : i32
    %192 = vector.broadcast %c5_i32 : i32 to vector<8x512xi32>
    %193 = arith.addi %191, %192 : vector<8x512xi32>
    %c8_i32_37 = arith.constant 8 : i32
    %194 = vector.broadcast %c8_i32_37 : i32 to vector<8x512xi32>
    %195 = arith.shrui %189, %194 : vector<8x512xi32>
    %196 = arith.sitofp %195 : vector<8x512xi32> to vector<8x512xf32>
    %cst_38 = arith.constant 1.000000e+00 : f32
    %197 = vector.broadcast %cst_38 : f32 to vector<8x512xf32>
    %198 = arith.addf %196, %197 : vector<8x512xf32>
    %cst_39 = arith.constant 5.96046448E-8 : f32
    %199 = vector.broadcast %cst_39 : f32 to vector<8x512xf32>
    %200 = arith.mulf %198, %199 : vector<8x512xf32>
    %c8_i32_40 = arith.constant 8 : i32
    %201 = vector.broadcast %c8_i32_40 : i32 to vector<8x512xi32>
    %202 = arith.shrui %193, %201 : vector<8x512xi32>
    %203 = arith.sitofp %202 : vector<8x512xi32> to vector<8x512xf32>
    %cst_41 = arith.constant 1.000000e+00 : f32
    %204 = vector.broadcast %cst_41 : f32 to vector<8x512xf32>
    %205 = arith.addf %203, %204 : vector<8x512xf32>
    %cst_42 = arith.constant 5.96046448E-8 : f32
    %206 = vector.broadcast %cst_42 : f32 to vector<8x512xf32>
    %207 = arith.mulf %205, %206 : vector<8x512xf32>
    %208 = arith.mulf %17, %200 : vector<8x512xf32>
    %209 = arith.cmpf ogt, %208, %7 : vector<8x512xf32>
    %210 = arith.extui %209 : vector<8x512xi1> to vector<8x512xi32>
    %211 = arith.sitofp %210 : vector<8x512xi32> to vector<8x512xf32>
    %212 = arith.addf %18, %211 : vector<8x512xf32>
    %213 = arith.mulf %208, %207 : vector<8x512xf32>
    %214 = arith.cmpf ogt, %213, %7 : vector<8x512xf32>
    %215 = arith.extui %214 : vector<8x512xi1> to vector<8x512xi32>
    %216 = arith.sitofp %215 : vector<8x512xi32> to vector<8x512xf32>
    %217 = arith.addf %212, %216 : vector<8x512xf32>
    %c1_i32_43 = arith.constant 1 : i32
    %218 = arith.xori %16, %c1013904242_i32 : i32
    %c466688986_i32_44 = arith.constant 466688986 : i32
    %219 = arith.xori %218, %c466688986_i32_44 : i32
    %220 = vector.broadcast %16 : i32 to vector<8x512xi32>
    %221 = arith.addi %15, %220 : vector<8x512xi32>
    %222 = arith.addi %c1_i32_43, %c1013904242_i32 : i32
    %223 = vector.broadcast %222 : i32 to vector<8x512xi32>
    %224 = arith.addi %221, %223 : vector<8x512xi32>
    %c13_i32_45 = arith.constant 13 : i32
    %225 = arith.shli %222, %c13_i32_45 : i32
    %c19_i32_46 = arith.constant 19 : i32
    %226 = arith.shrui %222, %c19_i32_46 : i32
    %227 = arith.ori %225, %226 : i32
    %228 = vector.broadcast %227 : i32 to vector<8x512xi32>
    %229 = arith.xori %228, %224 : vector<8x512xi32>
    %230 = arith.addi %224, %229 : vector<8x512xi32>
    %c15_i32_47 = arith.constant 15 : i32
    %231 = vector.broadcast %c15_i32_47 : i32 to vector<8x512xi32>
    %232 = arith.shli %229, %231 : vector<8x512xi32>
    %c17_i32_48 = arith.constant 17 : i32
    %233 = vector.broadcast %c17_i32_48 : i32 to vector<8x512xi32>
    %234 = arith.shrui %229, %233 : vector<8x512xi32>
    %235 = arith.ori %232, %234 : vector<8x512xi32>
    %236 = arith.xori %235, %230 : vector<8x512xi32>
    %237 = arith.addi %230, %236 : vector<8x512xi32>
    %c26_i32_49 = arith.constant 26 : i32
    %238 = vector.broadcast %c26_i32_49 : i32 to vector<8x512xi32>
    %239 = arith.shli %236, %238 : vector<8x512xi32>
    %c6_i32_50 = arith.constant 6 : i32
    %240 = vector.broadcast %c6_i32_50 : i32 to vector<8x512xi32>
    %241 = arith.shrui %236, %240 : vector<8x512xi32>
    %242 = arith.ori %239, %241 : vector<8x512xi32>
    %243 = arith.xori %242, %237 : vector<8x512xi32>
    %244 = arith.addi %237, %243 : vector<8x512xi32>
    %c6_i32_51 = arith.constant 6 : i32
    %245 = vector.broadcast %c6_i32_51 : i32 to vector<8x512xi32>
    %246 = arith.shli %243, %245 : vector<8x512xi32>
    %c26_i32_52 = arith.constant 26 : i32
    %247 = vector.broadcast %c26_i32_52 : i32 to vector<8x512xi32>
    %248 = arith.shrui %243, %247 : vector<8x512xi32>
    %249 = arith.ori %246, %248 : vector<8x512xi32>
    %250 = arith.xori %249, %244 : vector<8x512xi32>
    %251 = vector.broadcast %c1013904242_i32 : i32 to vector<8x512xi32>
    %252 = arith.addi %244, %251 : vector<8x512xi32>
    %253 = vector.broadcast %219 : i32 to vector<8x512xi32>
    %254 = arith.addi %250, %253 : vector<8x512xi32>
    %c1_i32_53 = arith.constant 1 : i32
    %255 = vector.broadcast %c1_i32_53 : i32 to vector<8x512xi32>
    %256 = arith.addi %254, %255 : vector<8x512xi32>
    %257 = arith.addi %252, %256 : vector<8x512xi32>
    %c17_i32_54 = arith.constant 17 : i32
    %258 = vector.broadcast %c17_i32_54 : i32 to vector<8x512xi32>
    %259 = arith.shli %256, %258 : vector<8x512xi32>
    %c15_i32_55 = arith.constant 15 : i32
    %260 = vector.broadcast %c15_i32_55 : i32 to vector<8x512xi32>
    %261 = arith.shrui %256, %260 : vector<8x512xi32>
    %262 = arith.ori %259, %261 : vector<8x512xi32>
    %263 = arith.xori %262, %257 : vector<8x512xi32>
    %264 = arith.addi %257, %263 : vector<8x512xi32>
    %c29_i32_56 = arith.constant 29 : i32
    %265 = vector.broadcast %c29_i32_56 : i32 to vector<8x512xi32>
    %266 = arith.shli %263, %265 : vector<8x512xi32>
    %c3_i32_57 = arith.constant 3 : i32
    %267 = vector.broadcast %c3_i32_57 : i32 to vector<8x512xi32>
    %268 = arith.shrui %263, %267 : vector<8x512xi32>
    %269 = arith.ori %266, %268 : vector<8x512xi32>
    %270 = arith.xori %269, %264 : vector<8x512xi32>
    %271 = arith.addi %264, %270 : vector<8x512xi32>
    %c16_i32_58 = arith.constant 16 : i32
    %272 = vector.broadcast %c16_i32_58 : i32 to vector<8x512xi32>
    %273 = arith.shli %270, %272 : vector<8x512xi32>
    %c16_i32_59 = arith.constant 16 : i32
    %274 = vector.broadcast %c16_i32_59 : i32 to vector<8x512xi32>
    %275 = arith.shrui %270, %274 : vector<8x512xi32>
    %276 = arith.ori %273, %275 : vector<8x512xi32>
    %277 = arith.xori %276, %271 : vector<8x512xi32>
    %278 = arith.addi %271, %277 : vector<8x512xi32>
    %c24_i32_60 = arith.constant 24 : i32
    %279 = vector.broadcast %c24_i32_60 : i32 to vector<8x512xi32>
    %280 = arith.shli %277, %279 : vector<8x512xi32>
    %c8_i32_61 = arith.constant 8 : i32
    %281 = vector.broadcast %c8_i32_61 : i32 to vector<8x512xi32>
    %282 = arith.shrui %277, %281 : vector<8x512xi32>
    %283 = arith.ori %280, %282 : vector<8x512xi32>
    %284 = arith.xori %283, %278 : vector<8x512xi32>
    %285 = vector.broadcast %219 : i32 to vector<8x512xi32>
    %286 = arith.addi %278, %285 : vector<8x512xi32>
    %287 = vector.broadcast %16 : i32 to vector<8x512xi32>
    %288 = arith.addi %284, %287 : vector<8x512xi32>
    %c2_i32_62 = arith.constant 2 : i32
    %289 = vector.broadcast %c2_i32_62 : i32 to vector<8x512xi32>
    %290 = arith.addi %288, %289 : vector<8x512xi32>
    %291 = arith.addi %286, %290 : vector<8x512xi32>
    %c13_i32_63 = arith.constant 13 : i32
    %292 = vector.broadcast %c13_i32_63 : i32 to vector<8x512xi32>
    %293 = arith.shli %290, %292 : vector<8x512xi32>
    %c19_i32_64 = arith.constant 19 : i32
    %294 = vector.broadcast %c19_i32_64 : i32 to vector<8x512xi32>
    %295 = arith.shrui %290, %294 : vector<8x512xi32>
    %296 = arith.ori %293, %295 : vector<8x512xi32>
    %297 = arith.xori %296, %291 : vector<8x512xi32>
    %298 = arith.addi %291, %297 : vector<8x512xi32>
    %c15_i32_65 = arith.constant 15 : i32
    %299 = vector.broadcast %c15_i32_65 : i32 to vector<8x512xi32>
    %300 = arith.shli %297, %299 : vector<8x512xi32>
    %c17_i32_66 = arith.constant 17 : i32
    %301 = vector.broadcast %c17_i32_66 : i32 to vector<8x512xi32>
    %302 = arith.shrui %297, %301 : vector<8x512xi32>
    %303 = arith.ori %300, %302 : vector<8x512xi32>
    %304 = arith.xori %303, %298 : vector<8x512xi32>
    %305 = arith.addi %298, %304 : vector<8x512xi32>
    %c26_i32_67 = arith.constant 26 : i32
    %306 = vector.broadcast %c26_i32_67 : i32 to vector<8x512xi32>
    %307 = arith.shli %304, %306 : vector<8x512xi32>
    %c6_i32_68 = arith.constant 6 : i32
    %308 = vector.broadcast %c6_i32_68 : i32 to vector<8x512xi32>
    %309 = arith.shrui %304, %308 : vector<8x512xi32>
    %310 = arith.ori %307, %309 : vector<8x512xi32>
    %311 = arith.xori %310, %305 : vector<8x512xi32>
    %312 = arith.addi %305, %311 : vector<8x512xi32>
    %c6_i32_69 = arith.constant 6 : i32
    %313 = vector.broadcast %c6_i32_69 : i32 to vector<8x512xi32>
    %314 = arith.shli %311, %313 : vector<8x512xi32>
    %c26_i32_70 = arith.constant 26 : i32
    %315 = vector.broadcast %c26_i32_70 : i32 to vector<8x512xi32>
    %316 = arith.shrui %311, %315 : vector<8x512xi32>
    %317 = arith.ori %314, %316 : vector<8x512xi32>
    %318 = arith.xori %317, %312 : vector<8x512xi32>
    %319 = vector.broadcast %16 : i32 to vector<8x512xi32>
    %320 = arith.addi %312, %319 : vector<8x512xi32>
    %321 = vector.broadcast %c1013904242_i32 : i32 to vector<8x512xi32>
    %322 = arith.addi %318, %321 : vector<8x512xi32>
    %c3_i32_71 = arith.constant 3 : i32
    %323 = vector.broadcast %c3_i32_71 : i32 to vector<8x512xi32>
    %324 = arith.addi %322, %323 : vector<8x512xi32>
    %325 = arith.addi %320, %324 : vector<8x512xi32>
    %c17_i32_72 = arith.constant 17 : i32
    %326 = vector.broadcast %c17_i32_72 : i32 to vector<8x512xi32>
    %327 = arith.shli %324, %326 : vector<8x512xi32>
    %c15_i32_73 = arith.constant 15 : i32
    %328 = vector.broadcast %c15_i32_73 : i32 to vector<8x512xi32>
    %329 = arith.shrui %324, %328 : vector<8x512xi32>
    %330 = arith.ori %327, %329 : vector<8x512xi32>
    %331 = arith.xori %330, %325 : vector<8x512xi32>
    %332 = arith.addi %325, %331 : vector<8x512xi32>
    %c29_i32_74 = arith.constant 29 : i32
    %333 = vector.broadcast %c29_i32_74 : i32 to vector<8x512xi32>
    %334 = arith.shli %331, %333 : vector<8x512xi32>
    %c3_i32_75 = arith.constant 3 : i32
    %335 = vector.broadcast %c3_i32_75 : i32 to vector<8x512xi32>
    %336 = arith.shrui %331, %335 : vector<8x512xi32>
    %337 = arith.ori %334, %336 : vector<8x512xi32>
    %338 = arith.xori %337, %332 : vector<8x512xi32>
    %339 = arith.addi %332, %338 : vector<8x512xi32>
    %c16_i32_76 = arith.constant 16 : i32
    %340 = vector.broadcast %c16_i32_76 : i32 to vector<8x512xi32>
    %341 = arith.shli %338, %340 : vector<8x512xi32>
    %c16_i32_77 = arith.constant 16 : i32
    %342 = vector.broadcast %c16_i32_77 : i32 to vector<8x512xi32>
    %343 = arith.shrui %338, %342 : vector<8x512xi32>
    %344 = arith.ori %341, %343 : vector<8x512xi32>
    %345 = arith.xori %344, %339 : vector<8x512xi32>
    %346 = arith.addi %339, %345 : vector<8x512xi32>
    %c24_i32_78 = arith.constant 24 : i32
    %347 = vector.broadcast %c24_i32_78 : i32 to vector<8x512xi32>
    %348 = arith.shli %345, %347 : vector<8x512xi32>
    %c8_i32_79 = arith.constant 8 : i32
    %349 = vector.broadcast %c8_i32_79 : i32 to vector<8x512xi32>
    %350 = arith.shrui %345, %349 : vector<8x512xi32>
    %351 = arith.ori %348, %350 : vector<8x512xi32>
    %352 = arith.xori %351, %346 : vector<8x512xi32>
    %353 = vector.broadcast %c1013904242_i32 : i32 to vector<8x512xi32>
    %354 = arith.addi %346, %353 : vector<8x512xi32>
    %355 = vector.broadcast %219 : i32 to vector<8x512xi32>
    %356 = arith.addi %352, %355 : vector<8x512xi32>
    %c4_i32_80 = arith.constant 4 : i32
    %357 = vector.broadcast %c4_i32_80 : i32 to vector<8x512xi32>
    %358 = arith.addi %356, %357 : vector<8x512xi32>
    %359 = arith.addi %354, %358 : vector<8x512xi32>
    %c13_i32_81 = arith.constant 13 : i32
    %360 = vector.broadcast %c13_i32_81 : i32 to vector<8x512xi32>
    %361 = arith.shli %358, %360 : vector<8x512xi32>
    %c19_i32_82 = arith.constant 19 : i32
    %362 = vector.broadcast %c19_i32_82 : i32 to vector<8x512xi32>
    %363 = arith.shrui %358, %362 : vector<8x512xi32>
    %364 = arith.ori %361, %363 : vector<8x512xi32>
    %365 = arith.xori %364, %359 : vector<8x512xi32>
    %366 = arith.addi %359, %365 : vector<8x512xi32>
    %c15_i32_83 = arith.constant 15 : i32
    %367 = vector.broadcast %c15_i32_83 : i32 to vector<8x512xi32>
    %368 = arith.shli %365, %367 : vector<8x512xi32>
    %c17_i32_84 = arith.constant 17 : i32
    %369 = vector.broadcast %c17_i32_84 : i32 to vector<8x512xi32>
    %370 = arith.shrui %365, %369 : vector<8x512xi32>
    %371 = arith.ori %368, %370 : vector<8x512xi32>
    %372 = arith.xori %371, %366 : vector<8x512xi32>
    %373 = arith.addi %366, %372 : vector<8x512xi32>
    %c26_i32_85 = arith.constant 26 : i32
    %374 = vector.broadcast %c26_i32_85 : i32 to vector<8x512xi32>
    %375 = arith.shli %372, %374 : vector<8x512xi32>
    %c6_i32_86 = arith.constant 6 : i32
    %376 = vector.broadcast %c6_i32_86 : i32 to vector<8x512xi32>
    %377 = arith.shrui %372, %376 : vector<8x512xi32>
    %378 = arith.ori %375, %377 : vector<8x512xi32>
    %379 = arith.xori %378, %373 : vector<8x512xi32>
    %380 = arith.addi %373, %379 : vector<8x512xi32>
    %c6_i32_87 = arith.constant 6 : i32
    %381 = vector.broadcast %c6_i32_87 : i32 to vector<8x512xi32>
    %382 = arith.shli %379, %381 : vector<8x512xi32>
    %c26_i32_88 = arith.constant 26 : i32
    %383 = vector.broadcast %c26_i32_88 : i32 to vector<8x512xi32>
    %384 = arith.shrui %379, %383 : vector<8x512xi32>
    %385 = arith.ori %382, %384 : vector<8x512xi32>
    %386 = arith.xori %385, %380 : vector<8x512xi32>
    %387 = vector.broadcast %219 : i32 to vector<8x512xi32>
    %388 = arith.addi %380, %387 : vector<8x512xi32>
    %389 = vector.broadcast %16 : i32 to vector<8x512xi32>
    %390 = arith.addi %386, %389 : vector<8x512xi32>
    %c5_i32_89 = arith.constant 5 : i32
    %391 = vector.broadcast %c5_i32_89 : i32 to vector<8x512xi32>
    %392 = arith.addi %390, %391 : vector<8x512xi32>
    %c8_i32_90 = arith.constant 8 : i32
    %393 = vector.broadcast %c8_i32_90 : i32 to vector<8x512xi32>
    %394 = arith.shrui %388, %393 : vector<8x512xi32>
    %395 = arith.sitofp %394 : vector<8x512xi32> to vector<8x512xf32>
    %cst_91 = arith.constant 1.000000e+00 : f32
    %396 = vector.broadcast %cst_91 : f32 to vector<8x512xf32>
    %397 = arith.addf %395, %396 : vector<8x512xf32>
    %cst_92 = arith.constant 5.96046448E-8 : f32
    %398 = vector.broadcast %cst_92 : f32 to vector<8x512xf32>
    %399 = arith.mulf %397, %398 : vector<8x512xf32>
    %c8_i32_93 = arith.constant 8 : i32
    %400 = vector.broadcast %c8_i32_93 : i32 to vector<8x512xi32>
    %401 = arith.shrui %392, %400 : vector<8x512xi32>
    %402 = arith.sitofp %401 : vector<8x512xi32> to vector<8x512xf32>
    %cst_94 = arith.constant 1.000000e+00 : f32
    %403 = vector.broadcast %cst_94 : f32 to vector<8x512xf32>
    %404 = arith.addf %402, %403 : vector<8x512xf32>
    %cst_95 = arith.constant 5.96046448E-8 : f32
    %405 = vector.broadcast %cst_95 : f32 to vector<8x512xf32>
    %406 = arith.mulf %404, %405 : vector<8x512xf32>
    %407 = arith.mulf %213, %399 : vector<8x512xf32>
    %408 = arith.cmpf ogt, %407, %7 : vector<8x512xf32>
    %409 = arith.extui %408 : vector<8x512xi1> to vector<8x512xi32>
    %410 = arith.sitofp %409 : vector<8x512xi32> to vector<8x512xf32>
    %411 = arith.addf %217, %410 : vector<8x512xf32>
    %412 = arith.mulf %407, %406 : vector<8x512xf32>
    %413 = arith.cmpf ogt, %412, %7 : vector<8x512xf32>
    %414 = arith.extui %413 : vector<8x512xi1> to vector<8x512xi32>
    %415 = arith.sitofp %414 : vector<8x512xi32> to vector<8x512xf32>
    %416 = arith.addf %411, %415 : vector<8x512xf32>
    %c2_i32_96 = arith.constant 2 : i32
    %417 = arith.xori %16, %c1013904242_i32 : i32
    %c466688986_i32_97 = arith.constant 466688986 : i32
    %418 = arith.xori %417, %c466688986_i32_97 : i32
    %419 = vector.broadcast %16 : i32 to vector<8x512xi32>
    %420 = arith.addi %15, %419 : vector<8x512xi32>
    %421 = arith.addi %c2_i32_96, %c1013904242_i32 : i32
    %422 = vector.broadcast %421 : i32 to vector<8x512xi32>
    %423 = arith.addi %420, %422 : vector<8x512xi32>
    %c13_i32_98 = arith.constant 13 : i32
    %424 = arith.shli %421, %c13_i32_98 : i32
    %c19_i32_99 = arith.constant 19 : i32
    %425 = arith.shrui %421, %c19_i32_99 : i32
    %426 = arith.ori %424, %425 : i32
    %427 = vector.broadcast %426 : i32 to vector<8x512xi32>
    %428 = arith.xori %427, %423 : vector<8x512xi32>
    %429 = arith.addi %423, %428 : vector<8x512xi32>
    %c15_i32_100 = arith.constant 15 : i32
    %430 = vector.broadcast %c15_i32_100 : i32 to vector<8x512xi32>
    %431 = arith.shli %428, %430 : vector<8x512xi32>
    %c17_i32_101 = arith.constant 17 : i32
    %432 = vector.broadcast %c17_i32_101 : i32 to vector<8x512xi32>
    %433 = arith.shrui %428, %432 : vector<8x512xi32>
    %434 = arith.ori %431, %433 : vector<8x512xi32>
    %435 = arith.xori %434, %429 : vector<8x512xi32>
    %436 = arith.addi %429, %435 : vector<8x512xi32>
    %c26_i32_102 = arith.constant 26 : i32
    %437 = vector.broadcast %c26_i32_102 : i32 to vector<8x512xi32>
    %438 = arith.shli %435, %437 : vector<8x512xi32>
    %c6_i32_103 = arith.constant 6 : i32
    %439 = vector.broadcast %c6_i32_103 : i32 to vector<8x512xi32>
    %440 = arith.shrui %435, %439 : vector<8x512xi32>
    %441 = arith.ori %438, %440 : vector<8x512xi32>
    %442 = arith.xori %441, %436 : vector<8x512xi32>
    %443 = arith.addi %436, %442 : vector<8x512xi32>
    %c6_i32_104 = arith.constant 6 : i32
    %444 = vector.broadcast %c6_i32_104 : i32 to vector<8x512xi32>
    %445 = arith.shli %442, %444 : vector<8x512xi32>
    %c26_i32_105 = arith.constant 26 : i32
    %446 = vector.broadcast %c26_i32_105 : i32 to vector<8x512xi32>
    %447 = arith.shrui %442, %446 : vector<8x512xi32>
    %448 = arith.ori %445, %447 : vector<8x512xi32>
    %449 = arith.xori %448, %443 : vector<8x512xi32>
    %450 = vector.broadcast %c1013904242_i32 : i32 to vector<8x512xi32>
    %451 = arith.addi %443, %450 : vector<8x512xi32>
    %452 = vector.broadcast %418 : i32 to vector<8x512xi32>
    %453 = arith.addi %449, %452 : vector<8x512xi32>
    %c1_i32_106 = arith.constant 1 : i32
    %454 = vector.broadcast %c1_i32_106 : i32 to vector<8x512xi32>
    %455 = arith.addi %453, %454 : vector<8x512xi32>
    %456 = arith.addi %451, %455 : vector<8x512xi32>
    %c17_i32_107 = arith.constant 17 : i32
    %457 = vector.broadcast %c17_i32_107 : i32 to vector<8x512xi32>
    %458 = arith.shli %455, %457 : vector<8x512xi32>
    %c15_i32_108 = arith.constant 15 : i32
    %459 = vector.broadcast %c15_i32_108 : i32 to vector<8x512xi32>
    %460 = arith.shrui %455, %459 : vector<8x512xi32>
    %461 = arith.ori %458, %460 : vector<8x512xi32>
    %462 = arith.xori %461, %456 : vector<8x512xi32>
    %463 = arith.addi %456, %462 : vector<8x512xi32>
    %c29_i32_109 = arith.constant 29 : i32
    %464 = vector.broadcast %c29_i32_109 : i32 to vector<8x512xi32>
    %465 = arith.shli %462, %464 : vector<8x512xi32>
    %c3_i32_110 = arith.constant 3 : i32
    %466 = vector.broadcast %c3_i32_110 : i32 to vector<8x512xi32>
    %467 = arith.shrui %462, %466 : vector<8x512xi32>
    %468 = arith.ori %465, %467 : vector<8x512xi32>
    %469 = arith.xori %468, %463 : vector<8x512xi32>
    %470 = arith.addi %463, %469 : vector<8x512xi32>
    %c16_i32_111 = arith.constant 16 : i32
    %471 = vector.broadcast %c16_i32_111 : i32 to vector<8x512xi32>
    %472 = arith.shli %469, %471 : vector<8x512xi32>
    %c16_i32_112 = arith.constant 16 : i32
    %473 = vector.broadcast %c16_i32_112 : i32 to vector<8x512xi32>
    %474 = arith.shrui %469, %473 : vector<8x512xi32>
    %475 = arith.ori %472, %474 : vector<8x512xi32>
    %476 = arith.xori %475, %470 : vector<8x512xi32>
    %477 = arith.addi %470, %476 : vector<8x512xi32>
    %c24_i32_113 = arith.constant 24 : i32
    %478 = vector.broadcast %c24_i32_113 : i32 to vector<8x512xi32>
    %479 = arith.shli %476, %478 : vector<8x512xi32>
    %c8_i32_114 = arith.constant 8 : i32
    %480 = vector.broadcast %c8_i32_114 : i32 to vector<8x512xi32>
    %481 = arith.shrui %476, %480 : vector<8x512xi32>
    %482 = arith.ori %479, %481 : vector<8x512xi32>
    %483 = arith.xori %482, %477 : vector<8x512xi32>
    %484 = vector.broadcast %418 : i32 to vector<8x512xi32>
    %485 = arith.addi %477, %484 : vector<8x512xi32>
    %486 = vector.broadcast %16 : i32 to vector<8x512xi32>
    %487 = arith.addi %483, %486 : vector<8x512xi32>
    %c2_i32_115 = arith.constant 2 : i32
    %488 = vector.broadcast %c2_i32_115 : i32 to vector<8x512xi32>
    %489 = arith.addi %487, %488 : vector<8x512xi32>
    %490 = arith.addi %485, %489 : vector<8x512xi32>
    %c13_i32_116 = arith.constant 13 : i32
    %491 = vector.broadcast %c13_i32_116 : i32 to vector<8x512xi32>
    %492 = arith.shli %489, %491 : vector<8x512xi32>
    %c19_i32_117 = arith.constant 19 : i32
    %493 = vector.broadcast %c19_i32_117 : i32 to vector<8x512xi32>
    %494 = arith.shrui %489, %493 : vector<8x512xi32>
    %495 = arith.ori %492, %494 : vector<8x512xi32>
    %496 = arith.xori %495, %490 : vector<8x512xi32>
    %497 = arith.addi %490, %496 : vector<8x512xi32>
    %c15_i32_118 = arith.constant 15 : i32
    %498 = vector.broadcast %c15_i32_118 : i32 to vector<8x512xi32>
    %499 = arith.shli %496, %498 : vector<8x512xi32>
    %c17_i32_119 = arith.constant 17 : i32
    %500 = vector.broadcast %c17_i32_119 : i32 to vector<8x512xi32>
    %501 = arith.shrui %496, %500 : vector<8x512xi32>
    %502 = arith.ori %499, %501 : vector<8x512xi32>
    %503 = arith.xori %502, %497 : vector<8x512xi32>
    %504 = arith.addi %497, %503 : vector<8x512xi32>
    %c26_i32_120 = arith.constant 26 : i32
    %505 = vector.broadcast %c26_i32_120 : i32 to vector<8x512xi32>
    %506 = arith.shli %503, %505 : vector<8x512xi32>
    %c6_i32_121 = arith.constant 6 : i32
    %507 = vector.broadcast %c6_i32_121 : i32 to vector<8x512xi32>
    %508 = arith.shrui %503, %507 : vector<8x512xi32>
    %509 = arith.ori %506, %508 : vector<8x512xi32>
    %510 = arith.xori %509, %504 : vector<8x512xi32>
    %511 = arith.addi %504, %510 : vector<8x512xi32>
    %c6_i32_122 = arith.constant 6 : i32
    %512 = vector.broadcast %c6_i32_122 : i32 to vector<8x512xi32>
    %513 = arith.shli %510, %512 : vector<8x512xi32>
    %c26_i32_123 = arith.constant 26 : i32
    %514 = vector.broadcast %c26_i32_123 : i32 to vector<8x512xi32>
    %515 = arith.shrui %510, %514 : vector<8x512xi32>
    %516 = arith.ori %513, %515 : vector<8x512xi32>
    %517 = arith.xori %516, %511 : vector<8x512xi32>
    %518 = vector.broadcast %16 : i32 to vector<8x512xi32>
    %519 = arith.addi %511, %518 : vector<8x512xi32>
    %520 = vector.broadcast %c1013904242_i32 : i32 to vector<8x512xi32>
    %521 = arith.addi %517, %520 : vector<8x512xi32>
    %c3_i32_124 = arith.constant 3 : i32
    %522 = vector.broadcast %c3_i32_124 : i32 to vector<8x512xi32>
    %523 = arith.addi %521, %522 : vector<8x512xi32>
    %524 = arith.addi %519, %523 : vector<8x512xi32>
    %c17_i32_125 = arith.constant 17 : i32
    %525 = vector.broadcast %c17_i32_125 : i32 to vector<8x512xi32>
    %526 = arith.shli %523, %525 : vector<8x512xi32>
    %c15_i32_126 = arith.constant 15 : i32
    %527 = vector.broadcast %c15_i32_126 : i32 to vector<8x512xi32>
    %528 = arith.shrui %523, %527 : vector<8x512xi32>
    %529 = arith.ori %526, %528 : vector<8x512xi32>
    %530 = arith.xori %529, %524 : vector<8x512xi32>
    %531 = arith.addi %524, %530 : vector<8x512xi32>
    %c29_i32_127 = arith.constant 29 : i32
    %532 = vector.broadcast %c29_i32_127 : i32 to vector<8x512xi32>
    %533 = arith.shli %530, %532 : vector<8x512xi32>
    %c3_i32_128 = arith.constant 3 : i32
    %534 = vector.broadcast %c3_i32_128 : i32 to vector<8x512xi32>
    %535 = arith.shrui %530, %534 : vector<8x512xi32>
    %536 = arith.ori %533, %535 : vector<8x512xi32>
    %537 = arith.xori %536, %531 : vector<8x512xi32>
    %538 = arith.addi %531, %537 : vector<8x512xi32>
    %c16_i32_129 = arith.constant 16 : i32
    %539 = vector.broadcast %c16_i32_129 : i32 to vector<8x512xi32>
    %540 = arith.shli %537, %539 : vector<8x512xi32>
    %c16_i32_130 = arith.constant 16 : i32
    %541 = vector.broadcast %c16_i32_130 : i32 to vector<8x512xi32>
    %542 = arith.shrui %537, %541 : vector<8x512xi32>
    %543 = arith.ori %540, %542 : vector<8x512xi32>
    %544 = arith.xori %543, %538 : vector<8x512xi32>
    %545 = arith.addi %538, %544 : vector<8x512xi32>
    %c24_i32_131 = arith.constant 24 : i32
    %546 = vector.broadcast %c24_i32_131 : i32 to vector<8x512xi32>
    %547 = arith.shli %544, %546 : vector<8x512xi32>
    %c8_i32_132 = arith.constant 8 : i32
    %548 = vector.broadcast %c8_i32_132 : i32 to vector<8x512xi32>
    %549 = arith.shrui %544, %548 : vector<8x512xi32>
    %550 = arith.ori %547, %549 : vector<8x512xi32>
    %551 = arith.xori %550, %545 : vector<8x512xi32>
    %552 = vector.broadcast %c1013904242_i32 : i32 to vector<8x512xi32>
    %553 = arith.addi %545, %552 : vector<8x512xi32>
    %554 = vector.broadcast %418 : i32 to vector<8x512xi32>
    %555 = arith.addi %551, %554 : vector<8x512xi32>
    %c4_i32_133 = arith.constant 4 : i32
    %556 = vector.broadcast %c4_i32_133 : i32 to vector<8x512xi32>
    %557 = arith.addi %555, %556 : vector<8x512xi32>
    %558 = arith.addi %553, %557 : vector<8x512xi32>
    %c13_i32_134 = arith.constant 13 : i32
    %559 = vector.broadcast %c13_i32_134 : i32 to vector<8x512xi32>
    %560 = arith.shli %557, %559 : vector<8x512xi32>
    %c19_i32_135 = arith.constant 19 : i32
    %561 = vector.broadcast %c19_i32_135 : i32 to vector<8x512xi32>
    %562 = arith.shrui %557, %561 : vector<8x512xi32>
    %563 = arith.ori %560, %562 : vector<8x512xi32>
    %564 = arith.xori %563, %558 : vector<8x512xi32>
    %565 = arith.addi %558, %564 : vector<8x512xi32>
    %c15_i32_136 = arith.constant 15 : i32
    %566 = vector.broadcast %c15_i32_136 : i32 to vector<8x512xi32>
    %567 = arith.shli %564, %566 : vector<8x512xi32>
    %c17_i32_137 = arith.constant 17 : i32
    %568 = vector.broadcast %c17_i32_137 : i32 to vector<8x512xi32>
    %569 = arith.shrui %564, %568 : vector<8x512xi32>
    %570 = arith.ori %567, %569 : vector<8x512xi32>
    %571 = arith.xori %570, %565 : vector<8x512xi32>
    %572 = arith.addi %565, %571 : vector<8x512xi32>
    %c26_i32_138 = arith.constant 26 : i32
    %573 = vector.broadcast %c26_i32_138 : i32 to vector<8x512xi32>
    %574 = arith.shli %571, %573 : vector<8x512xi32>
    %c6_i32_139 = arith.constant 6 : i32
    %575 = vector.broadcast %c6_i32_139 : i32 to vector<8x512xi32>
    %576 = arith.shrui %571, %575 : vector<8x512xi32>
    %577 = arith.ori %574, %576 : vector<8x512xi32>
    %578 = arith.xori %577, %572 : vector<8x512xi32>
    %579 = arith.addi %572, %578 : vector<8x512xi32>
    %c6_i32_140 = arith.constant 6 : i32
    %580 = vector.broadcast %c6_i32_140 : i32 to vector<8x512xi32>
    %581 = arith.shli %578, %580 : vector<8x512xi32>
    %c26_i32_141 = arith.constant 26 : i32
    %582 = vector.broadcast %c26_i32_141 : i32 to vector<8x512xi32>
    %583 = arith.shrui %578, %582 : vector<8x512xi32>
    %584 = arith.ori %581, %583 : vector<8x512xi32>
    %585 = arith.xori %584, %579 : vector<8x512xi32>
    %586 = vector.broadcast %418 : i32 to vector<8x512xi32>
    %587 = arith.addi %579, %586 : vector<8x512xi32>
    %588 = vector.broadcast %16 : i32 to vector<8x512xi32>
    %589 = arith.addi %585, %588 : vector<8x512xi32>
    %c5_i32_142 = arith.constant 5 : i32
    %590 = vector.broadcast %c5_i32_142 : i32 to vector<8x512xi32>
    %591 = arith.addi %589, %590 : vector<8x512xi32>
    %c8_i32_143 = arith.constant 8 : i32
    %592 = vector.broadcast %c8_i32_143 : i32 to vector<8x512xi32>
    %593 = arith.shrui %587, %592 : vector<8x512xi32>
    %594 = arith.sitofp %593 : vector<8x512xi32> to vector<8x512xf32>
    %cst_144 = arith.constant 1.000000e+00 : f32
    %595 = vector.broadcast %cst_144 : f32 to vector<8x512xf32>
    %596 = arith.addf %594, %595 : vector<8x512xf32>
    %cst_145 = arith.constant 5.96046448E-8 : f32
    %597 = vector.broadcast %cst_145 : f32 to vector<8x512xf32>
    %598 = arith.mulf %596, %597 : vector<8x512xf32>
    %c8_i32_146 = arith.constant 8 : i32
    %599 = vector.broadcast %c8_i32_146 : i32 to vector<8x512xi32>
    %600 = arith.shrui %591, %599 : vector<8x512xi32>
    %601 = arith.sitofp %600 : vector<8x512xi32> to vector<8x512xf32>
    %cst_147 = arith.constant 1.000000e+00 : f32
    %602 = vector.broadcast %cst_147 : f32 to vector<8x512xf32>
    %603 = arith.addf %601, %602 : vector<8x512xf32>
    %cst_148 = arith.constant 5.96046448E-8 : f32
    %604 = vector.broadcast %cst_148 : f32 to vector<8x512xf32>
    %605 = arith.mulf %603, %604 : vector<8x512xf32>
    %606 = arith.mulf %412, %598 : vector<8x512xf32>
    %607 = arith.cmpf ogt, %606, %7 : vector<8x512xf32>
    %608 = arith.extui %607 : vector<8x512xi1> to vector<8x512xi32>
    %609 = arith.sitofp %608 : vector<8x512xi32> to vector<8x512xf32>
    %610 = arith.addf %416, %609 : vector<8x512xf32>
    %611 = arith.mulf %606, %605 : vector<8x512xf32>
    %612 = arith.cmpf ogt, %611, %7 : vector<8x512xf32>
    %613 = arith.extui %612 : vector<8x512xi1> to vector<8x512xi32>
    %614 = arith.sitofp %613 : vector<8x512xi32> to vector<8x512xf32>
    %615 = arith.addf %610, %614 : vector<8x512xf32>
    %c3_i32_149 = arith.constant 3 : i32
    %616 = arith.xori %16, %c1013904242_i32 : i32
    %c466688986_i32_150 = arith.constant 466688986 : i32
    %617 = arith.xori %616, %c466688986_i32_150 : i32
    %618 = vector.broadcast %16 : i32 to vector<8x512xi32>
    %619 = arith.addi %15, %618 : vector<8x512xi32>
    %620 = arith.addi %c3_i32_149, %c1013904242_i32 : i32
    %621 = vector.broadcast %620 : i32 to vector<8x512xi32>
    %622 = arith.addi %619, %621 : vector<8x512xi32>
    %c13_i32_151 = arith.constant 13 : i32
    %623 = arith.shli %620, %c13_i32_151 : i32
    %c19_i32_152 = arith.constant 19 : i32
    %624 = arith.shrui %620, %c19_i32_152 : i32
    %625 = arith.ori %623, %624 : i32
    %626 = vector.broadcast %625 : i32 to vector<8x512xi32>
    %627 = arith.xori %626, %622 : vector<8x512xi32>
    %628 = arith.addi %622, %627 : vector<8x512xi32>
    %c15_i32_153 = arith.constant 15 : i32
    %629 = vector.broadcast %c15_i32_153 : i32 to vector<8x512xi32>
    %630 = arith.shli %627, %629 : vector<8x512xi32>
    %c17_i32_154 = arith.constant 17 : i32
    %631 = vector.broadcast %c17_i32_154 : i32 to vector<8x512xi32>
    %632 = arith.shrui %627, %631 : vector<8x512xi32>
    %633 = arith.ori %630, %632 : vector<8x512xi32>
    %634 = arith.xori %633, %628 : vector<8x512xi32>
    %635 = arith.addi %628, %634 : vector<8x512xi32>
    %c26_i32_155 = arith.constant 26 : i32
    %636 = vector.broadcast %c26_i32_155 : i32 to vector<8x512xi32>
    %637 = arith.shli %634, %636 : vector<8x512xi32>
    %c6_i32_156 = arith.constant 6 : i32
    %638 = vector.broadcast %c6_i32_156 : i32 to vector<8x512xi32>
    %639 = arith.shrui %634, %638 : vector<8x512xi32>
    %640 = arith.ori %637, %639 : vector<8x512xi32>
    %641 = arith.xori %640, %635 : vector<8x512xi32>
    %642 = arith.addi %635, %641 : vector<8x512xi32>
    %c6_i32_157 = arith.constant 6 : i32
    %643 = vector.broadcast %c6_i32_157 : i32 to vector<8x512xi32>
    %644 = arith.shli %641, %643 : vector<8x512xi32>
    %c26_i32_158 = arith.constant 26 : i32
    %645 = vector.broadcast %c26_i32_158 : i32 to vector<8x512xi32>
    %646 = arith.shrui %641, %645 : vector<8x512xi32>
    %647 = arith.ori %644, %646 : vector<8x512xi32>
    %648 = arith.xori %647, %642 : vector<8x512xi32>
    %649 = vector.broadcast %c1013904242_i32 : i32 to vector<8x512xi32>
    %650 = arith.addi %642, %649 : vector<8x512xi32>
    %651 = vector.broadcast %617 : i32 to vector<8x512xi32>
    %652 = arith.addi %648, %651 : vector<8x512xi32>
    %c1_i32_159 = arith.constant 1 : i32
    %653 = vector.broadcast %c1_i32_159 : i32 to vector<8x512xi32>
    %654 = arith.addi %652, %653 : vector<8x512xi32>
    %655 = arith.addi %650, %654 : vector<8x512xi32>
    %c17_i32_160 = arith.constant 17 : i32
    %656 = vector.broadcast %c17_i32_160 : i32 to vector<8x512xi32>
    %657 = arith.shli %654, %656 : vector<8x512xi32>
    %c15_i32_161 = arith.constant 15 : i32
    %658 = vector.broadcast %c15_i32_161 : i32 to vector<8x512xi32>
    %659 = arith.shrui %654, %658 : vector<8x512xi32>
    %660 = arith.ori %657, %659 : vector<8x512xi32>
    %661 = arith.xori %660, %655 : vector<8x512xi32>
    %662 = arith.addi %655, %661 : vector<8x512xi32>
    %c29_i32_162 = arith.constant 29 : i32
    %663 = vector.broadcast %c29_i32_162 : i32 to vector<8x512xi32>
    %664 = arith.shli %661, %663 : vector<8x512xi32>
    %c3_i32_163 = arith.constant 3 : i32
    %665 = vector.broadcast %c3_i32_163 : i32 to vector<8x512xi32>
    %666 = arith.shrui %661, %665 : vector<8x512xi32>
    %667 = arith.ori %664, %666 : vector<8x512xi32>
    %668 = arith.xori %667, %662 : vector<8x512xi32>
    %669 = arith.addi %662, %668 : vector<8x512xi32>
    %c16_i32_164 = arith.constant 16 : i32
    %670 = vector.broadcast %c16_i32_164 : i32 to vector<8x512xi32>
    %671 = arith.shli %668, %670 : vector<8x512xi32>
    %c16_i32_165 = arith.constant 16 : i32
    %672 = vector.broadcast %c16_i32_165 : i32 to vector<8x512xi32>
    %673 = arith.shrui %668, %672 : vector<8x512xi32>
    %674 = arith.ori %671, %673 : vector<8x512xi32>
    %675 = arith.xori %674, %669 : vector<8x512xi32>
    %676 = arith.addi %669, %675 : vector<8x512xi32>
    %c24_i32_166 = arith.constant 24 : i32
    %677 = vector.broadcast %c24_i32_166 : i32 to vector<8x512xi32>
    %678 = arith.shli %675, %677 : vector<8x512xi32>
    %c8_i32_167 = arith.constant 8 : i32
    %679 = vector.broadcast %c8_i32_167 : i32 to vector<8x512xi32>
    %680 = arith.shrui %675, %679 : vector<8x512xi32>
    %681 = arith.ori %678, %680 : vector<8x512xi32>
    %682 = arith.xori %681, %676 : vector<8x512xi32>
    %683 = vector.broadcast %617 : i32 to vector<8x512xi32>
    %684 = arith.addi %676, %683 : vector<8x512xi32>
    %685 = vector.broadcast %16 : i32 to vector<8x512xi32>
    %686 = arith.addi %682, %685 : vector<8x512xi32>
    %c2_i32_168 = arith.constant 2 : i32
    %687 = vector.broadcast %c2_i32_168 : i32 to vector<8x512xi32>
    %688 = arith.addi %686, %687 : vector<8x512xi32>
    %689 = arith.addi %684, %688 : vector<8x512xi32>
    %c13_i32_169 = arith.constant 13 : i32
    %690 = vector.broadcast %c13_i32_169 : i32 to vector<8x512xi32>
    %691 = arith.shli %688, %690 : vector<8x512xi32>
    %c19_i32_170 = arith.constant 19 : i32
    %692 = vector.broadcast %c19_i32_170 : i32 to vector<8x512xi32>
    %693 = arith.shrui %688, %692 : vector<8x512xi32>
    %694 = arith.ori %691, %693 : vector<8x512xi32>
    %695 = arith.xori %694, %689 : vector<8x512xi32>
    %696 = arith.addi %689, %695 : vector<8x512xi32>
    %c15_i32_171 = arith.constant 15 : i32
    %697 = vector.broadcast %c15_i32_171 : i32 to vector<8x512xi32>
    %698 = arith.shli %695, %697 : vector<8x512xi32>
    %c17_i32_172 = arith.constant 17 : i32
    %699 = vector.broadcast %c17_i32_172 : i32 to vector<8x512xi32>
    %700 = arith.shrui %695, %699 : vector<8x512xi32>
    %701 = arith.ori %698, %700 : vector<8x512xi32>
    %702 = arith.xori %701, %696 : vector<8x512xi32>
    %703 = arith.addi %696, %702 : vector<8x512xi32>
    %c26_i32_173 = arith.constant 26 : i32
    %704 = vector.broadcast %c26_i32_173 : i32 to vector<8x512xi32>
    %705 = arith.shli %702, %704 : vector<8x512xi32>
    %c6_i32_174 = arith.constant 6 : i32
    %706 = vector.broadcast %c6_i32_174 : i32 to vector<8x512xi32>
    %707 = arith.shrui %702, %706 : vector<8x512xi32>
    %708 = arith.ori %705, %707 : vector<8x512xi32>
    %709 = arith.xori %708, %703 : vector<8x512xi32>
    %710 = arith.addi %703, %709 : vector<8x512xi32>
    %c6_i32_175 = arith.constant 6 : i32
    %711 = vector.broadcast %c6_i32_175 : i32 to vector<8x512xi32>
    %712 = arith.shli %709, %711 : vector<8x512xi32>
    %c26_i32_176 = arith.constant 26 : i32
    %713 = vector.broadcast %c26_i32_176 : i32 to vector<8x512xi32>
    %714 = arith.shrui %709, %713 : vector<8x512xi32>
    %715 = arith.ori %712, %714 : vector<8x512xi32>
    %716 = arith.xori %715, %710 : vector<8x512xi32>
    %717 = vector.broadcast %16 : i32 to vector<8x512xi32>
    %718 = arith.addi %710, %717 : vector<8x512xi32>
    %719 = vector.broadcast %c1013904242_i32 : i32 to vector<8x512xi32>
    %720 = arith.addi %716, %719 : vector<8x512xi32>
    %c3_i32_177 = arith.constant 3 : i32
    %721 = vector.broadcast %c3_i32_177 : i32 to vector<8x512xi32>
    %722 = arith.addi %720, %721 : vector<8x512xi32>
    %723 = arith.addi %718, %722 : vector<8x512xi32>
    %c17_i32_178 = arith.constant 17 : i32
    %724 = vector.broadcast %c17_i32_178 : i32 to vector<8x512xi32>
    %725 = arith.shli %722, %724 : vector<8x512xi32>
    %c15_i32_179 = arith.constant 15 : i32
    %726 = vector.broadcast %c15_i32_179 : i32 to vector<8x512xi32>
    %727 = arith.shrui %722, %726 : vector<8x512xi32>
    %728 = arith.ori %725, %727 : vector<8x512xi32>
    %729 = arith.xori %728, %723 : vector<8x512xi32>
    %730 = arith.addi %723, %729 : vector<8x512xi32>
    %c29_i32_180 = arith.constant 29 : i32
    %731 = vector.broadcast %c29_i32_180 : i32 to vector<8x512xi32>
    %732 = arith.shli %729, %731 : vector<8x512xi32>
    %c3_i32_181 = arith.constant 3 : i32
    %733 = vector.broadcast %c3_i32_181 : i32 to vector<8x512xi32>
    %734 = arith.shrui %729, %733 : vector<8x512xi32>
    %735 = arith.ori %732, %734 : vector<8x512xi32>
    %736 = arith.xori %735, %730 : vector<8x512xi32>
    %737 = arith.addi %730, %736 : vector<8x512xi32>
    %c16_i32_182 = arith.constant 16 : i32
    %738 = vector.broadcast %c16_i32_182 : i32 to vector<8x512xi32>
    %739 = arith.shli %736, %738 : vector<8x512xi32>
    %c16_i32_183 = arith.constant 16 : i32
    %740 = vector.broadcast %c16_i32_183 : i32 to vector<8x512xi32>
    %741 = arith.shrui %736, %740 : vector<8x512xi32>
    %742 = arith.ori %739, %741 : vector<8x512xi32>
    %743 = arith.xori %742, %737 : vector<8x512xi32>
    %744 = arith.addi %737, %743 : vector<8x512xi32>
    %c24_i32_184 = arith.constant 24 : i32
    %745 = vector.broadcast %c24_i32_184 : i32 to vector<8x512xi32>
    %746 = arith.shli %743, %745 : vector<8x512xi32>
    %c8_i32_185 = arith.constant 8 : i32
    %747 = vector.broadcast %c8_i32_185 : i32 to vector<8x512xi32>
    %748 = arith.shrui %743, %747 : vector<8x512xi32>
    %749 = arith.ori %746, %748 : vector<8x512xi32>
    %750 = arith.xori %749, %744 : vector<8x512xi32>
    %751 = vector.broadcast %c1013904242_i32 : i32 to vector<8x512xi32>
    %752 = arith.addi %744, %751 : vector<8x512xi32>
    %753 = vector.broadcast %617 : i32 to vector<8x512xi32>
    %754 = arith.addi %750, %753 : vector<8x512xi32>
    %c4_i32_186 = arith.constant 4 : i32
    %755 = vector.broadcast %c4_i32_186 : i32 to vector<8x512xi32>
    %756 = arith.addi %754, %755 : vector<8x512xi32>
    %757 = arith.addi %752, %756 : vector<8x512xi32>
    %c13_i32_187 = arith.constant 13 : i32
    %758 = vector.broadcast %c13_i32_187 : i32 to vector<8x512xi32>
    %759 = arith.shli %756, %758 : vector<8x512xi32>
    %c19_i32_188 = arith.constant 19 : i32
    %760 = vector.broadcast %c19_i32_188 : i32 to vector<8x512xi32>
    %761 = arith.shrui %756, %760 : vector<8x512xi32>
    %762 = arith.ori %759, %761 : vector<8x512xi32>
    %763 = arith.xori %762, %757 : vector<8x512xi32>
    %764 = arith.addi %757, %763 : vector<8x512xi32>
    %c15_i32_189 = arith.constant 15 : i32
    %765 = vector.broadcast %c15_i32_189 : i32 to vector<8x512xi32>
    %766 = arith.shli %763, %765 : vector<8x512xi32>
    %c17_i32_190 = arith.constant 17 : i32
    %767 = vector.broadcast %c17_i32_190 : i32 to vector<8x512xi32>
    %768 = arith.shrui %763, %767 : vector<8x512xi32>
    %769 = arith.ori %766, %768 : vector<8x512xi32>
    %770 = arith.xori %769, %764 : vector<8x512xi32>
    %771 = arith.addi %764, %770 : vector<8x512xi32>
    %c26_i32_191 = arith.constant 26 : i32
    %772 = vector.broadcast %c26_i32_191 : i32 to vector<8x512xi32>
    %773 = arith.shli %770, %772 : vector<8x512xi32>
    %c6_i32_192 = arith.constant 6 : i32
    %774 = vector.broadcast %c6_i32_192 : i32 to vector<8x512xi32>
    %775 = arith.shrui %770, %774 : vector<8x512xi32>
    %776 = arith.ori %773, %775 : vector<8x512xi32>
    %777 = arith.xori %776, %771 : vector<8x512xi32>
    %778 = arith.addi %771, %777 : vector<8x512xi32>
    %c6_i32_193 = arith.constant 6 : i32
    %779 = vector.broadcast %c6_i32_193 : i32 to vector<8x512xi32>
    %780 = arith.shli %777, %779 : vector<8x512xi32>
    %c26_i32_194 = arith.constant 26 : i32
    %781 = vector.broadcast %c26_i32_194 : i32 to vector<8x512xi32>
    %782 = arith.shrui %777, %781 : vector<8x512xi32>
    %783 = arith.ori %780, %782 : vector<8x512xi32>
    %784 = arith.xori %783, %778 : vector<8x512xi32>
    %785 = vector.broadcast %617 : i32 to vector<8x512xi32>
    %786 = arith.addi %778, %785 : vector<8x512xi32>
    %787 = vector.broadcast %16 : i32 to vector<8x512xi32>
    %788 = arith.addi %784, %787 : vector<8x512xi32>
    %c5_i32_195 = arith.constant 5 : i32
    %789 = vector.broadcast %c5_i32_195 : i32 to vector<8x512xi32>
    %790 = arith.addi %788, %789 : vector<8x512xi32>
    %c8_i32_196 = arith.constant 8 : i32
    %791 = vector.broadcast %c8_i32_196 : i32 to vector<8x512xi32>
    %792 = arith.shrui %786, %791 : vector<8x512xi32>
    %793 = arith.sitofp %792 : vector<8x512xi32> to vector<8x512xf32>
    %cst_197 = arith.constant 1.000000e+00 : f32
    %794 = vector.broadcast %cst_197 : f32 to vector<8x512xf32>
    %795 = arith.addf %793, %794 : vector<8x512xf32>
    %cst_198 = arith.constant 5.96046448E-8 : f32
    %796 = vector.broadcast %cst_198 : f32 to vector<8x512xf32>
    %797 = arith.mulf %795, %796 : vector<8x512xf32>
    %c8_i32_199 = arith.constant 8 : i32
    %798 = vector.broadcast %c8_i32_199 : i32 to vector<8x512xi32>
    %799 = arith.shrui %790, %798 : vector<8x512xi32>
    %800 = arith.sitofp %799 : vector<8x512xi32> to vector<8x512xf32>
    %cst_200 = arith.constant 1.000000e+00 : f32
    %801 = vector.broadcast %cst_200 : f32 to vector<8x512xf32>
    %802 = arith.addf %800, %801 : vector<8x512xf32>
    %cst_201 = arith.constant 5.96046448E-8 : f32
    %803 = vector.broadcast %cst_201 : f32 to vector<8x512xf32>
    %804 = arith.mulf %802, %803 : vector<8x512xf32>
    %805 = arith.mulf %611, %797 : vector<8x512xf32>
    %806 = arith.cmpf ogt, %805, %7 : vector<8x512xf32>
    %807 = arith.extui %806 : vector<8x512xi1> to vector<8x512xi32>
    %808 = arith.sitofp %807 : vector<8x512xi32> to vector<8x512xf32>
    %809 = arith.addf %615, %808 : vector<8x512xf32>
    %810 = arith.mulf %805, %804 : vector<8x512xf32>
    %811 = arith.cmpf ogt, %810, %7 : vector<8x512xf32>
    %812 = arith.extui %811 : vector<8x512xi1> to vector<8x512xi32>
    %813 = arith.sitofp %812 : vector<8x512xi32> to vector<8x512xf32>
    %814 = arith.addf %809, %813 : vector<8x512xf32>
    %c4_i32_202 = arith.constant 4 : i32
    %815 = arith.xori %16, %c1013904242_i32 : i32
    %c466688986_i32_203 = arith.constant 466688986 : i32
    %816 = arith.xori %815, %c466688986_i32_203 : i32
    %817 = vector.broadcast %16 : i32 to vector<8x512xi32>
    %818 = arith.addi %15, %817 : vector<8x512xi32>
    %819 = arith.addi %c4_i32_202, %c1013904242_i32 : i32
    %820 = vector.broadcast %819 : i32 to vector<8x512xi32>
    %821 = arith.addi %818, %820 : vector<8x512xi32>
    %c13_i32_204 = arith.constant 13 : i32
    %822 = arith.shli %819, %c13_i32_204 : i32
    %c19_i32_205 = arith.constant 19 : i32
    %823 = arith.shrui %819, %c19_i32_205 : i32
    %824 = arith.ori %822, %823 : i32
    %825 = vector.broadcast %824 : i32 to vector<8x512xi32>
    %826 = arith.xori %825, %821 : vector<8x512xi32>
    %827 = arith.addi %821, %826 : vector<8x512xi32>
    %c15_i32_206 = arith.constant 15 : i32
    %828 = vector.broadcast %c15_i32_206 : i32 to vector<8x512xi32>
    %829 = arith.shli %826, %828 : vector<8x512xi32>
    %c17_i32_207 = arith.constant 17 : i32
    %830 = vector.broadcast %c17_i32_207 : i32 to vector<8x512xi32>
    %831 = arith.shrui %826, %830 : vector<8x512xi32>
    %832 = arith.ori %829, %831 : vector<8x512xi32>
    %833 = arith.xori %832, %827 : vector<8x512xi32>
    %834 = arith.addi %827, %833 : vector<8x512xi32>
    %c26_i32_208 = arith.constant 26 : i32
    %835 = vector.broadcast %c26_i32_208 : i32 to vector<8x512xi32>
    %836 = arith.shli %833, %835 : vector<8x512xi32>
    %c6_i32_209 = arith.constant 6 : i32
    %837 = vector.broadcast %c6_i32_209 : i32 to vector<8x512xi32>
    %838 = arith.shrui %833, %837 : vector<8x512xi32>
    %839 = arith.ori %836, %838 : vector<8x512xi32>
    %840 = arith.xori %839, %834 : vector<8x512xi32>
    %841 = arith.addi %834, %840 : vector<8x512xi32>
    %c6_i32_210 = arith.constant 6 : i32
    %842 = vector.broadcast %c6_i32_210 : i32 to vector<8x512xi32>
    %843 = arith.shli %840, %842 : vector<8x512xi32>
    %c26_i32_211 = arith.constant 26 : i32
    %844 = vector.broadcast %c26_i32_211 : i32 to vector<8x512xi32>
    %845 = arith.shrui %840, %844 : vector<8x512xi32>
    %846 = arith.ori %843, %845 : vector<8x512xi32>
    %847 = arith.xori %846, %841 : vector<8x512xi32>
    %848 = vector.broadcast %c1013904242_i32 : i32 to vector<8x512xi32>
    %849 = arith.addi %841, %848 : vector<8x512xi32>
    %850 = vector.broadcast %816 : i32 to vector<8x512xi32>
    %851 = arith.addi %847, %850 : vector<8x512xi32>
    %c1_i32_212 = arith.constant 1 : i32
    %852 = vector.broadcast %c1_i32_212 : i32 to vector<8x512xi32>
    %853 = arith.addi %851, %852 : vector<8x512xi32>
    %854 = arith.addi %849, %853 : vector<8x512xi32>
    %c17_i32_213 = arith.constant 17 : i32
    %855 = vector.broadcast %c17_i32_213 : i32 to vector<8x512xi32>
    %856 = arith.shli %853, %855 : vector<8x512xi32>
    %c15_i32_214 = arith.constant 15 : i32
    %857 = vector.broadcast %c15_i32_214 : i32 to vector<8x512xi32>
    %858 = arith.shrui %853, %857 : vector<8x512xi32>
    %859 = arith.ori %856, %858 : vector<8x512xi32>
    %860 = arith.xori %859, %854 : vector<8x512xi32>
    %861 = arith.addi %854, %860 : vector<8x512xi32>
    %c29_i32_215 = arith.constant 29 : i32
    %862 = vector.broadcast %c29_i32_215 : i32 to vector<8x512xi32>
    %863 = arith.shli %860, %862 : vector<8x512xi32>
    %c3_i32_216 = arith.constant 3 : i32
    %864 = vector.broadcast %c3_i32_216 : i32 to vector<8x512xi32>
    %865 = arith.shrui %860, %864 : vector<8x512xi32>
    %866 = arith.ori %863, %865 : vector<8x512xi32>
    %867 = arith.xori %866, %861 : vector<8x512xi32>
    %868 = arith.addi %861, %867 : vector<8x512xi32>
    %c16_i32_217 = arith.constant 16 : i32
    %869 = vector.broadcast %c16_i32_217 : i32 to vector<8x512xi32>
    %870 = arith.shli %867, %869 : vector<8x512xi32>
    %c16_i32_218 = arith.constant 16 : i32
    %871 = vector.broadcast %c16_i32_218 : i32 to vector<8x512xi32>
    %872 = arith.shrui %867, %871 : vector<8x512xi32>
    %873 = arith.ori %870, %872 : vector<8x512xi32>
    %874 = arith.xori %873, %868 : vector<8x512xi32>
    %875 = arith.addi %868, %874 : vector<8x512xi32>
    %c24_i32_219 = arith.constant 24 : i32
    %876 = vector.broadcast %c24_i32_219 : i32 to vector<8x512xi32>
    %877 = arith.shli %874, %876 : vector<8x512xi32>
    %c8_i32_220 = arith.constant 8 : i32
    %878 = vector.broadcast %c8_i32_220 : i32 to vector<8x512xi32>
    %879 = arith.shrui %874, %878 : vector<8x512xi32>
    %880 = arith.ori %877, %879 : vector<8x512xi32>
    %881 = arith.xori %880, %875 : vector<8x512xi32>
    %882 = vector.broadcast %816 : i32 to vector<8x512xi32>
    %883 = arith.addi %875, %882 : vector<8x512xi32>
    %884 = vector.broadcast %16 : i32 to vector<8x512xi32>
    %885 = arith.addi %881, %884 : vector<8x512xi32>
    %c2_i32_221 = arith.constant 2 : i32
    %886 = vector.broadcast %c2_i32_221 : i32 to vector<8x512xi32>
    %887 = arith.addi %885, %886 : vector<8x512xi32>
    %888 = arith.addi %883, %887 : vector<8x512xi32>
    %c13_i32_222 = arith.constant 13 : i32
    %889 = vector.broadcast %c13_i32_222 : i32 to vector<8x512xi32>
    %890 = arith.shli %887, %889 : vector<8x512xi32>
    %c19_i32_223 = arith.constant 19 : i32
    %891 = vector.broadcast %c19_i32_223 : i32 to vector<8x512xi32>
    %892 = arith.shrui %887, %891 : vector<8x512xi32>
    %893 = arith.ori %890, %892 : vector<8x512xi32>
    %894 = arith.xori %893, %888 : vector<8x512xi32>
    %895 = arith.addi %888, %894 : vector<8x512xi32>
    %c15_i32_224 = arith.constant 15 : i32
    %896 = vector.broadcast %c15_i32_224 : i32 to vector<8x512xi32>
    %897 = arith.shli %894, %896 : vector<8x512xi32>
    %c17_i32_225 = arith.constant 17 : i32
    %898 = vector.broadcast %c17_i32_225 : i32 to vector<8x512xi32>
    %899 = arith.shrui %894, %898 : vector<8x512xi32>
    %900 = arith.ori %897, %899 : vector<8x512xi32>
    %901 = arith.xori %900, %895 : vector<8x512xi32>
    %902 = arith.addi %895, %901 : vector<8x512xi32>
    %c26_i32_226 = arith.constant 26 : i32
    %903 = vector.broadcast %c26_i32_226 : i32 to vector<8x512xi32>
    %904 = arith.shli %901, %903 : vector<8x512xi32>
    %c6_i32_227 = arith.constant 6 : i32
    %905 = vector.broadcast %c6_i32_227 : i32 to vector<8x512xi32>
    %906 = arith.shrui %901, %905 : vector<8x512xi32>
    %907 = arith.ori %904, %906 : vector<8x512xi32>
    %908 = arith.xori %907, %902 : vector<8x512xi32>
    %909 = arith.addi %902, %908 : vector<8x512xi32>
    %c6_i32_228 = arith.constant 6 : i32
    %910 = vector.broadcast %c6_i32_228 : i32 to vector<8x512xi32>
    %911 = arith.shli %908, %910 : vector<8x512xi32>
    %c26_i32_229 = arith.constant 26 : i32
    %912 = vector.broadcast %c26_i32_229 : i32 to vector<8x512xi32>
    %913 = arith.shrui %908, %912 : vector<8x512xi32>
    %914 = arith.ori %911, %913 : vector<8x512xi32>
    %915 = arith.xori %914, %909 : vector<8x512xi32>
    %916 = vector.broadcast %16 : i32 to vector<8x512xi32>
    %917 = arith.addi %909, %916 : vector<8x512xi32>
    %918 = vector.broadcast %c1013904242_i32 : i32 to vector<8x512xi32>
    %919 = arith.addi %915, %918 : vector<8x512xi32>
    %c3_i32_230 = arith.constant 3 : i32
    %920 = vector.broadcast %c3_i32_230 : i32 to vector<8x512xi32>
    %921 = arith.addi %919, %920 : vector<8x512xi32>
    %922 = arith.addi %917, %921 : vector<8x512xi32>
    %c17_i32_231 = arith.constant 17 : i32
    %923 = vector.broadcast %c17_i32_231 : i32 to vector<8x512xi32>
    %924 = arith.shli %921, %923 : vector<8x512xi32>
    %c15_i32_232 = arith.constant 15 : i32
    %925 = vector.broadcast %c15_i32_232 : i32 to vector<8x512xi32>
    %926 = arith.shrui %921, %925 : vector<8x512xi32>
    %927 = arith.ori %924, %926 : vector<8x512xi32>
    %928 = arith.xori %927, %922 : vector<8x512xi32>
    %929 = arith.addi %922, %928 : vector<8x512xi32>
    %c29_i32_233 = arith.constant 29 : i32
    %930 = vector.broadcast %c29_i32_233 : i32 to vector<8x512xi32>
    %931 = arith.shli %928, %930 : vector<8x512xi32>
    %c3_i32_234 = arith.constant 3 : i32
    %932 = vector.broadcast %c3_i32_234 : i32 to vector<8x512xi32>
    %933 = arith.shrui %928, %932 : vector<8x512xi32>
    %934 = arith.ori %931, %933 : vector<8x512xi32>
    %935 = arith.xori %934, %929 : vector<8x512xi32>
    %936 = arith.addi %929, %935 : vector<8x512xi32>
    %c16_i32_235 = arith.constant 16 : i32
    %937 = vector.broadcast %c16_i32_235 : i32 to vector<8x512xi32>
    %938 = arith.shli %935, %937 : vector<8x512xi32>
    %c16_i32_236 = arith.constant 16 : i32
    %939 = vector.broadcast %c16_i32_236 : i32 to vector<8x512xi32>
    %940 = arith.shrui %935, %939 : vector<8x512xi32>
    %941 = arith.ori %938, %940 : vector<8x512xi32>
    %942 = arith.xori %941, %936 : vector<8x512xi32>
    %943 = arith.addi %936, %942 : vector<8x512xi32>
    %c24_i32_237 = arith.constant 24 : i32
    %944 = vector.broadcast %c24_i32_237 : i32 to vector<8x512xi32>
    %945 = arith.shli %942, %944 : vector<8x512xi32>
    %c8_i32_238 = arith.constant 8 : i32
    %946 = vector.broadcast %c8_i32_238 : i32 to vector<8x512xi32>
    %947 = arith.shrui %942, %946 : vector<8x512xi32>
    %948 = arith.ori %945, %947 : vector<8x512xi32>
    %949 = arith.xori %948, %943 : vector<8x512xi32>
    %950 = vector.broadcast %c1013904242_i32 : i32 to vector<8x512xi32>
    %951 = arith.addi %943, %950 : vector<8x512xi32>
    %952 = vector.broadcast %816 : i32 to vector<8x512xi32>
    %953 = arith.addi %949, %952 : vector<8x512xi32>
    %c4_i32_239 = arith.constant 4 : i32
    %954 = vector.broadcast %c4_i32_239 : i32 to vector<8x512xi32>
    %955 = arith.addi %953, %954 : vector<8x512xi32>
    %956 = arith.addi %951, %955 : vector<8x512xi32>
    %c13_i32_240 = arith.constant 13 : i32
    %957 = vector.broadcast %c13_i32_240 : i32 to vector<8x512xi32>
    %958 = arith.shli %955, %957 : vector<8x512xi32>
    %c19_i32_241 = arith.constant 19 : i32
    %959 = vector.broadcast %c19_i32_241 : i32 to vector<8x512xi32>
    %960 = arith.shrui %955, %959 : vector<8x512xi32>
    %961 = arith.ori %958, %960 : vector<8x512xi32>
    %962 = arith.xori %961, %956 : vector<8x512xi32>
    %963 = arith.addi %956, %962 : vector<8x512xi32>
    %c15_i32_242 = arith.constant 15 : i32
    %964 = vector.broadcast %c15_i32_242 : i32 to vector<8x512xi32>
    %965 = arith.shli %962, %964 : vector<8x512xi32>
    %c17_i32_243 = arith.constant 17 : i32
    %966 = vector.broadcast %c17_i32_243 : i32 to vector<8x512xi32>
    %967 = arith.shrui %962, %966 : vector<8x512xi32>
    %968 = arith.ori %965, %967 : vector<8x512xi32>
    %969 = arith.xori %968, %963 : vector<8x512xi32>
    %970 = arith.addi %963, %969 : vector<8x512xi32>
    %c26_i32_244 = arith.constant 26 : i32
    %971 = vector.broadcast %c26_i32_244 : i32 to vector<8x512xi32>
    %972 = arith.shli %969, %971 : vector<8x512xi32>
    %c6_i32_245 = arith.constant 6 : i32
    %973 = vector.broadcast %c6_i32_245 : i32 to vector<8x512xi32>
    %974 = arith.shrui %969, %973 : vector<8x512xi32>
    %975 = arith.ori %972, %974 : vector<8x512xi32>
    %976 = arith.xori %975, %970 : vector<8x512xi32>
    %977 = arith.addi %970, %976 : vector<8x512xi32>
    %c6_i32_246 = arith.constant 6 : i32
    %978 = vector.broadcast %c6_i32_246 : i32 to vector<8x512xi32>
    %979 = arith.shli %976, %978 : vector<8x512xi32>
    %c26_i32_247 = arith.constant 26 : i32
    %980 = vector.broadcast %c26_i32_247 : i32 to vector<8x512xi32>
    %981 = arith.shrui %976, %980 : vector<8x512xi32>
    %982 = arith.ori %979, %981 : vector<8x512xi32>
    %983 = arith.xori %982, %977 : vector<8x512xi32>
    %984 = vector.broadcast %816 : i32 to vector<8x512xi32>
    %985 = arith.addi %977, %984 : vector<8x512xi32>
    %986 = vector.broadcast %16 : i32 to vector<8x512xi32>
    %987 = arith.addi %983, %986 : vector<8x512xi32>
    %c5_i32_248 = arith.constant 5 : i32
    %988 = vector.broadcast %c5_i32_248 : i32 to vector<8x512xi32>
    %989 = arith.addi %987, %988 : vector<8x512xi32>
    %c8_i32_249 = arith.constant 8 : i32
    %990 = vector.broadcast %c8_i32_249 : i32 to vector<8x512xi32>
    %991 = arith.shrui %985, %990 : vector<8x512xi32>
    %992 = arith.sitofp %991 : vector<8x512xi32> to vector<8x512xf32>
    %cst_250 = arith.constant 1.000000e+00 : f32
    %993 = vector.broadcast %cst_250 : f32 to vector<8x512xf32>
    %994 = arith.addf %992, %993 : vector<8x512xf32>
    %cst_251 = arith.constant 5.96046448E-8 : f32
    %995 = vector.broadcast %cst_251 : f32 to vector<8x512xf32>
    %996 = arith.mulf %994, %995 : vector<8x512xf32>
    %c8_i32_252 = arith.constant 8 : i32
    %997 = vector.broadcast %c8_i32_252 : i32 to vector<8x512xi32>
    %998 = arith.shrui %989, %997 : vector<8x512xi32>
    %999 = arith.sitofp %998 : vector<8x512xi32> to vector<8x512xf32>
    %cst_253 = arith.constant 1.000000e+00 : f32
    %1000 = vector.broadcast %cst_253 : f32 to vector<8x512xf32>
    %1001 = arith.addf %999, %1000 : vector<8x512xf32>
    %cst_254 = arith.constant 5.96046448E-8 : f32
    %1002 = vector.broadcast %cst_254 : f32 to vector<8x512xf32>
    %1003 = arith.mulf %1001, %1002 : vector<8x512xf32>
    %1004 = arith.mulf %810, %996 : vector<8x512xf32>
    %1005 = arith.cmpf ogt, %1004, %7 : vector<8x512xf32>
    %1006 = arith.extui %1005 : vector<8x512xi1> to vector<8x512xi32>
    %1007 = arith.sitofp %1006 : vector<8x512xi32> to vector<8x512xf32>
    %1008 = arith.addf %814, %1007 : vector<8x512xf32>
    %1009 = arith.mulf %1004, %1003 : vector<8x512xf32>
    %1010 = arith.cmpf ogt, %1009, %7 : vector<8x512xf32>
    %1011 = arith.extui %1010 : vector<8x512xi1> to vector<8x512xi32>
    %1012 = arith.sitofp %1011 : vector<8x512xi32> to vector<8x512xf32>
    %1013 = arith.addf %1008, %1012 : vector<8x512xf32>
    %c5_i32_255 = arith.constant 5 : i32
    %1014 = arith.xori %16, %c1013904242_i32 : i32
    %c466688986_i32_256 = arith.constant 466688986 : i32
    %1015 = arith.xori %1014, %c466688986_i32_256 : i32
    %1016 = vector.broadcast %16 : i32 to vector<8x512xi32>
    %1017 = arith.addi %15, %1016 : vector<8x512xi32>
    %1018 = arith.addi %c5_i32_255, %c1013904242_i32 : i32
    %1019 = vector.broadcast %1018 : i32 to vector<8x512xi32>
    %1020 = arith.addi %1017, %1019 : vector<8x512xi32>
    %c13_i32_257 = arith.constant 13 : i32
    %1021 = arith.shli %1018, %c13_i32_257 : i32
    %c19_i32_258 = arith.constant 19 : i32
    %1022 = arith.shrui %1018, %c19_i32_258 : i32
    %1023 = arith.ori %1021, %1022 : i32
    %1024 = vector.broadcast %1023 : i32 to vector<8x512xi32>
    %1025 = arith.xori %1024, %1020 : vector<8x512xi32>
    %1026 = arith.addi %1020, %1025 : vector<8x512xi32>
    %c15_i32_259 = arith.constant 15 : i32
    %1027 = vector.broadcast %c15_i32_259 : i32 to vector<8x512xi32>
    %1028 = arith.shli %1025, %1027 : vector<8x512xi32>
    %c17_i32_260 = arith.constant 17 : i32
    %1029 = vector.broadcast %c17_i32_260 : i32 to vector<8x512xi32>
    %1030 = arith.shrui %1025, %1029 : vector<8x512xi32>
    %1031 = arith.ori %1028, %1030 : vector<8x512xi32>
    %1032 = arith.xori %1031, %1026 : vector<8x512xi32>
    %1033 = arith.addi %1026, %1032 : vector<8x512xi32>
    %c26_i32_261 = arith.constant 26 : i32
    %1034 = vector.broadcast %c26_i32_261 : i32 to vector<8x512xi32>
    %1035 = arith.shli %1032, %1034 : vector<8x512xi32>
    %c6_i32_262 = arith.constant 6 : i32
    %1036 = vector.broadcast %c6_i32_262 : i32 to vector<8x512xi32>
    %1037 = arith.shrui %1032, %1036 : vector<8x512xi32>
    %1038 = arith.ori %1035, %1037 : vector<8x512xi32>
    %1039 = arith.xori %1038, %1033 : vector<8x512xi32>
    %1040 = arith.addi %1033, %1039 : vector<8x512xi32>
    %c6_i32_263 = arith.constant 6 : i32
    %1041 = vector.broadcast %c6_i32_263 : i32 to vector<8x512xi32>
    %1042 = arith.shli %1039, %1041 : vector<8x512xi32>
    %c26_i32_264 = arith.constant 26 : i32
    %1043 = vector.broadcast %c26_i32_264 : i32 to vector<8x512xi32>
    %1044 = arith.shrui %1039, %1043 : vector<8x512xi32>
    %1045 = arith.ori %1042, %1044 : vector<8x512xi32>
    %1046 = arith.xori %1045, %1040 : vector<8x512xi32>
    %1047 = vector.broadcast %c1013904242_i32 : i32 to vector<8x512xi32>
    %1048 = arith.addi %1040, %1047 : vector<8x512xi32>
    %1049 = vector.broadcast %1015 : i32 to vector<8x512xi32>
    %1050 = arith.addi %1046, %1049 : vector<8x512xi32>
    %c1_i32_265 = arith.constant 1 : i32
    %1051 = vector.broadcast %c1_i32_265 : i32 to vector<8x512xi32>
    %1052 = arith.addi %1050, %1051 : vector<8x512xi32>
    %1053 = arith.addi %1048, %1052 : vector<8x512xi32>
    %c17_i32_266 = arith.constant 17 : i32
    %1054 = vector.broadcast %c17_i32_266 : i32 to vector<8x512xi32>
    %1055 = arith.shli %1052, %1054 : vector<8x512xi32>
    %c15_i32_267 = arith.constant 15 : i32
    %1056 = vector.broadcast %c15_i32_267 : i32 to vector<8x512xi32>
    %1057 = arith.shrui %1052, %1056 : vector<8x512xi32>
    %1058 = arith.ori %1055, %1057 : vector<8x512xi32>
    %1059 = arith.xori %1058, %1053 : vector<8x512xi32>
    %1060 = arith.addi %1053, %1059 : vector<8x512xi32>
    %c29_i32_268 = arith.constant 29 : i32
    %1061 = vector.broadcast %c29_i32_268 : i32 to vector<8x512xi32>
    %1062 = arith.shli %1059, %1061 : vector<8x512xi32>
    %c3_i32_269 = arith.constant 3 : i32
    %1063 = vector.broadcast %c3_i32_269 : i32 to vector<8x512xi32>
    %1064 = arith.shrui %1059, %1063 : vector<8x512xi32>
    %1065 = arith.ori %1062, %1064 : vector<8x512xi32>
    %1066 = arith.xori %1065, %1060 : vector<8x512xi32>
    %1067 = arith.addi %1060, %1066 : vector<8x512xi32>
    %c16_i32_270 = arith.constant 16 : i32
    %1068 = vector.broadcast %c16_i32_270 : i32 to vector<8x512xi32>
    %1069 = arith.shli %1066, %1068 : vector<8x512xi32>
    %c16_i32_271 = arith.constant 16 : i32
    %1070 = vector.broadcast %c16_i32_271 : i32 to vector<8x512xi32>
    %1071 = arith.shrui %1066, %1070 : vector<8x512xi32>
    %1072 = arith.ori %1069, %1071 : vector<8x512xi32>
    %1073 = arith.xori %1072, %1067 : vector<8x512xi32>
    %1074 = arith.addi %1067, %1073 : vector<8x512xi32>
    %c24_i32_272 = arith.constant 24 : i32
    %1075 = vector.broadcast %c24_i32_272 : i32 to vector<8x512xi32>
    %1076 = arith.shli %1073, %1075 : vector<8x512xi32>
    %c8_i32_273 = arith.constant 8 : i32
    %1077 = vector.broadcast %c8_i32_273 : i32 to vector<8x512xi32>
    %1078 = arith.shrui %1073, %1077 : vector<8x512xi32>
    %1079 = arith.ori %1076, %1078 : vector<8x512xi32>
    %1080 = arith.xori %1079, %1074 : vector<8x512xi32>
    %1081 = vector.broadcast %1015 : i32 to vector<8x512xi32>
    %1082 = arith.addi %1074, %1081 : vector<8x512xi32>
    %1083 = vector.broadcast %16 : i32 to vector<8x512xi32>
    %1084 = arith.addi %1080, %1083 : vector<8x512xi32>
    %c2_i32_274 = arith.constant 2 : i32
    %1085 = vector.broadcast %c2_i32_274 : i32 to vector<8x512xi32>
    %1086 = arith.addi %1084, %1085 : vector<8x512xi32>
    %1087 = arith.addi %1082, %1086 : vector<8x512xi32>
    %c13_i32_275 = arith.constant 13 : i32
    %1088 = vector.broadcast %c13_i32_275 : i32 to vector<8x512xi32>
    %1089 = arith.shli %1086, %1088 : vector<8x512xi32>
    %c19_i32_276 = arith.constant 19 : i32
    %1090 = vector.broadcast %c19_i32_276 : i32 to vector<8x512xi32>
    %1091 = arith.shrui %1086, %1090 : vector<8x512xi32>
    %1092 = arith.ori %1089, %1091 : vector<8x512xi32>
    %1093 = arith.xori %1092, %1087 : vector<8x512xi32>
    %1094 = arith.addi %1087, %1093 : vector<8x512xi32>
    %c15_i32_277 = arith.constant 15 : i32
    %1095 = vector.broadcast %c15_i32_277 : i32 to vector<8x512xi32>
    %1096 = arith.shli %1093, %1095 : vector<8x512xi32>
    %c17_i32_278 = arith.constant 17 : i32
    %1097 = vector.broadcast %c17_i32_278 : i32 to vector<8x512xi32>
    %1098 = arith.shrui %1093, %1097 : vector<8x512xi32>
    %1099 = arith.ori %1096, %1098 : vector<8x512xi32>
    %1100 = arith.xori %1099, %1094 : vector<8x512xi32>
    %1101 = arith.addi %1094, %1100 : vector<8x512xi32>
    %c26_i32_279 = arith.constant 26 : i32
    %1102 = vector.broadcast %c26_i32_279 : i32 to vector<8x512xi32>
    %1103 = arith.shli %1100, %1102 : vector<8x512xi32>
    %c6_i32_280 = arith.constant 6 : i32
    %1104 = vector.broadcast %c6_i32_280 : i32 to vector<8x512xi32>
    %1105 = arith.shrui %1100, %1104 : vector<8x512xi32>
    %1106 = arith.ori %1103, %1105 : vector<8x512xi32>
    %1107 = arith.xori %1106, %1101 : vector<8x512xi32>
    %1108 = arith.addi %1101, %1107 : vector<8x512xi32>
    %c6_i32_281 = arith.constant 6 : i32
    %1109 = vector.broadcast %c6_i32_281 : i32 to vector<8x512xi32>
    %1110 = arith.shli %1107, %1109 : vector<8x512xi32>
    %c26_i32_282 = arith.constant 26 : i32
    %1111 = vector.broadcast %c26_i32_282 : i32 to vector<8x512xi32>
    %1112 = arith.shrui %1107, %1111 : vector<8x512xi32>
    %1113 = arith.ori %1110, %1112 : vector<8x512xi32>
    %1114 = arith.xori %1113, %1108 : vector<8x512xi32>
    %1115 = vector.broadcast %16 : i32 to vector<8x512xi32>
    %1116 = arith.addi %1108, %1115 : vector<8x512xi32>
    %1117 = vector.broadcast %c1013904242_i32 : i32 to vector<8x512xi32>
    %1118 = arith.addi %1114, %1117 : vector<8x512xi32>
    %c3_i32_283 = arith.constant 3 : i32
    %1119 = vector.broadcast %c3_i32_283 : i32 to vector<8x512xi32>
    %1120 = arith.addi %1118, %1119 : vector<8x512xi32>
    %1121 = arith.addi %1116, %1120 : vector<8x512xi32>
    %c17_i32_284 = arith.constant 17 : i32
    %1122 = vector.broadcast %c17_i32_284 : i32 to vector<8x512xi32>
    %1123 = arith.shli %1120, %1122 : vector<8x512xi32>
    %c15_i32_285 = arith.constant 15 : i32
    %1124 = vector.broadcast %c15_i32_285 : i32 to vector<8x512xi32>
    %1125 = arith.shrui %1120, %1124 : vector<8x512xi32>
    %1126 = arith.ori %1123, %1125 : vector<8x512xi32>
    %1127 = arith.xori %1126, %1121 : vector<8x512xi32>
    %1128 = arith.addi %1121, %1127 : vector<8x512xi32>
    %c29_i32_286 = arith.constant 29 : i32
    %1129 = vector.broadcast %c29_i32_286 : i32 to vector<8x512xi32>
    %1130 = arith.shli %1127, %1129 : vector<8x512xi32>
    %c3_i32_287 = arith.constant 3 : i32
    %1131 = vector.broadcast %c3_i32_287 : i32 to vector<8x512xi32>
    %1132 = arith.shrui %1127, %1131 : vector<8x512xi32>
    %1133 = arith.ori %1130, %1132 : vector<8x512xi32>
    %1134 = arith.xori %1133, %1128 : vector<8x512xi32>
    %1135 = arith.addi %1128, %1134 : vector<8x512xi32>
    %c16_i32_288 = arith.constant 16 : i32
    %1136 = vector.broadcast %c16_i32_288 : i32 to vector<8x512xi32>
    %1137 = arith.shli %1134, %1136 : vector<8x512xi32>
    %c16_i32_289 = arith.constant 16 : i32
    %1138 = vector.broadcast %c16_i32_289 : i32 to vector<8x512xi32>
    %1139 = arith.shrui %1134, %1138 : vector<8x512xi32>
    %1140 = arith.ori %1137, %1139 : vector<8x512xi32>
    %1141 = arith.xori %1140, %1135 : vector<8x512xi32>
    %1142 = arith.addi %1135, %1141 : vector<8x512xi32>
    %c24_i32_290 = arith.constant 24 : i32
    %1143 = vector.broadcast %c24_i32_290 : i32 to vector<8x512xi32>
    %1144 = arith.shli %1141, %1143 : vector<8x512xi32>
    %c8_i32_291 = arith.constant 8 : i32
    %1145 = vector.broadcast %c8_i32_291 : i32 to vector<8x512xi32>
    %1146 = arith.shrui %1141, %1145 : vector<8x512xi32>
    %1147 = arith.ori %1144, %1146 : vector<8x512xi32>
    %1148 = arith.xori %1147, %1142 : vector<8x512xi32>
    %1149 = vector.broadcast %c1013904242_i32 : i32 to vector<8x512xi32>
    %1150 = arith.addi %1142, %1149 : vector<8x512xi32>
    %1151 = vector.broadcast %1015 : i32 to vector<8x512xi32>
    %1152 = arith.addi %1148, %1151 : vector<8x512xi32>
    %c4_i32_292 = arith.constant 4 : i32
    %1153 = vector.broadcast %c4_i32_292 : i32 to vector<8x512xi32>
    %1154 = arith.addi %1152, %1153 : vector<8x512xi32>
    %1155 = arith.addi %1150, %1154 : vector<8x512xi32>
    %c13_i32_293 = arith.constant 13 : i32
    %1156 = vector.broadcast %c13_i32_293 : i32 to vector<8x512xi32>
    %1157 = arith.shli %1154, %1156 : vector<8x512xi32>
    %c19_i32_294 = arith.constant 19 : i32
    %1158 = vector.broadcast %c19_i32_294 : i32 to vector<8x512xi32>
    %1159 = arith.shrui %1154, %1158 : vector<8x512xi32>
    %1160 = arith.ori %1157, %1159 : vector<8x512xi32>
    %1161 = arith.xori %1160, %1155 : vector<8x512xi32>
    %1162 = arith.addi %1155, %1161 : vector<8x512xi32>
    %c15_i32_295 = arith.constant 15 : i32
    %1163 = vector.broadcast %c15_i32_295 : i32 to vector<8x512xi32>
    %1164 = arith.shli %1161, %1163 : vector<8x512xi32>
    %c17_i32_296 = arith.constant 17 : i32
    %1165 = vector.broadcast %c17_i32_296 : i32 to vector<8x512xi32>
    %1166 = arith.shrui %1161, %1165 : vector<8x512xi32>
    %1167 = arith.ori %1164, %1166 : vector<8x512xi32>
    %1168 = arith.xori %1167, %1162 : vector<8x512xi32>
    %1169 = arith.addi %1162, %1168 : vector<8x512xi32>
    %c26_i32_297 = arith.constant 26 : i32
    %1170 = vector.broadcast %c26_i32_297 : i32 to vector<8x512xi32>
    %1171 = arith.shli %1168, %1170 : vector<8x512xi32>
    %c6_i32_298 = arith.constant 6 : i32
    %1172 = vector.broadcast %c6_i32_298 : i32 to vector<8x512xi32>
    %1173 = arith.shrui %1168, %1172 : vector<8x512xi32>
    %1174 = arith.ori %1171, %1173 : vector<8x512xi32>
    %1175 = arith.xori %1174, %1169 : vector<8x512xi32>
    %1176 = arith.addi %1169, %1175 : vector<8x512xi32>
    %c6_i32_299 = arith.constant 6 : i32
    %1177 = vector.broadcast %c6_i32_299 : i32 to vector<8x512xi32>
    %1178 = arith.shli %1175, %1177 : vector<8x512xi32>
    %c26_i32_300 = arith.constant 26 : i32
    %1179 = vector.broadcast %c26_i32_300 : i32 to vector<8x512xi32>
    %1180 = arith.shrui %1175, %1179 : vector<8x512xi32>
    %1181 = arith.ori %1178, %1180 : vector<8x512xi32>
    %1182 = arith.xori %1181, %1176 : vector<8x512xi32>
    %1183 = vector.broadcast %1015 : i32 to vector<8x512xi32>
    %1184 = arith.addi %1176, %1183 : vector<8x512xi32>
    %1185 = vector.broadcast %16 : i32 to vector<8x512xi32>
    %1186 = arith.addi %1182, %1185 : vector<8x512xi32>
    %c5_i32_301 = arith.constant 5 : i32
    %1187 = vector.broadcast %c5_i32_301 : i32 to vector<8x512xi32>
    %1188 = arith.addi %1186, %1187 : vector<8x512xi32>
    %c8_i32_302 = arith.constant 8 : i32
    %1189 = vector.broadcast %c8_i32_302 : i32 to vector<8x512xi32>
    %1190 = arith.shrui %1184, %1189 : vector<8x512xi32>
    %1191 = arith.sitofp %1190 : vector<8x512xi32> to vector<8x512xf32>
    %cst_303 = arith.constant 1.000000e+00 : f32
    %1192 = vector.broadcast %cst_303 : f32 to vector<8x512xf32>
    %1193 = arith.addf %1191, %1192 : vector<8x512xf32>
    %cst_304 = arith.constant 5.96046448E-8 : f32
    %1194 = vector.broadcast %cst_304 : f32 to vector<8x512xf32>
    %1195 = arith.mulf %1193, %1194 : vector<8x512xf32>
    %c8_i32_305 = arith.constant 8 : i32
    %1196 = vector.broadcast %c8_i32_305 : i32 to vector<8x512xi32>
    %1197 = arith.shrui %1188, %1196 : vector<8x512xi32>
    %1198 = arith.sitofp %1197 : vector<8x512xi32> to vector<8x512xf32>
    %cst_306 = arith.constant 1.000000e+00 : f32
    %1199 = vector.broadcast %cst_306 : f32 to vector<8x512xf32>
    %1200 = arith.addf %1198, %1199 : vector<8x512xf32>
    %cst_307 = arith.constant 5.96046448E-8 : f32
    %1201 = vector.broadcast %cst_307 : f32 to vector<8x512xf32>
    %1202 = arith.mulf %1200, %1201 : vector<8x512xf32>
    %1203 = arith.mulf %1009, %1195 : vector<8x512xf32>
    %1204 = arith.cmpf ogt, %1203, %7 : vector<8x512xf32>
    %1205 = arith.extui %1204 : vector<8x512xi1> to vector<8x512xi32>
    %1206 = arith.sitofp %1205 : vector<8x512xi32> to vector<8x512xf32>
    %1207 = arith.addf %1013, %1206 : vector<8x512xf32>
    %1208 = arith.mulf %1203, %1202 : vector<8x512xf32>
    %1209 = arith.cmpf ogt, %1208, %7 : vector<8x512xf32>
    %1210 = arith.extui %1209 : vector<8x512xi1> to vector<8x512xi32>
    %1211 = arith.sitofp %1210 : vector<8x512xi32> to vector<8x512xf32>
    %1212 = arith.addf %1207, %1211 : vector<8x512xf32>
    %c6_i32_308 = arith.constant 6 : i32
    %1213 = vector.broadcast %0 : f32 to vector<8x512xf32>
    %1214 = arith.mulf %1212, %1213 : vector<8x512xf32>
    %c0_309 = arith.constant 0 : index
    %c0_310 = arith.constant 0 : index
    %1215 = vector.load %arg4[%c0_309, %c0_310] : memref<8x512xf32, #tpu.memory_space<vmem>>, vector<8x512xf32>
    tpu.vector_store %arg4[%c0_309, %c0_310], %1214 {strides = array<i32>} : memref<8x512xf32, #tpu.memory_space<vmem>>, vector<8x512xf32>,
    return
  }
  func.func @transform_0(%arg0: i32) -> i32 {
    %c0_i32 = arith.constant 0 : i32
    %c0_i32_0 = arith.constant 0 : i32
    return %c0_i32 : i32
  }
  func.func @transform_1(%arg0: i32) -> i32 {
    %c0_i32 = arith.constant 0 : i32
    %c0_i32_0 = arith.constant 0 : i32
    return %c0_i32 : i32
  }
  func.func @transform_2(%arg0: i32) -> (i32, i32) {
    %c0_i32 = arith.constant 0 : i32
    %c0_i32_0 = arith.constant 0 : i32
    return %arg0, %c0_i32 : i32, i32
  }
  func.func @transform_3(%arg0: i32) -> (i32, i32) {
    %c0_i32 = arith.constant 0 : i32
    %c0_i32_0 = arith.constant 0 : i32
    return %arg0, %c0_i32 : i32, i32
  }
}

</mosaic_0001>

<bundles_post_ra>
// kernel: tpu_custom_call.1
= control target key start
LH: loop header
LB: loop body
LE: loop exit
PB: predicated region body
PF: predicated region fallthrough
CT: control target
= control target key end

     0   :  { %10 = vsyncpa [#allocation5], 0  ;;  %s4453_s0 = inlined_call_operand.<no memory space> [shape: s32[1], index: 0, kind: input, shape index: {}]   ;;  %s4454_s1 = inlined_call_operand.<no memory space> [shape: f32[1], index: 1, kind: input, shape index: {}]   ;;  %s4455_s2 = inlined_call_operand.hbm [shape: f32[8,512], index: 2, kind: input, shape index: {}]   ;;  %s4456_s3 = inlined_call_operand.hbm [shape: f32[8,512], index: 3, kind: output, shape index: {}]  }
   0x1   :  { %11 = vsyncpa [#allocation6], 0  ;;  %s21_s14 = sshll.u32 %s4455_s2, 4  ;;  %s3350_s15 = smov [#allocation4]   ;;  %v3379_v0 = vstv %s4454_s1  ;;  %s22_s14 = int_to_ptr.hbm [resolvable:$true] %s21_s14 }
   0x2   :  { %s23_s16 = sshll.u32 %s3350_s15, 4  ;;  %4479 = vst [vmem:[#allocation10_spill] sm:$0xff] %v3379_v0  ;;  %s24_s16 = int_to_ptr.vmem [resolvable:$true] %s23_s16 }
   0x3   :  { %26 = dma.hbm_to_vmem [thread:$0]  %s22_s14, 512, %s24_s16, [#allocation5]  }
   0x4   :  { %3346 = dma.done.wait [#allocation5], 512  }
   0x5   :  { %3347 = vsyncadd [#allocation5], 4294966784  ;;  %v69_v1 = vlaneseq  ;;  %3288 = vrcp.f32 %v3379_v0  ;;  %v3385_v8 = vstv %s4453_s0  ;;  %vm38_vm0 = vweird.f32 %v3379_v0  ;;  %s85_s21 = sxor.u32 1013904242, %s4453_s0  ;;  %s3352_s23 = smov [#allocation7]  }
   0x6   :  { %4480 = vst [vmem:[#allocation11_spill] sm:$0xff] %v3385_v8  ;;  %v42_v17 = vand.u32 2147483647, %v3379_v0  ;;  %v44_v18 = vand.u32 2147483648, %v3379_v0  ;;  %s86_s22 = sxor.u32 466688986, %s85_s21 }
   0x7   :  { %v70_v2 = vshrl.u32 %v69_v1, 7  ;;  %v72_v3 = vand.u32 127, %v69_v1  ;;  %s3223_s24 = sshll.u32 %s3352_s23, 4  ;;  %s3225_s27 = sshll.u32 %s4456_s3, 4  ;;  %s3224_s24 = int_to_ptr.vmem [resolvable:$true] %s3223_s24  ;;  %s3226_s27 = int_to_ptr.hbm [resolvable:$true] %s3225_s27 }
   0x8   :  { %v45_v30 = vor.u32 1.1754944e-38, %v44_v18  ;;  %vm43_vm3 = vcmp.eq.f32.partialorder %v42_v17, 8.507059e+37 }
   0x9   :  { %v73_v4 = vadd.s32 128, %v72_v3  ;;  %v74_v5 = vadd.s32 256, %v72_v3  ;;  %v75_v6 = vadd.s32 384, %v72_v3  ;;  %v79_v7 = vshll.u32 %v70_v2, 9 }
   0xb   :  { %v80_v9 = vor.u32 %v79_v7, %v72_v3  ;;  %v81_v10 = vor.u32 %v79_v7, %v73_v4  ;;  %v82_v11 = vor.u32 %v79_v7, %v74_v5  ;;  %v83_v12 = vor.u32 %v79_v7, %v75_v6  ;;  %v3289_v13 = vpop.eup %3288 }
   0xc   :  { %v34_v14 = vmul.f32 %v3289_v13, %v3379_v0  ;;  %vm39_vm1 = vweird.f32 %v3289_v13 }
   0xd   :  { %v3390_v15 = vadd.s32 %v3385_v8, %v80_v9  ;;  %v3393_v16 = vadd.s32 %v3385_v8, %v81_v10  ;;  %v3398_v19 = vadd.s32 %v3385_v8, %v82_v11  ;;  %v3401_v20 = vadd.s32 %v3385_v8, %v83_v12  ;;  %vm3409_vm2 = vmor %vm38_vm0, %vm39_vm1 }
   0xe   :  { %v35_v21 = vsub.f32 1.0, %v34_v14 }
   0xf   :  { %4481 = vst [vmem:[#allocation12_spill] sm:$0xff] %v3390_v15  ;;  %v92_v22 = vadd.s32 1013904242, %v3390_v15  ;;  %v93_v23 = vadd.s32 1013904242, %v3393_v16 }
  0x10   :  { %4482 = vst [vmem:[#allocation13_spill] sm:$0xff] %v3393_v16  ;;  %v94_v24 = vadd.s32 1013904242, %v3398_v19  ;;  %v95_v25 = vadd.s32 1013904242, %v3401_v20  ;;  %v36_v26 = vmul.f32 %v3289_v13, %v35_v21 }
  0x11   :  { %4483 = vst [vmem:[#allocation14_spill] sm:$0xff] %v3398_v19  ;;  %v96_v27 = vxor.u32 3731769229, %v92_v22  ;;  %v97_v28 = vxor.u32 3731769229, %v93_v23 }
  0x12   :  { %4484 = vst [vmem:[#allocation15_spill] sm:$0xff] %v3401_v20  ;;  %v98_v31 = vxor.u32 3731769229, %v94_v24  ;;  %v99_v32 = vxor.u32 3731769229, %v95_v25  ;;  %v37_v33 = vadd.f32 %v3289_v13, %v36_v26 }
  0x13   :  { %v100_v34 = vadd.s32 %v96_v27, %v92_v22  ;;  %v104_v35 = vshll.u32 %v96_v27, 15  ;;  %v101_v36 = vadd.s32 %v97_v28, %v93_v23  ;;  %v105_v38 = vshll.u32 %v97_v28, 15 }
  0x14   :  { %v102_v37 = vadd.s32 %v98_v31, %v94_v24  ;;  %v106_v39 = vshll.u32 %v98_v31, 15  ;;  %v41_v40 = vsel %vm3409_vm2, %v3289_v13, %v37_v33  ;;  %v107_v41 = vshll.u32 %v99_v32, 15 }
  0x15   :  { %v108_v42 = vshrl.u32 %v96_v27, 17  ;;  %v109_v43 = vshrl.u32 %v97_v28, 17  ;;  %v46_v44 = vsel %vm43_vm3, %v45_v30, %v41_v40  ;;  %v103_v45 = vadd.s32 %v99_v32, %v95_v25 }
  0x16   :  { %v110_v46 = vshrl.u32 %v98_v31, 17  ;;  %v111_v47 = vshrl.u32 %v99_v32, 17  ;;  %3283 = vpush %v46_v44 }
  0x17   :  { %v112_v48 = vor.u32 %v108_v42, %v104_v35  ;;  %v113_v49 = vor.u32 %v109_v43, %v105_v38  ;;  %v3418_v35 = vstv %s86_s22 }
  0x18   :  { %v114_v50 = vor.u32 %v110_v46, %v106_v39  ;;  %v115_v51 = vor.u32 %v111_v47, %v107_v41 }
  0x19   :  { %v116_v52 = vxor.u32 %v112_v48, %v100_v34  ;;  %v117_v53 = vxor.u32 %v113_v49, %v101_v36 }
  0x1a   :  { %v118_v54 = vxor.u32 %v114_v50, %v102_v37  ;;  %v119_v55 = vxor.u32 %v115_v51, %v103_v45 }
  0x1b   :  { %v120_v56 = vadd.s32 %v116_v52, %v100_v34  ;;  %v121_v57 = vadd.s32 %v117_v53, %v101_v36  ;;  %v124_v58 = vshll.u32 %v116_v52, 26  ;;  %v125_v59 = vshll.u32 %v117_v53, 26 }
  0x1c   :  { %v122_v60 = vadd.s32 %v118_v54, %v102_v37  ;;  %v123_v61 = vadd.s32 %v119_v55, %v103_v45  ;;  %v126_v62 = vshll.u32 %v118_v54, 26  ;;  %v127_v63 = vshll.u32 %v119_v55, 26 }
  0x1d   :  { %v128_v1 = vshrl.u32 %v116_v52, 6  ;;  %v129_v2 = vshrl.u32 %v117_v53, 6  ;;  %v130_v3 = vshrl.u32 %v118_v54, 6  ;;  %v131_v4 = vshrl.u32 %v119_v55, 6 }
  0x1f   :  { %v132_v5 = vor.u32 %v128_v1, %v124_v58  ;;  %v133_v6 = vor.u32 %v129_v2, %v125_v59  ;;  %v134_v7 = vor.u32 %v130_v3, %v126_v62  ;;  %v135_v9 = vor.u32 %v131_v4, %v127_v63 }
  0x21   :  { %v136_v10 = vxor.u32 %v132_v5, %v120_v56  ;;  %v137_v11 = vxor.u32 %v133_v6, %v121_v57  ;;  %v138_v12 = vxor.u32 %v134_v7, %v122_v60  ;;  %v139_v13 = vxor.u32 %v135_v9, %v123_v61 }
  0x23   :  { %v140_v14 = vadd.s32 %v136_v10, %v120_v56  ;;  %v141_v17 = vadd.s32 %v137_v11, %v121_v57  ;;  %v142_v18 = vadd.s32 %v138_v12, %v122_v60  ;;  %v143_v21 = vadd.s32 %v139_v13, %v123_v61 }
  0x24   :  { %v144_v22 = vshll.u32 %v136_v10, 6  ;;  %v145_v23 = vshll.u32 %v137_v11, 6  ;;  %v146_v24 = vshll.u32 %v138_v12, 6  ;;  %v147_v25 = vshll.u32 %v139_v13, 6 }
  0x25   :  { %v148_v26 = vshrl.u32 %v136_v10, 26  ;;  %v149_v27 = vshrl.u32 %v137_v11, 26  ;;  %v150_v28 = vshrl.u32 %v138_v12, 26  ;;  %v151_v29 = vshrl.u32 %v139_v13, 26 }
  0x26   :  { %v160_v34 = vadd.s32 1013904242, %v140_v14  ;;  %v161_v40 = vadd.s32 1013904242, %v141_v17  ;;  %v162_v41 = vadd.s32 1013904242, %v142_v18 }
  0x27   :  { %v152_v30 = vor.u32 %v148_v26, %v144_v22  ;;  %v153_v31 = vor.u32 %v149_v27, %v145_v23  ;;  %v154_v32 = vor.u32 %v150_v28, %v146_v24  ;;  %v155_v33 = vor.u32 %v151_v29, %v147_v25 }
  0x28   :  { %v163_v42 = vadd.s32 1013904242, %v143_v21  ;;  %v609_v25 = vadd.s32 1013904243, %v3390_v15  ;;  %v610_v26 = vadd.s32 1013904243, %v3393_v16 }
  0x29   :  { %v156_v36 = vxor.u32 %v152_v30, %v140_v14  ;;  %v157_v37 = vxor.u32 %v153_v31, %v141_v17  ;;  %v158_v38 = vxor.u32 %v154_v32, %v142_v18  ;;  %v159_v39 = vxor.u32 %v155_v33, %v143_v21 }
  0x2a   :  { %v611_v27 = vadd.s32 1013904243, %v3398_v19  ;;  %v612_v32 = vadd.s32 1013904243, %v3401_v20 }
  0x2b   :  { %v165_v43 = vadd.s32 %v3418_v35, %v156_v36  ;;  %v166_v44 = vadd.s32 %v3418_v35, %v157_v37  ;;  %v167_v45 = vadd.s32 %v3418_v35, %v158_v38  ;;  %v168_v46 = vadd.s32 %v3418_v35, %v159_v39 }
  0x2c   :  { %v613_v38 = vxor.u32 3731777421, %v609_v25  ;;  %v614_v39 = vxor.u32 3731777421, %v610_v26 }
  0x2d   :  { %v169_v47 = vadd.s32 1, %v165_v43  ;;  %v170_v48 = vadd.s32 1, %v166_v44  ;;  %v171_v49 = vadd.s32 1, %v167_v45  ;;  %v172_v50 = vadd.s32 1, %v168_v46 }
  0x2f   :  { %v173_v51 = vadd.s32 %v169_v47, %v160_v34  ;;  %v174_v52 = vadd.s32 %v170_v48, %v161_v40  ;;  %v175_v53 = vadd.s32 %v171_v49, %v162_v41  ;;  %v176_v54 = vadd.s32 %v172_v50, %v163_v42 }
  0x30   :  { %v177_v55 = vshll.u32 %v169_v47, 17  ;;  %v178_v56 = vshll.u32 %v170_v48, 17  ;;  %v179_v57 = vshll.u32 %v171_v49, 17  ;;  %v180_v58 = vshll.u32 %v172_v50, 17 }
  0x31   :  { %v181_v59 = vshrl.u32 %v169_v47, 15  ;;  %v182_v60 = vshrl.u32 %v170_v48, 15  ;;  %v183_v61 = vshrl.u32 %v171_v49, 15  ;;  %v184_v62 = vshrl.u32 %v172_v50, 15 }
  0x32   :  { %v615_v40 = vxor.u32 3731777421, %v611_v27 }
  0x33   :  { %v185_v63 = vor.u32 %v181_v59, %v177_v55  ;;  %v186_v1 = vor.u32 %v182_v60, %v178_v56  ;;  %v187_v2 = vor.u32 %v183_v61, %v179_v57  ;;  %v188_v3 = vor.u32 %v184_v62, %v180_v58 }
  0x34   :  { %v621_v55 = vshll.u32 %v613_v38, 15  ;;  %v625_v56 = vshrl.u32 %v613_v38, 17  ;;  %v3430_v61 = vadd.s32 %v614_v39, %v610_v26  ;;  %v3432_v62 = vadd.s32 %v615_v40, %v611_v27 }
  0x35   :  { %v189_v4 = vxor.u32 %v185_v63, %v173_v51  ;;  %v190_v5 = vxor.u32 %v186_v1, %v174_v52  ;;  %v191_v6 = vxor.u32 %v187_v2, %v175_v53  ;;  %v192_v7 = vxor.u32 %v188_v3, %v176_v54 }
  0x36   :  { %v622_v63 = vshll.u32 %v614_v39, 15  ;;  %v623_v1 = vshll.u32 %v615_v40, 15 }
  0x37   :  { %v193_v9 = vadd.s32 %v189_v4, %v173_v51  ;;  %v194_v10 = vadd.s32 %v190_v5, %v174_v52  ;;  %v195_v11 = vadd.s32 %v191_v6, %v175_v53  ;;  %v196_v12 = vadd.s32 %v192_v7, %v176_v54 }
  0x38   :  { %v197_v13 = vshll.u32 %v189_v4, 29  ;;  %v198_v14 = vshll.u32 %v190_v5, 29  ;;  %v199_v17 = vshll.u32 %v191_v6, 29  ;;  %v200_v18 = vshll.u32 %v192_v7, 29 }
  0x39   :  { %v201_v21 = vshrl.u32 %v189_v4, 3  ;;  %v202_v22 = vshrl.u32 %v190_v5, 3  ;;  %v203_v23 = vshrl.u32 %v191_v6, 3  ;;  %v204_v24 = vshrl.u32 %v192_v7, 3 }
  0x3a   :  { %v616_v53 = vxor.u32 3731777421, %v612_v32  ;;  %v3428_v54 = vadd.s32 %v613_v38, %v609_v25  ;;  %v626_v7 = vshrl.u32 %v614_v39, 17 }
  0x3b   :  { %v205_v28 = vor.u32 %v201_v21, %v197_v13  ;;  %v206_v29 = vor.u32 %v202_v22, %v198_v14  ;;  %v207_v30 = vor.u32 %v203_v23, %v199_v17  ;;  %v208_v31 = vor.u32 %v204_v24, %v200_v18 }
  0x3c   :  { %v624_v6 = vshll.u32 %v616_v53, 15  ;;  %v3434_v13 = vadd.s32 %v616_v53, %v612_v32  ;;  %v629_v14 = vor.u32 %v625_v56, %v621_v55 }
  0x3d   :  { %v209_v33 = vxor.u32 %v205_v28, %v193_v9  ;;  %v210_v34 = vxor.u32 %v206_v29, %v194_v10  ;;  %v211_v36 = vxor.u32 %v207_v30, %v195_v11  ;;  %v212_v37 = vxor.u32 %v208_v31, %v196_v12 }
  0x3e   :  { %v630_v28 = vor.u32 %v626_v7, %v622_v63 }
  0x3f   :  { %v213_v41 = vadd.s32 %v209_v33, %v193_v9  ;;  %v214_v42 = vadd.s32 %v210_v34, %v194_v10  ;;  %v215_v43 = vadd.s32 %v211_v36, %v195_v11  ;;  %v216_v44 = vadd.s32 %v212_v37, %v196_v12 }
  0x40   :  { %v217_v45 = vshll.u32 %v209_v33, 16  ;;  %v218_v46 = vshll.u32 %v210_v34, 16  ;;  %v219_v47 = vshll.u32 %v211_v36, 16  ;;  %v220_v48 = vshll.u32 %v212_v37, 16 }
  0x41   :  { %v221_v49 = vshrl.u32 %v209_v33, 16  ;;  %v222_v50 = vshrl.u32 %v210_v34, 16  ;;  %v223_v51 = vshrl.u32 %v211_v36, 16  ;;  %v224_v52 = vshrl.u32 %v212_v37, 16 }
  0x42   :  { %v627_v9 = vshrl.u32 %v615_v40, 17  ;;  %v628_v10 = vshrl.u32 %v616_v53, 17  ;;  %v633_v40 = vxor.u32 %v629_v14, %v3428_v54 }
  0x43   :  { %v225_v57 = vor.u32 %v221_v49, %v217_v45  ;;  %v226_v58 = vor.u32 %v222_v50, %v218_v46  ;;  %v227_v59 = vor.u32 %v223_v51, %v219_v47  ;;  %v228_v60 = vor.u32 %v224_v52, %v220_v48 }
  0x44   :  { %v631_v29 = vor.u32 %v627_v9, %v623_v1  ;;  %v632_v30 = vor.u32 %v628_v10, %v624_v6  ;;  %v641_v56 = vshll.u32 %v633_v40, 26 }
  0x45   :  { %v229_v2 = vxor.u32 %v225_v57, %v213_v41  ;;  %v230_v3 = vxor.u32 %v226_v58, %v214_v42  ;;  %v231_v4 = vxor.u32 %v227_v59, %v215_v43  ;;  %v232_v5 = vxor.u32 %v228_v60, %v216_v44 }
  0x47   :  { %v233_v11 = vadd.s32 %v229_v2, %v213_v41  ;;  %v234_v12 = vadd.s32 %v230_v3, %v214_v42  ;;  %v235_v17 = vadd.s32 %v231_v4, %v215_v43  ;;  %v237_v18 = vshll.u32 %v229_v2, 24  ;;  %s3284_s0 = spop %3283 }
  0x48   :  { %v238_v21 = vshll.u32 %v230_v3, 24  ;;  %v239_v22 = vshll.u32 %v231_v4, 24  ;;  %v240_v23 = vshll.u32 %v232_v5, 24  ;;  %v241_v24 = vshrl.u32 %v229_v2, 8 }
  0x49   :  { %v242_v25 = vshrl.u32 %v230_v3, 8  ;;  %v243_v26 = vshrl.u32 %v231_v4, 8  ;;  %v236_v27 = vadd.s32 %v232_v5, %v216_v44  ;;  %v244_v31 = vshrl.u32 %v232_v5, 8 }
  0x4a   :  { %v245_v33 = vor.u32 %v241_v24, %v237_v18  ;;  %v634_v41 = vxor.u32 %v630_v28, %v3430_v61  ;;  %v635_v43 = vxor.u32 %v631_v29, %v3432_v62  ;;  %v636_v44 = vxor.u32 %v632_v30, %v3434_v13 }
  0x4b   :  { %v246_v34 = vor.u32 %v242_v25, %v238_v21  ;;  %v247_v36 = vor.u32 %v243_v26, %v239_v22  ;;  %v248_v37 = vor.u32 %v244_v31, %v240_v23  ;;  %v253_v45 = vadd.s32 %v233_v11, %v3418_v35 }
  0x4c   :  { %v249_v32 = vxor.u32 %v245_v33, %v233_v11  ;;  %v254_v46 = vadd.s32 %v234_v12, %v3418_v35  ;;  %v255_v49 = vadd.s32 %v235_v17, %v3418_v35  ;;  %v256_v50 = vadd.s32 %v236_v27, %v3418_v35 }
  0x4d   :  { %v250_v38 = vxor.u32 %v246_v34, %v234_v12  ;;  %v251_v39 = vxor.u32 %v247_v36, %v235_v17  ;;  %v252_v42 = vxor.u32 %v248_v37, %v236_v27  ;;  %v642_v57 = vshll.u32 %v634_v41, 26 }
  0x4e   :  { %v257_v47 = vadd.s32 %v249_v32, %v3385_v8  ;;  %v643_v60 = vshll.u32 %v635_v43, 26  ;;  %v644_v63 = vshll.u32 %v636_v44, 26  ;;  %v645_v17 = vshrl.u32 %v633_v40, 6 }
  0x4f   :  { %v258_v48 = vadd.s32 %v250_v38, %v3385_v8  ;;  %v259_v51 = vadd.s32 %v251_v39, %v3385_v8  ;;  %v260_v52 = vadd.s32 %v252_v42, %v3385_v8  ;;  %v646_v18 = vshrl.u32 %v634_v41, 6 }
  0x50   :  { %v261_v53 = vadd.s32 2, %v257_v47  ;;  %v647_v21 = vshrl.u32 %v635_v43, 6  ;;  %v648_v22 = vshrl.u32 %v636_v44, 6  ;;  %v637_v27 = vadd.s32 %v633_v40, %v3428_v54 }
  0x51   :  { %v262_v55 = vadd.s32 2, %v258_v48  ;;  %v263_v58 = vadd.s32 2, %v259_v51  ;;  %v264_v59 = vadd.s32 2, %v260_v52  ;;  %v638_v28 = vadd.s32 %v634_v41, %v3430_v61 }
  0x52   :  { %v265_v1 = vadd.s32 %v261_v53, %v253_v45  ;;  %v269_v3 = vshll.u32 %v261_v53, 13  ;;  %v273_v10 = vshrl.u32 %v261_v53, 19  ;;  %v3451_v29 = vadd.s32 %v635_v43, %v3432_v62 }
  0x53   :  { %v266_v2 = vadd.s32 %v262_v55, %v254_v46  ;;  %v270_v4 = vshll.u32 %v262_v55, 13  ;;  %v267_v5 = vadd.s32 %v263_v58, %v255_v49  ;;  %v268_v6 = vadd.s32 %v264_v59, %v256_v50 }
  0x54   :  { %v271_v7 = vshll.u32 %v263_v58, 13  ;;  %v272_v9 = vshll.u32 %v264_v59, 13  ;;  %v274_v11 = vshrl.u32 %v262_v55, 19  ;;  %v275_v12 = vshrl.u32 %v263_v58, 19 }
  0x55   :  { %v276_v14 = vshrl.u32 %v264_v59, 19  ;;  %v277_v23 = vor.u32 %v273_v10, %v269_v3  ;;  %v3454_v30 = vadd.s32 %v636_v44, %v3434_v13  ;;  %v649_v37 = vor.u32 %v645_v17, %v641_v56 }
  0x56   :  { %v278_v24 = vor.u32 %v274_v11, %v270_v4  ;;  %v279_v25 = vor.u32 %v275_v12, %v271_v7  ;;  %v650_v32 = vor.u32 %v646_v18, %v642_v57  ;;  %v651_v38 = vor.u32 %v647_v21, %v643_v60 }
  0x57   :  { %v280_v26 = vor.u32 %v276_v14, %v272_v9  ;;  %v281_v31 = vxor.u32 %v277_v23, %v265_v1  ;;  %v652_v39 = vor.u32 %v648_v22, %v644_v63  ;;  %v653_v48 = vxor.u32 %v649_v37, %v637_v27 }
  0x58   :  { %v282_v33 = vxor.u32 %v278_v24, %v266_v2  ;;  %v283_v34 = vxor.u32 %v279_v25, %v267_v5  ;;  %v654_v49 = vxor.u32 %v650_v32, %v638_v28  ;;  %v655_v50 = vxor.u32 %v651_v38, %v3451_v29 }
  0x59   :  { %v284_v36 = vxor.u32 %v280_v26, %v268_v6  ;;  %v285_v42 = vadd.s32 %v281_v31, %v265_v1  ;;  %v289_v40 = vshll.u32 %v281_v31, 15  ;;  %v293_v43 = vshrl.u32 %v281_v31, 17 }
  0x5a   :  { %v286_v45 = vadd.s32 %v282_v33, %v266_v2  ;;  %v287_v46 = vadd.s32 %v283_v34, %v267_v5  ;;  %v290_v61 = vshll.u32 %v282_v33, 15  ;;  %v291_v41 = vshll.u32 %v283_v34, 15 }
  0x5b   :  { %v288_v54 = vadd.s32 %v284_v36, %v268_v6  ;;  %v292_v62 = vshll.u32 %v284_v36, 15  ;;  %v294_v47 = vshrl.u32 %v282_v33, 17  ;;  %v295_v13 = vshrl.u32 %v283_v34, 17 }
  0x5c   :  { %v296_v44 = vshrl.u32 %v284_v36, 17  ;;  %v656_v51 = vxor.u32 %v652_v39, %v3454_v30  ;;  %v297_v52 = vor.u32 %v293_v43, %v289_v40  ;;  %v661_v63 = vshll.u32 %v653_v48, 6 }
  0x5d   :  { %v298_v53 = vor.u32 %v294_v47, %v290_v61  ;;  %v299_v55 = vor.u32 %v295_v13, %v291_v41  ;;  %v662_v1 = vshll.u32 %v654_v49, 6  ;;  %v663_v2 = vshll.u32 %v655_v50, 6 }
  0x5e   :  { %v300_v56 = vor.u32 %v296_v44, %v292_v62  ;;  %v301_v57 = vxor.u32 %v297_v52, %v285_v42  ;;  %v664_v3 = vshll.u32 %v656_v51, 6  ;;  %v665_v22 = vshrl.u32 %v653_v48, 26 }
  0x5f   :  { %v302_v58 = vxor.u32 %v298_v53, %v286_v45  ;;  %v303_v59 = vxor.u32 %v299_v55, %v287_v46  ;;  %v666_v23 = vshrl.u32 %v654_v49, 26  ;;  %v667_v24 = vshrl.u32 %v655_v50, 26 }
  0x60   :  { %v304_v60 = vxor.u32 %v300_v56, %v288_v54  ;;  %v305_v4 = vadd.s32 %v301_v57, %v285_v42  ;;  %v309_v9 = vshll.u32 %v301_v57, 26  ;;  %v313_v14 = vshrl.u32 %v301_v57, 6 }
  0x61   :  { %v306_v5 = vadd.s32 %v302_v58, %v286_v45  ;;  %v307_v6 = vadd.s32 %v303_v59, %v287_v46  ;;  %v310_v10 = vshll.u32 %v302_v58, 26  ;;  %v311_v11 = vshll.u32 %v303_v59, 26 }
  0x62   :  { %v308_v7 = vadd.s32 %v304_v60, %v288_v54  ;;  %v312_v12 = vshll.u32 %v304_v60, 26  ;;  %v314_v17 = vshrl.u32 %v302_v58, 6  ;;  %v315_v18 = vshrl.u32 %v303_v59, 6 }
  0x63   :  { %v316_v21 = vshrl.u32 %v304_v60, 6  ;;  %v668_v25 = vshrl.u32 %v656_v51, 26  ;;  %v317_v26 = vor.u32 %v313_v14, %v309_v9  ;;  %v657_v36 = vadd.s32 %v653_v48, %v637_v27 }
  0x64   :  { %v318_v31 = vor.u32 %v314_v17, %v310_v10  ;;  %v319_v33 = vor.u32 %v315_v18, %v311_v11  ;;  %v658_v37 = vadd.s32 %v654_v49, %v638_v28  ;;  %v659_v45 = vadd.s32 %v655_v50, %v3451_v29 }
  0x65   :  { %v320_v34 = vor.u32 %v316_v21, %v312_v12  ;;  %v321_v32 = vxor.u32 %v317_v26, %v305_v4  ;;  %v669_v46 = vor.u32 %v665_v22, %v661_v63  ;;  %v670_v54 = vor.u32 %v666_v23, %v662_v1 }
  0x66   :  { %v322_v38 = vxor.u32 %v318_v31, %v306_v5  ;;  %v323_v39 = vxor.u32 %v319_v33, %v307_v6  ;;  %v671_v40 = vor.u32 %v667_v24, %v663_v2  ;;  %v660_v62 = vadd.s32 %v656_v51, %v3454_v30 }
  0x67   :  { %v324_v42 = vxor.u32 %v320_v34, %v308_v7  ;;  %v325_v61 = vadd.s32 %v321_v32, %v305_v4  ;;  %v672_v43 = vor.u32 %v668_v25, %v664_v3  ;;  %v329_v47 = vshll.u32 %v321_v32, 6 }
  0x68   :  { %v326_v41 = vadd.s32 %v322_v38, %v306_v5  ;;  %v330_v13 = vshll.u32 %v322_v38, 6  ;;  %v331_v44 = vshll.u32 %v323_v39, 6  ;;  %v333_v27 = vshrl.u32 %v321_v32, 26 }
  0x69   :  { %v332_v52 = vshll.u32 %v324_v42, 6  ;;  %v334_v28 = vshrl.u32 %v322_v38, 26  ;;  %v335_v48 = vshrl.u32 %v323_v39, 26  ;;  %v336_v49 = vshrl.u32 %v324_v42, 26 }
  0x6a   :  { %v327_v53 = vadd.s32 %v323_v39, %v307_v6  ;;  %v673_v55 = vxor.u32 %v669_v46, %v657_v36  ;;  %v674_v56 = vxor.u32 %v670_v54, %v658_v37  ;;  %v675_v29 = vxor.u32 %v671_v40, %v659_v45 }
  0x6b   :  { %v337_v50 = vor.u32 %v333_v27, %v329_v47  ;;  %v338_v57 = vor.u32 %v334_v28, %v330_v13  ;;  %v339_v58 = vor.u32 %v335_v48, %v331_v44  ;;  %v676_v59 = vxor.u32 %v672_v43, %v660_v62 }
  0x6c   :  { %v328_v60 = vadd.s32 %v324_v42, %v308_v7  ;;  %v340_v63 = vor.u32 %v336_v49, %v332_v52  ;;  %v681_v2 = vadd.s32 %v673_v55, %v3418_v35  ;;  %v682_v3 = vadd.s32 %v674_v56, %v3418_v35 }
  0x6d   :  { %v341_v30 = vxor.u32 %v337_v50, %v325_v61  ;;  %v342_v51 = vxor.u32 %v338_v57, %v326_v41  ;;  %v343_v1 = vxor.u32 %v339_v58, %v327_v53  ;;  %v683_v4 = vadd.s32 %v675_v29, %v3418_v35 }
  0x6e   :  { %v684_v5 = vadd.s32 %v676_v59, %v3418_v35  ;;  %v344_v6 = vxor.u32 %v340_v63, %v328_v60  ;;  %v677_v12 = vadd.s32 1013904242, %v657_v36  ;;  %v685_v14 = vadd.s32 1, %v681_v2 }
  0x6f   :  { %v349_v9 = vadd.s32 1013904242, %v341_v30  ;;  %v350_v10 = vadd.s32 1013904242, %v342_v51  ;;  %v351_v11 = vadd.s32 1013904242, %v343_v1  ;;  %v345_v36 = vadd.s32 %v325_v61, %v3385_v8 }
  0x70   :  { %v686_v17 = vadd.s32 1, %v682_v3  ;;  %v687_v7 = vadd.s32 1, %v683_v4  ;;  %v688_v18 = vadd.s32 1, %v684_v5  ;;  %v352_v21 = vadd.s32 1013904242, %v344_v6 }
  0x71   :  { %v678_v22 = vadd.s32 1013904242, %v658_v37  ;;  %v353_v23 = vadd.s32 3, %v349_v9  ;;  %v354_v24 = vadd.s32 3, %v350_v10  ;;  %v679_v25 = vadd.s32 1013904242, %v659_v45 }
  0x72   :  { %v680_v26 = vadd.s32 1013904242, %v660_v62  ;;  %v355_v31 = vadd.s32 3, %v351_v11  ;;  %v689_v33 = vadd.s32 %v685_v14, %v677_v12  ;;  %v693_v34 = vshll.u32 %v685_v14, 17 }
  0x73   :  { %v694_v32 = vshll.u32 %v686_v17, 17  ;;  %v695_v38 = vshll.u32 %v687_v7, 17  ;;  %v696_v39 = vshll.u32 %v688_v18, 17  ;;  %v697_v42 = vshrl.u32 %v685_v14, 15 }
  0x74   :  { %v698_v46 = vshrl.u32 %v686_v17, 15  ;;  %v346_v54 = vadd.s32 %v326_v41, %v3385_v8  ;;  %v356_v40 = vadd.s32 3, %v352_v21  ;;  %v699_v43 = vshrl.u32 %v687_v7, 15 }
  0x75   :  { %v361_v47 = vshll.u32 %v353_v23, 17  ;;  %v362_v37 = vshll.u32 %v354_v24, 17  ;;  %v365_v13 = vshrl.u32 %v353_v23, 15  ;;  %v366_v44 = vshrl.u32 %v354_v24, 15 }
  0x76   :  { %v347_v45 = vadd.s32 %v327_v53, %v3385_v8  ;;  %v363_v62 = vshll.u32 %v355_v31, 17  ;;  %v367_v52 = vshrl.u32 %v355_v31, 15  ;;  %v700_v27 = vshrl.u32 %v688_v18, 15 }
  0x77   :  { %v690_v28 = vadd.s32 %v686_v17, %v678_v22  ;;  %v691_v48 = vadd.s32 %v687_v7, %v679_v25  ;;  %v701_v49 = vor.u32 %v697_v42, %v693_v34  ;;  %v702_v55 = vor.u32 %v698_v46, %v694_v32 }
  0x78   :  { %v348_v56 = vadd.s32 %v328_v60, %v3385_v8  ;;  %v364_v61 = vshll.u32 %v356_v40, 17  ;;  %v368_v29 = vshrl.u32 %v356_v40, 15  ;;  %v703_v41 = vor.u32 %v699_v43, %v695_v38 }
  0x79   :  { %v357_v50 = vadd.s32 %v353_v23, %v345_v36  ;;  %v358_v57 = vadd.s32 %v354_v24, %v346_v54  ;;  %v369_v58 = vor.u32 %v365_v13, %v361_v47  ;;  %v370_v59 = vor.u32 %v366_v44, %v362_v37 }
  0x7a   :  { %v359_v63 = vadd.s32 %v355_v31, %v347_v45  ;;  %v371_v30 = vor.u32 %v367_v52, %v363_v62  ;;  %v692_v51 = vadd.s32 %v688_v18, %v680_v26  ;;  %v704_v53 = vor.u32 %v700_v27, %v696_v39 }
  0x7b   :  { %v705_v1 = vxor.u32 %v701_v49, %v689_v33  ;;  %v706_v2 = vxor.u32 %v702_v55, %v690_v28  ;;  %v360_v3 = vadd.s32 %v356_v40, %v348_v56  ;;  %v372_v4 = vor.u32 %v368_v29, %v364_v61 }
  0x7c   :  { %v707_v5 = vxor.u32 %v703_v41, %v691_v48  ;;  %v373_v6 = vxor.u32 %v369_v58, %v357_v50  ;;  %v374_v9 = vxor.u32 %v370_v59, %v358_v57  ;;  %v375_v10 = vxor.u32 %v371_v30, %v359_v63 }
  0x7d   :  { %v708_v60 = vxor.u32 %v704_v53, %v692_v51  ;;  %v713_v11 = vshll.u32 %v705_v1, 29  ;;  %v714_v12 = vshll.u32 %v706_v2, 29  ;;  %v717_v14 = vshrl.u32 %v705_v1, 3 }
  0x7e   :  { %v718_v17 = vshrl.u32 %v706_v2, 3  ;;  %v376_v7 = vxor.u32 %v372_v4, %v360_v3  ;;  %v715_v21 = vshll.u32 %v707_v5, 29  ;;  %v719_v22 = vshrl.u32 %v707_v5, 3 }
  0x7f   :  { %v381_v23 = vshll.u32 %v373_v6, 29  ;;  %v382_v24 = vshll.u32 %v374_v9, 29  ;;  %v385_v18 = vshrl.u32 %v373_v6, 3  ;;  %v386_v25 = vshrl.u32 %v374_v9, 3 }
  0x80   :  { %v383_v26 = vshll.u32 %v375_v10, 29  ;;  %v387_v31 = vshrl.u32 %v375_v10, 3  ;;  %v716_v34 = vshll.u32 %v708_v60, 29  ;;  %v720_v32 = vshrl.u32 %v708_v60, 3 }
  0x81   :  { %v709_v38 = vadd.s32 %v705_v1, %v689_v33  ;;  %v710_v39 = vadd.s32 %v706_v2, %v690_v28  ;;  %v721_v42 = vor.u32 %v717_v14, %v713_v11  ;;  %v722_v46 = vor.u32 %v718_v17, %v714_v12 }
  0x82   :  { %v384_v36 = vshll.u32 %v376_v7, 29  ;;  %v388_v54 = vshrl.u32 %v376_v7, 3  ;;  %v711_v40 = vadd.s32 %v707_v5, %v691_v48  ;;  %v723_v43 = vor.u32 %v719_v22, %v715_v21 }
  0x83   :  { %v377_v47 = vadd.s32 %v373_v6, %v357_v50  ;;  %v378_v37 = vadd.s32 %v374_v9, %v358_v57  ;;  %v389_v13 = vor.u32 %v385_v18, %v381_v23  ;;  %v390_v44 = vor.u32 %v386_v25, %v382_v24 }
  0x84   :  { %v379_v45 = vadd.s32 %v375_v10, %v359_v63  ;;  %v391_v62 = vor.u32 %v387_v31, %v383_v26  ;;  %v712_v52 = vadd.s32 %v708_v60, %v692_v51  ;;  %v724_v27 = vor.u32 %v720_v32, %v716_v34 }
  0x85   :  { %v725_v49 = vxor.u32 %v721_v42, %v709_v38  ;;  %v726_v55 = vxor.u32 %v722_v46, %v710_v39  ;;  %v380_v56 = vadd.s32 %v376_v7, %v360_v3  ;;  %v392_v61 = vor.u32 %v388_v54, %v384_v36 }
  0x86   :  { %v727_v33 = vxor.u32 %v723_v43, %v711_v40  ;;  %v393_v28 = vxor.u32 %v389_v13, %v377_v47  ;;  %v394_v29 = vxor.u32 %v390_v44, %v378_v37  ;;  %v395_v41 = vxor.u32 %v391_v62, %v379_v45 }
  0x87   :  { %v728_v58 = vxor.u32 %v724_v27, %v712_v52  ;;  %v733_v59 = vshll.u32 %v725_v49, 16  ;;  %v734_v48 = vshll.u32 %v726_v55, 16  ;;  %v737_v30 = vshrl.u32 %v725_v49, 16 }
  0x88   :  { %v738_v50 = vshrl.u32 %v726_v55, 16  ;;  %v396_v57 = vxor.u32 %v392_v61, %v380_v56  ;;  %v735_v53 = vshll.u32 %v727_v33, 16  ;;  %v739_v1 = vshrl.u32 %v727_v33, 16 }
  0x89   :  { %v401_v63 = vshll.u32 %v393_v28, 16  ;;  %v402_v2 = vshll.u32 %v394_v29, 16  ;;  %v405_v51 = vshrl.u32 %v393_v28, 16  ;;  %v406_v4 = vshrl.u32 %v394_v29, 16 }
  0x8a   :  { %v403_v5 = vshll.u32 %v395_v41, 16  ;;  %v407_v6 = vshrl.u32 %v395_v41, 16  ;;  %v736_v3 = vshll.u32 %v728_v58, 16  ;;  %v740_v9 = vshrl.u32 %v728_v58, 16 }
  0x8b   :  { %v729_v10 = vadd.s32 %v725_v49, %v709_v38  ;;  %v730_v60 = vadd.s32 %v726_v55, %v710_v39  ;;  %v741_v11 = vor.u32 %v737_v30, %v733_v59  ;;  %v742_v12 = vor.u32 %v738_v50, %v734_v48 }
  0x8c   :  { %v404_v14 = vshll.u32 %v396_v57, 16  ;;  %v408_v17 = vshrl.u32 %v396_v57, 16  ;;  %v731_v7 = vadd.s32 %v727_v33, %v711_v40  ;;  %v743_v21 = vor.u32 %v739_v1, %v735_v53 }
  0x8d   :  { %v397_v22 = vadd.s32 %v393_v28, %v377_v47  ;;  %v398_v23 = vadd.s32 %v394_v29, %v378_v37  ;;  %v409_v24 = vor.u32 %v405_v51, %v401_v63  ;;  %v410_v18 = vor.u32 %v406_v4, %v402_v2 }
  0x8e   :  { %v399_v25 = vadd.s32 %v395_v41, %v379_v45  ;;  %v411_v26 = vor.u32 %v407_v6, %v403_v5  ;;  %v732_v31 = vadd.s32 %v728_v58, %v712_v52  ;;  %v744_v34 = vor.u32 %v740_v9, %v736_v3 }
  0x8f   :  { %v745_v32 = vxor.u32 %v741_v11, %v729_v10  ;;  %v746_v42 = vxor.u32 %v742_v12, %v730_v60  ;;  %v400_v46 = vadd.s32 %v396_v57, %v380_v56  ;;  %v412_v36 = vor.u32 %v408_v17, %v404_v14 }
  0x90   :  { %v747_v38 = vxor.u32 %v743_v21, %v731_v7  ;;  %v413_v39 = vxor.u32 %v409_v24, %v397_v22  ;;  %v414_v54 = vxor.u32 %v410_v18, %v398_v23  ;;  %v415_v43 = vxor.u32 %v411_v26, %v399_v25 }
  0x91   :  { %v748_v13 = vxor.u32 %v744_v34, %v732_v31  ;;  %v753_v44 = vshll.u32 %v745_v32, 24  ;;  %v754_v40 = vshll.u32 %v746_v42, 24  ;;  %v757_v62 = vshrl.u32 %v745_v32, 8 }
  0x92   :  { %v758_v47 = vshrl.u32 %v746_v42, 8  ;;  %v416_v37 = vxor.u32 %v412_v36, %v400_v46  ;;  %v755_v27 = vshll.u32 %v747_v38, 24  ;;  %v759_v49 = vshrl.u32 %v747_v38, 8 }
  0x93   :  { %v421_v45 = vshll.u32 %v413_v39, 24  ;;  %v422_v55 = vshll.u32 %v414_v54, 24  ;;  %v425_v52 = vshrl.u32 %v413_v39, 8  ;;  %v426_v61 = vshrl.u32 %v414_v54, 8 }
  0x94   :  { %v423_v33 = vshll.u32 %v415_v43, 24  ;;  %v427_v28 = vshrl.u32 %v415_v43, 8  ;;  %v756_v56 = vshll.u32 %v748_v13, 24  ;;  %v760_v29 = vshrl.u32 %v748_v13, 8 }
  0x95   :  { %v749_v41 = vadd.s32 %v745_v32, %v729_v10  ;;  %v750_v58 = vadd.s32 %v746_v42, %v730_v60  ;;  %v761_v59 = vor.u32 %v757_v62, %v753_v44  ;;  %v762_v48 = vor.u32 %v758_v47, %v754_v40 }
  0x96   :  { %v424_v30 = vshll.u32 %v416_v37, 24  ;;  %v428_v50 = vshrl.u32 %v416_v37, 8  ;;  %v751_v57 = vadd.s32 %v747_v38, %v731_v7  ;;  %v763_v53 = vor.u32 %v759_v49, %v755_v27 }
  0x97   :  { %v417_v1 = vadd.s32 %v413_v39, %v397_v22  ;;  %v418_v63 = vadd.s32 %v414_v54, %v398_v23  ;;  %v429_v2 = vor.u32 %v425_v52, %v421_v45  ;;  %v430_v51 = vor.u32 %v426_v61, %v422_v55 }
  0x98   :  { %v419_v4 = vadd.s32 %v415_v43, %v399_v25  ;;  %v431_v5 = vor.u32 %v427_v28, %v423_v33  ;;  %v752_v6 = vadd.s32 %v748_v13, %v732_v31  ;;  %v764_v3 = vor.u32 %v760_v29, %v756_v56 }
  0x99   :  { %v765_v9 = vxor.u32 %v761_v59, %v749_v41  ;;  %v766_v11 = vxor.u32 %v762_v48, %v750_v58  ;;  %v420_v12 = vadd.s32 %v416_v37, %v400_v46  ;;  %v432_v14 = vor.u32 %v428_v50, %v424_v30 }
  0x9a   :  { %v767_v10 = vxor.u32 %v763_v53, %v751_v57  ;;  %v433_v60 = vxor.u32 %v429_v2, %v417_v1  ;;  %v434_v17 = vxor.u32 %v430_v51, %v418_v63  ;;  %v435_v21 = vxor.u32 %v431_v5, %v419_v4 }
  0x9b   :  { %v768_v24 = vxor.u32 %v764_v3, %v752_v6  ;;  %v773_v7 = vadd.s32 %v765_v9, %v3385_v8  ;;  %v774_v22 = vadd.s32 %v766_v11, %v3385_v8  ;;  %v436_v23 = vxor.u32 %v432_v14, %v420_v12 }
  0x9c   :  { %v775_v18 = vadd.s32 %v767_v10, %v3385_v8  ;;  %v441_v25 = vadd.s32 %v433_v60, %v3418_v35  ;;  %v442_v26 = vadd.s32 %v434_v17, %v3418_v35  ;;  %v443_v31 = vadd.s32 %v435_v21, %v3418_v35 }
  0x9d   :  { %v776_v34 = vadd.s32 %v768_v24, %v3385_v8  ;;  %v437_v32 = vadd.s32 1013904242, %v417_v1  ;;  %v777_v42 = vadd.s32 2, %v773_v7  ;;  %v778_v46 = vadd.s32 2, %v774_v22 }
  0x9e   :  { %v438_v36 = vadd.s32 1013904242, %v418_v63  ;;  %v439_v38 = vadd.s32 1013904242, %v419_v4  ;;  %v444_v39 = vadd.s32 %v436_v23, %v3418_v35  ;;  %v779_v54 = vadd.s32 2, %v775_v18 }
  0x9f   :  { %v440_v43 = vadd.s32 1013904242, %v420_v12  ;;  %v445_v13 = vadd.s32 4, %v441_v25  ;;  %v446_v44 = vadd.s32 4, %v442_v26  ;;  %v769_v40 = vadd.s32 %v749_v41, %v3418_v35 }
  0xa0   :  { %v447_v62 = vadd.s32 4, %v443_v31  ;;  %v770_v47 = vadd.s32 %v750_v58, %v3418_v35  ;;  %v771_v37 = vadd.s32 %v751_v57, %v3418_v35  ;;  %v780_v27 = vadd.s32 2, %v776_v34 }
  0xa1   :  { %v785_v49 = vshll.u32 %v777_v42, 13  ;;  %v786_v45 = vshll.u32 %v778_v46, 13  ;;  %v789_v55 = vshrl.u32 %v777_v42, 19  ;;  %v790_v52 = vshrl.u32 %v778_v46, 19 }
  0xa2   :  { %v448_v61 = vadd.s32 4, %v444_v39  ;;  %v772_v33 = vadd.s32 %v752_v6, %v3418_v35  ;;  %v787_v28 = vshll.u32 %v779_v54, 13  ;;  %v791_v56 = vshrl.u32 %v779_v54, 19 }
  0xa3   :  { %v453_v29 = vshll.u32 %v445_v13, 13  ;;  %v454_v59 = vshll.u32 %v446_v44, 13  ;;  %v457_v48 = vshrl.u32 %v445_v13, 19  ;;  %v458_v30 = vshrl.u32 %v446_v44, 19 }
  0xa4   :  { %v455_v41 = vshll.u32 %v447_v62, 13  ;;  %v459_v50 = vshrl.u32 %v447_v62, 19  ;;  %v788_v53 = vshll.u32 %v780_v27, 13  ;;  %v792_v58 = vshrl.u32 %v780_v27, 19 }
  0xa5   :  { %v781_v1 = vadd.s32 %v777_v42, %v769_v40  ;;  %v782_v57 = vadd.s32 %v778_v46, %v770_v47  ;;  %v793_v63 = vor.u32 %v789_v55, %v785_v49  ;;  %v794_v2 = vor.u32 %v790_v52, %v786_v45 }
  0xa6   :  { %v449_v51 = vadd.s32 %v445_v13, %v437_v32  ;;  %v450_v4 = vadd.s32 %v446_v44, %v438_v36  ;;  %v783_v5 = vadd.s32 %v779_v54, %v771_v37  ;;  %v795_v3 = vor.u32 %v791_v56, %v787_v28 }
  0xa7   :  { %v456_v9 = vshll.u32 %v448_v61, 13  ;;  %v460_v6 = vshrl.u32 %v448_v61, 19  ;;  %v461_v11 = vor.u32 %v457_v48, %v453_v29  ;;  %v462_v12 = vor.u32 %v458_v30, %v454_v59  ;;  %v48_v29 = vld [vmem:[#allocation4] sm:$0xff] }
  0xa8   :  { %v451_v14 = vadd.s32 %v447_v62, %v439_v38  ;;  %v463_v10 = vor.u32 %v459_v50, %v455_v41  ;;  %v784_v60 = vadd.s32 %v780_v27, %v772_v33  ;;  %v796_v17 = vor.u32 %v792_v58, %v788_v53  ;;  %v49_v50 = vld [vmem:[#allocation4 + $0x8] sm:$0xff] }
  0xa9   :  { %v797_v21 = vxor.u32 %v793_v63, %v781_v1  ;;  %v798_v24 = vxor.u32 %v794_v2, %v782_v57  ;;  %v799_v7 = vxor.u32 %v795_v3, %v783_v5  ;;  %v452_v22 = vadd.s32 %v448_v61, %v440_v43 }
  0xaa   :  { %v464_v23 = vor.u32 %v460_v6, %v456_v9  ;;  %v465_v18 = vxor.u32 %v461_v11, %v449_v51  ;;  %v466_v25 = vxor.u32 %v462_v12, %v450_v4  ;;  %v467_v26 = vxor.u32 %v463_v10, %v451_v14 }
  0xab   :  { %v800_v31 = vxor.u32 %v796_v17, %v784_v60  ;;  %v805_v34 = vshll.u32 %v797_v21, 15  ;;  %v806_v32 = vshll.u32 %v798_v24, 15  ;;  %v807_v42 = vshll.u32 %v799_v7, 15 }
  0xac   :  { %v809_v46 = vshrl.u32 %v797_v21, 17  ;;  %v810_v36 = vshrl.u32 %v798_v24, 17  ;;  %v811_v39 = vshrl.u32 %v799_v7, 17  ;;  %v468_v54 = vxor.u32 %v464_v23, %v452_v22 }
  0xad   :  { %v473_v38 = vshll.u32 %v465_v18, 15  ;;  %v474_v13 = vshll.u32 %v466_v25, 15  ;;  %v475_v44 = vshll.u32 %v467_v26, 15  ;;  %v477_v40 = vshrl.u32 %v465_v18, 17 }
  0xae   :  { %v478_v62 = vshrl.u32 %v466_v25, 17  ;;  %v808_v47 = vshll.u32 %v800_v31, 15  ;;  %v479_v43 = vshrl.u32 %v467_v26, 17  ;;  %v801_v37 = vadd.s32 %v797_v21, %v781_v1  ;;  %v50_v1 = vld [vmem:[#allocation4 + $0x10] sm:$0xff] }
  0xaf   :  { %v802_v27 = vadd.s32 %v798_v24, %v782_v57  ;;  %v803_v49 = vadd.s32 %v799_v7, %v783_v5  ;;  %v812_v45 = vshrl.u32 %v800_v31, 17  ;;  %v813_v55 = vor.u32 %v809_v46, %v805_v34  ;;  %v51_v34 = vld [vmem:[#allocation4 + $0x18] sm:$0xff] }
  0xb0   :  { %v814_v52 = vor.u32 %v810_v36, %v806_v32  ;;  %v815_v61 = vor.u32 %v811_v39, %v807_v42  ;;  %v52_v33 = vstv %s3284_s0  ;;  %v469_v28 = vadd.s32 %v465_v18, %v449_v51 }
  0xb1   :  { %v804_v56 = vadd.s32 %v800_v31, %v784_v60  ;;  %v476_v59 = vshll.u32 %v468_v54, 15  ;;  %v480_v48 = vshrl.u32 %v468_v54, 17  ;;  %v481_v30 = vor.u32 %v477_v40, %v473_v38 }
  0xb2   :  { %v816_v41 = vor.u32 %v812_v45, %v808_v47  ;;  %v470_v53 = vadd.s32 %v466_v25, %v450_v4  ;;  %v471_v58 = vadd.s32 %v467_v26, %v451_v14  ;;  %v482_v63 = vor.u32 %v478_v62, %v474_v13 }
  0xb3   :  { %v483_v2 = vor.u32 %v479_v43, %v475_v44  ;;  %v817_v57 = vxor.u32 %v813_v55, %v801_v37  ;;  %v818_v5 = vxor.u32 %v814_v52, %v802_v27  ;;  %v819_v3 = vxor.u32 %v815_v61, %v803_v49 }
  0xb4   :  { %v53_v9 = vmul.f32 %v52_v33, %v48_v29  ;;  %v820_v6 = vxor.u32 %v816_v41, %v804_v56  ;;  %v3480_v11 = vmul.f32 %v52_v33, %v49_v50  ;;  %v472_v51 = vadd.s32 %v468_v54, %v452_v22 }
  0xb5   :  { %v484_v12 = vor.u32 %v480_v48, %v476_v59  ;;  %v485_v10 = vxor.u32 %v481_v30, %v469_v28  ;;  %v3482_v60 = vmul.f32 %v52_v33, %v50_v1  ;;  %v486_v17 = vxor.u32 %v482_v63, %v470_v53 }
  0xb6   :  { %v487_v21 = vxor.u32 %v483_v2, %v471_v58  ;;  %v821_v24 = vadd.s32 %v817_v57, %v801_v37  ;;  %v822_v4 = vadd.s32 %v818_v5, %v802_v27  ;;  %v825_v14 = vshll.u32 %v817_v57, 26 }
  0xb7   :  { %v826_v7 = vshll.u32 %v818_v5, 26  ;;  %v827_v23 = vshll.u32 %v819_v3, 26  ;;  %v828_v18 = vshll.u32 %v820_v6, 26  ;;  %v829_v25 = vshrl.u32 %v817_v57, 6 }
  0xb8   :  { %v830_v26 = vshrl.u32 %v818_v5, 6  ;;  %v831_v31 = vshrl.u32 %v819_v3, 6  ;;  %v488_v32 = vxor.u32 %v484_v12, %v472_v51  ;;  %v493_v42 = vshll.u32 %v485_v10, 26 }
  0xb9   :  { %v823_v46 = vadd.s32 %v819_v3, %v803_v49  ;;  %v832_v22 = vshrl.u32 %v820_v6, 6  ;;  %v494_v36 = vshll.u32 %v486_v17, 26  ;;  %v833_v39 = vor.u32 %v829_v25, %v825_v14 }
  0xba   :  { %v834_v54 = vor.u32 %v830_v26, %v826_v7  ;;  %v835_v38 = vor.u32 %v831_v31, %v827_v23  ;;  %v497_v13 = vshrl.u32 %v485_v10, 6  ;;  %v498_v44 = vshrl.u32 %v486_v17, 6 }
  0xbb   :  { %v824_v40 = vadd.s32 %v820_v6, %v804_v56  ;;  %v836_v62 = vor.u32 %v832_v22, %v828_v18  ;;  %v56_v47 = vmul.f32 %v52_v33, %v51_v34  ;;  %v57_v43 = vsub.f32 0.0, %v53_v9 }
  0xbc   :  { %v837_v37 = vxor.u32 %v833_v39, %v821_v24  ;;  %v838_v27 = vxor.u32 %v834_v54, %v822_v4  ;;  %v58_v45 = vsub.f32 0.0, %v3480_v11  ;;  %v495_v55 = vshll.u32 %v487_v21, 26 }
  0xbd   :  { %v499_v52 = vshrl.u32 %v487_v21, 6  ;;  %v839_v61 = vxor.u32 %v835_v38, %v823_v46  ;;  %v59_v49 = vsub.f32 0.0, %v3482_v60  ;;  %v489_v29 = vadd.s32 %v485_v10, %v469_v28 }
  0xbe   :  { %v496_v59 = vshll.u32 %v488_v32, 26  ;;  %v500_v48 = vshrl.u32 %v488_v32, 6  ;;  %v490_v30 = vadd.s32 %v486_v17, %v470_v53  ;;  %v501_v41 = vor.u32 %v497_v13, %v493_v42 }
  0xbf   :  { %v502_v50 = vor.u32 %v498_v44, %v494_v36  ;;  %v840_v63 = vxor.u32 %v836_v62, %v824_v40  ;;  %v845_v56 = vshll.u32 %v837_v37, 6  ;;  %v846_v2 = vshll.u32 %v838_v27, 6 }
  0xc0   :  { %v849_v33 = vshrl.u32 %v837_v37, 26  ;;  %v850_v1 = vshrl.u32 %v838_v27, 26  ;;  %v491_v57 = vadd.s32 %v487_v21, %v471_v58  ;;  %v503_v5 = vor.u32 %v499_v52, %v495_v55 }
  0xc1   :  { %v847_v3 = vshll.u32 %v839_v61, 6  ;;  %v851_v9 = vshrl.u32 %v839_v61, 26  ;;  %v60_v6 = vsub.f32 0.0, %v56_v47  ;;  %v61_v11 = vmul.f32 1.442695, %v57_v43 }
  0xc2   :  { %v492_v12 = vadd.s32 %v488_v32, %v472_v51  ;;  %v504_v14 = vor.u32 %v500_v48, %v496_v59  ;;  %v505_v60 = vxor.u32 %v501_v41, %v489_v29  ;;  %v506_v28 = vxor.u32 %v502_v50, %v490_v30 }
  0xc3   :  { %v848_v10 = vshll.u32 %v840_v63, 6  ;;  %v852_v7 = vshrl.u32 %v840_v63, 26  ;;  %v841_v53 = vadd.s32 %v837_v37, %v821_v24  ;;  %v842_v17 = vadd.s32 %v838_v27, %v822_v4 }
  0xc4   :  { %v853_v23 = vor.u32 %v849_v33, %v845_v56  ;;  %v854_v18 = vor.u32 %v850_v1, %v846_v2  ;;  %v63_v25 = vmul.f32 1.442695, %v58_v45  ;;  %v507_v26 = vxor.u32 %v503_v5, %v491_v57 }
  0xc5   :  { %v3486_v31 = vadd.s32 %v839_v61, %v823_v46  ;;  %v855_v58 = vor.u32 %v851_v9, %v847_v3  ;;  %3290 = vpow2.f32 %v61_v11  ;;  %v65_v21 = vmul.f32 1.442695, %v59_v49 }
  0xc6   :  { %v508_v34 = vxor.u32 %v504_v14, %v492_v12  ;;  %v3488_v42 = vadd.s32 %v505_v60, %v489_v29  ;;  %v3490_v51 = vadd.s32 %v506_v28, %v490_v30  ;;  %v3492_v32 = vadd.s32 %v507_v26, %v491_v57 }
  0xc7   :  { %v3494_v22 = vadd.s32 %v840_v63, %v824_v40  ;;  %v856_v24 = vor.u32 %v852_v7, %v848_v10  ;;  %v513_v4 = vshll.u32 %v505_v60, 6  ;;  %v514_v36 = vshll.u32 %v506_v28, 6 }
  0xc8   :  { %v857_v39 = vxor.u32 %v853_v23, %v841_v53  ;;  %v858_v54 = vxor.u32 %v854_v18, %v842_v17  ;;  %v515_v38 = vshll.u32 %v507_v26, 6  ;;  %v517_v46 = vshrl.u32 %v505_v60, 26 }
  0xc9   :  { %v518_v13 = vshrl.u32 %v506_v28, 26  ;;  %v859_v44 = vxor.u32 %v855_v58, %v3486_v31  ;;  %v516_v62 = vshll.u32 %v508_v34, 6  ;;  %v519_v47 = vshrl.u32 %v507_v26, 26 }
  0xca   :  { %v520_v43 = vshrl.u32 %v508_v34, 26  ;;  %v529_v37 = vadd.s32 %v3488_v42, %v3418_v35  ;;  %3292 = vpow2.f32 %v63_v25  ;;  %v67_v27 = vmul.f32 1.442695, %v60_v6 }
  0xcb   :  { %v3499_v40 = vadd.s32 %v508_v34, %v492_v12  ;;  %v860_v45 = vxor.u32 %v856_v24, %v3494_v22  ;;  %v3502_v55 = vpop.eup %3290  ;;  %v530_v52 = vadd.s32 %v3490_v51, %v3418_v35  ;;  %v531_v61 = vadd.s32 %v3492_v32, %v3418_v35 }
  0xcc   :  { %v865_v49 = vadd.s32 1013904242, %v857_v39  ;;  %v866_v29 = vadd.s32 1013904242, %v858_v54  ;;  %v521_v59 = vor.u32 %v517_v46, %v513_v4  ;;  %v522_v48 = vor.u32 %v518_v13, %v514_v36 }
  0xcd   :  { %v532_v30 = vadd.s32 %v3499_v40, %v3418_v35  ;;  %v867_v41 = vadd.s32 1013904242, %v859_v44  ;;  %3294 = vpow2.f32 %v65_v21  ;;  %v523_v50 = vor.u32 %v519_v47, %v515_v38 }
  0xce   :  { %v524_v63 = vor.u32 %v520_v43, %v516_v62  ;;  %v541_v56 = vshrl.u32 %v529_v37, 8  ;;  %3296 = vpow2.f32 %v67_v27  ;;  %v868_v2 = vadd.s32 1013904242, %v860_v45 }
  0xcf   :  { %v542_v33 = vshrl.u32 %v530_v52, 8  ;;  %v543_v1 = vshrl.u32 %v531_v61, 8  ;;  %v869_v57 = vadd.s32 3, %v865_v49  ;;  %v870_v5 = vadd.s32 3, %v866_v29 }
  0xd0   :  { %v3510_v3 = vpop.eup %3292  ;;  %v525_v9 = vxor.u32 %v521_v59, %v3488_v42  ;;  %v526_v6 = vxor.u32 %v522_v48, %v3490_v51  ;;  %v544_v11 = vshrl.u32 %v532_v30, 8  ;;  %v871_v12 = vadd.s32 3, %v867_v41 }
  0xd1   :  { %v527_v14 = vxor.u32 %v523_v50, %v3492_v32  ;;  %v528_v60 = vxor.u32 %v524_v63, %v3499_v40  ;;  %v545_v28 = vcvt.s32.f32 %v541_v56  ;;  %v1129_v10 = vadd.s32 1013904244, %v3390_v15 }
  0xd2   :  { %v861_v7 = vadd.s32 %v841_v53, %v3385_v8  ;;  %v862_v23 = vadd.s32 %v842_v17, %v3385_v8  ;;  %v872_v18 = vadd.s32 3, %v868_v2  ;;  %v1130_v25 = vadd.s32 1013904244, %v3393_v16 }
  0xd3   :  { %v3520_v26 = vpop.eup %3294  ;;  %v877_v58 = vshll.u32 %v869_v57, 17  ;;  %v878_v21 = vshll.u32 %v870_v5, 17  ;;  %v881_v34 = vshrl.u32 %v869_v57, 15  ;;  %v882_v42 = vshrl.u32 %v870_v5, 15 }
  0xd4   :  { %4487 = vst [vmem:[#allocation16_spill] sm:$0xff] %v3520_v26  ;;  %v3522_v51 = vpop.eup %3296  ;;  %v863_v32 = vadd.s32 %v3486_v31, %v3385_v8  ;;  %v879_v24 = vshll.u32 %v871_v12, 17  ;;  %v883_v4 = vshrl.u32 %v871_v12, 15  ;;  %v1131_v53 = vadd.s32 1013904244, %v3398_v19 }
  0xd5   :  { %4488 = vst [vmem:[#allocation17_spill] sm:$0xff] %v3522_v51  ;;  %v546_v36 = vcvt.s32.f32 %v542_v33  ;;  %v547_v17 = vcvt.s32.f32 %v543_v1  ;;  %v1132_v39 = vadd.s32 1013904244, %v3401_v20  ;;  %v1133_v54 = vxor.u32 3731785613, %v1129_v10 }
  0xd6   :  { %v864_v38 = vadd.s32 %v3494_v22, %v3385_v8  ;;  %v880_v46 = vshll.u32 %v872_v18, 17  ;;  %v884_v13 = vshrl.u32 %v872_v18, 15  ;;  %v1134_v44 = vxor.u32 3731785613, %v1130_v25 }
  0xd7   :  { %v873_v62 = vadd.s32 %v869_v57, %v861_v7  ;;  %v874_v47 = vadd.s32 %v870_v5, %v862_v23  ;;  %v885_v43 = vor.u32 %v881_v34, %v877_v58  ;;  %v886_v37 = vor.u32 %v882_v42, %v878_v21 }
  0xd8   :  { %v548_v31 = vcvt.s32.f32 %v544_v11  ;;  %v875_v27 = vadd.s32 %v871_v12, %v863_v32  ;;  %v887_v40 = vor.u32 %v883_v4, %v879_v24  ;;  %v1135_v45 = vxor.u32 3731785613, %v1131_v53 }
  0xd9   :  { %v533_v52 = vadd.s32 %v525_v9, %v3385_v8  ;;  %v534_v61 = vadd.s32 %v526_v6, %v3385_v8  ;;  %v535_v49 = vadd.s32 %v527_v14, %v3385_v8  ;;  %v1136_v29 = vxor.u32 3731785613, %v1132_v39 }
  0xda   :  { %v876_v59 = vadd.s32 %v872_v18, %v864_v38  ;;  %v888_v22 = vor.u32 %v884_v13, %v880_v46  ;;  %v1141_v48 = vshll.u32 %v1133_v54, 15  ;;  %v1145_v30 = vshrl.u32 %v1133_v54, 17 }
  0xdb   :  { %v536_v41 = vadd.s32 %v528_v60, %v3385_v8  ;;  %v889_v50 = vxor.u32 %v885_v43, %v873_v62  ;;  %v890_v63 = vxor.u32 %v886_v37, %v874_v47  ;;  %v1142_v56 = vshll.u32 %v1134_v44, 15 }
  0xdc   :  { %v891_v2 = vxor.u32 %v887_v40, %v875_v27  ;;  %v1143_v33 = vshll.u32 %v1135_v45, 15  ;;  %v1146_v1 = vshrl.u32 %v1134_v44, 17  ;;  %v1147_v57 = vshrl.u32 %v1135_v45, 17 }
  0xdd   :  { %v549_v5 = vadd.f32 1.0, %v545_v28  ;;  %v1137_v9 = vadd.s32 %v1133_v54, %v1129_v10  ;;  %v1144_v11 = vshll.u32 %v1136_v29, 15  ;;  %v1148_v6 = vshrl.u32 %v1136_v29, 17 }
  0xde   :  { %v892_v12 = vxor.u32 %v888_v22, %v876_v59  ;;  %v1138_v14 = vadd.s32 %v1134_v44, %v1130_v25  ;;  %v1139_v7 = vadd.s32 %v1135_v45, %v1131_v53  ;;  %v1149_v23 = vor.u32 %v1145_v30, %v1141_v48 }
  0xdf   :  { %v897_v18 = vshll.u32 %v889_v50, 29  ;;  %v898_v58 = vshll.u32 %v890_v63, 29  ;;  %v901_v21 = vshrl.u32 %v889_v50, 3  ;;  %v902_v34 = vshrl.u32 %v890_v63, 3 }
  0xe0   :  { %v899_v60 = vshll.u32 %v891_v2, 29  ;;  %v903_v42 = vshrl.u32 %v891_v2, 3  ;;  %v1150_v32 = vor.u32 %v1146_v1, %v1142_v56  ;;  %v1151_v24 = vor.u32 %v1147_v57, %v1143_v33 }
  0xe1   :  { %v550_v4 = vadd.f32 1.0, %v546_v36  ;;  %v3534_v38 = vadd.f32 1.0, %v547_v17  ;;  %v1140_v46 = vadd.s32 %v1136_v29, %v1132_v39  ;;  %v1152_v28 = vor.u32 %v1148_v6, %v1144_v11 }
  0xe2   :  { %v3536_v10 = vadd.f32 1.0, %v548_v31  ;;  %v900_v54 = vshll.u32 %v892_v12, 29  ;;  %v904_v13 = vshrl.u32 %v892_v12, 3  ;;  %v1153_v25 = vxor.u32 %v1149_v23, %v1137_v9 }
  0xe3   :  { %v893_v53 = vadd.s32 %v889_v50, %v873_v62  ;;  %v894_v44 = vadd.s32 %v890_v63, %v874_v47  ;;  %v905_v43 = vor.u32 %v901_v21, %v897_v18  ;;  %v906_v37 = vor.u32 %v902_v34, %v898_v58 }
  0xe4   :  { %v895_v40 = vadd.s32 %v891_v2, %v875_v27  ;;  %v907_v45 = vor.u32 %v903_v42, %v899_v60  ;;  %v1154_v22 = vxor.u32 %v1150_v32, %v1138_v14  ;;  %v1155_v48 = vxor.u32 %v1151_v24, %v1139_v7 }
  0xe5   :  { %v537_v30 = vadd.s32 5, %v533_v52  ;;  %v538_v56 = vadd.s32 5, %v534_v61  ;;  %v539_v36 = vadd.s32 5, %v535_v49  ;;  %v1156_v17 = vxor.u32 %v1152_v28, %v1140_v46 }
  0xe6   :  { %v896_v33 = vadd.s32 %v892_v12, %v876_v59  ;;  %v908_v39 = vor.u32 %v904_v13, %v900_v54  ;;  %v1161_v29 = vshll.u32 %v1153_v25, 26  ;;  %v1165_v31 = vshrl.u32 %v1153_v25, 6 }
  0xe7   :  { %v540_v1 = vadd.s32 5, %v536_v41  ;;  %v3538_v57 = vmul.f32 5.9604645e-08, %v549_v5  ;;  %v909_v11 = vxor.u32 %v905_v43, %v893_v53  ;;  %v910_v62 = vxor.u32 %v906_v37, %v894_v44 }
  0xe8   :  { %v3540_v47 = vmul.f32 5.9604645e-08, %v550_v4  ;;  %v911_v50 = vxor.u32 %v907_v45, %v895_v40  ;;  %v1162_v27 = vshll.u32 %v1154_v22, 26  ;;  %v1163_v63 = vshll.u32 %v1155_v48, 26 }
  0xe9   :  { %v1164_v2 = vshll.u32 %v1156_v17, 26  ;;  %v1166_v6 = vshrl.u32 %v1154_v22, 6  ;;  %v1167_v52 = vshrl.u32 %v1155_v48, 6  ;;  %v1168_v61 = vshrl.u32 %v1156_v17, 6 }
  0xea   :  { %v557_v49 = vshrl.u32 %v537_v30, 8  ;;  %v912_v23 = vxor.u32 %v908_v39, %v896_v33  ;;  %v1157_v59 = vadd.s32 %v1153_v25, %v1137_v9  ;;  %v1169_v12 = vor.u32 %v1165_v31, %v1161_v29 }
  0xeb   :  { %v917_v18 = vshll.u32 %v909_v11, 16  ;;  %v918_v58 = vshll.u32 %v910_v62, 16  ;;  %v921_v41 = vshrl.u32 %v909_v11, 16  ;;  %v922_v5 = vshrl.u32 %v910_v62, 16 }
  0xec   :  { %v919_v21 = vshll.u32 %v911_v50, 16  ;;  %v923_v34 = vshrl.u32 %v911_v50, 16  ;;  %v1158_v60 = vadd.s32 %v1154_v22, %v1138_v14  ;;  %v1159_v42 = vadd.s32 %v1155_v48, %v1139_v7 }
  0xed   :  { %v1160_v32 = vadd.s32 %v1156_v17, %v1140_v46  ;;  %v1170_v24 = vor.u32 %v1166_v6, %v1162_v27  ;;  %v1171_v4 = vor.u32 %v1167_v52, %v1163_v63  ;;  %v1172_v28 = vor.u32 %v1168_v61, %v1164_v2 }
  0xee   :  { %v558_v54 = vshrl.u32 %v538_v56, 8  ;;  %v920_v13 = vshll.u32 %v912_v23, 16  ;;  %v924_v43 = vshrl.u32 %v912_v23, 16  ;;  %v1173_v37 = vxor.u32 %v1169_v12, %v1157_v59 }
  0xef   :  { %v913_v45 = vadd.s32 %v909_v11, %v893_v53  ;;  %v914_v30 = vadd.s32 %v910_v62, %v894_v44  ;;  %v925_v9 = vor.u32 %v921_v41, %v917_v18  ;;  %v926_v25 = vor.u32 %v922_v5, %v918_v58 }
  0xf0   :  { %v559_v39 = vshrl.u32 %v539_v36, 8  ;;  %v560_v29 = vshrl.u32 %v540_v1, 8  ;;  %v915_v31 = vadd.s32 %v911_v50, %v895_v40  ;;  %v927_v0 = vor.u32 %v923_v34, %v919_v21 }
  0xf1   :  { %v3543_v20 = vmul.f32 5.9604645e-08, %v3534_v38  ;;  %v1174_v14 = vxor.u32 %v1170_v24, %v1158_v60  ;;  %v1175_v7 = vxor.u32 %v1171_v4, %v1159_v42  ;;  %v1176_v46 = vxor.u32 %v1172_v28, %v1160_v32 }
  0xf2   :  { %v916_v22 = vadd.s32 %v912_v23, %v896_v33  ;;  %v928_v48 = vor.u32 %v924_v43, %v920_v13  ;;  %v1181_v56 = vshll.u32 %v1173_v37, 6  ;;  %v1185_v17 = vshrl.u32 %v1173_v37, 26 }
  0xf3   :  { %v561_v27 = vcvt.s32.f32 %v557_v49  ;;  %v562_v63 = vcvt.s32.f32 %v558_v54  ;;  %v929_v53 = vxor.u32 %v925_v9, %v913_v45  ;;  %v930_v44 = vxor.u32 %v926_v25, %v914_v30 }
  0xf4   :  { %v563_v11 = vcvt.s32.f32 %v559_v39  ;;  %v564_v62 = vcvt.s32.f32 %v560_v29  ;;  %v931_v36 = vxor.u32 %v927_v0, %v915_v31  ;;  %v3545_v1 = vadd.s32 %v1173_v37, %v1157_v59 }
  0xf5   :  { %v1182_v40 = vshll.u32 %v1174_v14, 6  ;;  %v1183_v50 = vshll.u32 %v1175_v7, 6  ;;  %v1186_v38 = vshrl.u32 %v1174_v14, 26  ;;  %v1187_v2 = vshrl.u32 %v1175_v7, 26 }
  0xf6   :  { %v932_v6 = vxor.u32 %v928_v48, %v916_v22  ;;  %v1184_v52 = vshll.u32 %v1176_v46, 6  ;;  %v1188_v61 = vshrl.u32 %v1176_v46, 26  ;;  %v1189_v33 = vor.u32 %v1185_v17, %v1181_v56 }
  0xf7   :  { %v937_v23 = vshll.u32 %v929_v53, 24  ;;  %v938_v12 = vshll.u32 %v930_v44, 24  ;;  %v941_v18 = vshrl.u32 %v929_v53, 8  ;;  %v942_v49 = vshrl.u32 %v930_v44, 8 }
  0xf8   :  { %v565_v58 = vadd.f32 1.0, %v561_v27  ;;  %v939_v41 = vshll.u32 %v931_v36, 24  ;;  %v943_v5 = vshrl.u32 %v931_v36, 8  ;;  %v3547_v21 = vadd.s32 %v1174_v14, %v1158_v60 }
  0xf9   :  { %v3549_v0 = vadd.s32 %v1175_v7, %v1159_v42  ;;  %v3551_v59 = vadd.s32 %v1176_v46, %v1160_v32  ;;  %v1190_v34 = vor.u32 %v1186_v38, %v1182_v40  ;;  %v1191_v24 = vor.u32 %v1187_v2, %v1183_v50 }
  0xfa   :  { %v933_v4 = vadd.s32 %v929_v53, %v913_v45  ;;  %v940_v28 = vshll.u32 %v932_v6, 24  ;;  %v944_v54 = vshrl.u32 %v932_v6, 8  ;;  %v1192_v13 = vor.u32 %v1188_v61, %v1184_v52 }
  0xfb   :  { %v934_v43 = vadd.s32 %v930_v44, %v914_v30  ;;  %v945_v37 = vor.u32 %v941_v18, %v937_v23  ;;  %v946_v9 = vor.u32 %v942_v49, %v938_v12  ;;  %v1193_v25 = vxor.u32 %v1189_v33, %v3545_v1 }
  0xfc   :  { %v566_v39 = vadd.f32 1.0, %v562_v63  ;;  %v567_v29 = vadd.f32 1.0, %v563_v11  ;;  %v935_v48 = vadd.s32 %v931_v36, %v915_v31  ;;  %v947_v60 = vor.u32 %v943_v5, %v939_v41 }
  0xfd   :  { %vm573_vm4 = vcmp.gt.f32.partialorder %v3538_v57, %v3502_v55  ;;  %vm574_vm5 = vcmp.gt.f32.partialorder %v3540_v47, %v3510_v3  ;;  %v1194_v42 = vxor.u32 %v1190_v34, %v3547_v21  ;;  %v1195_v32 = vxor.u32 %v1191_v24, %v3549_v0 }
  0xfe   :  { %vm575_vm6 = vcmp.gt.f32.partialorder %v3543_v20, %v3520_v26  ;;  %v3562_v45 = vadd.s32 %v932_v6, %v916_v22  ;;  %v948_v30 = vor.u32 %v944_v54, %v940_v28  ;;  %v1196_v14 = vxor.u32 %v1192_v13, %v3551_v59 }
  0xff   :  { %v568_v31 = vadd.f32 1.0, %v564_v62  ;;  %v949_v7 = vxor.u32 %v945_v37, %v933_v4  ;;  %v950_v46 = vxor.u32 %v946_v9, %v934_v43  ;;  %v1201_v56 = vadd.s32 %v1193_v25, %v3418_v35 }
 0x100   :  { %v569_v17 = vmul.f32 5.9604645e-08, %v565_v58  ;;  %v570_v27 = vmul.f32 5.9604645e-08, %v566_v39  ;;  %v571_v63 = vmul.f32 5.9604645e-08, %v567_v29  ;;  %v951_v53 = vxor.u32 %v947_v60, %v935_v48 }
 0x101   :  { %v3567_v44 = vmul.f32 5.9604645e-08, %v3536_v10  ;;  %v4461_v11 = vmov 0.0   ;;  %v1202_v62 = vadd.s32 %v1194_v42, %v3418_v35  ;;  %v1203_v36 = vadd.s32 %v1195_v32, %v3418_v35 }
 0x102   :  { %v3573_v22 = vsel %vm573_vm4, 1.0, %v4461_v11  ;;  %v3581_v40 = vsel %vm574_vm5, 1.0, %v4461_v11  ;;  %v3587_v10 = vsel %vm575_vm6, 1.0, %v4461_v11  ;;  %v952_v50 = vxor.u32 %v948_v30, %v3562_v45 }
 0x103   :  { %v1204_v38 = vadd.s32 %v1196_v14, %v3418_v35  ;;  %v572_v2 = vmul.f32 5.9604645e-08, %v568_v31  ;;  %v957_v6 = vadd.s32 %v949_v7, %v3418_v35  ;;  %v958_v52 = vadd.s32 %v950_v46, %v3418_v35 }
 0x104   :  { %v1205_v61 = vadd.s32 1, %v1201_v56  ;;  %v3594_v33 = vmul.f32 %v569_v17, %v3538_v57  ;;  %v3597_v23 = vmul.f32 %v570_v27, %v3540_v47  ;;  %v3600_v12 = vmul.f32 %v571_v63, %v3543_v20 }
 0x105   :  { %v959_v18 = vadd.s32 %v951_v53, %v3418_v35  ;;  %v953_v49 = vadd.s32 1013904242, %v933_v4  ;;  %v954_v58 = vadd.s32 1013904242, %v934_v43  ;;  %v1206_v41 = vadd.s32 1, %v1202_v62 }
 0x106   :  { %v1207_v5 = vadd.s32 1, %v1203_v36  ;;  %vm576_vm7 = vcmp.gt.f32.partialorder %v3567_v44, %v3522_v51  ;;  %v955_v34 = vadd.s32 1013904242, %v935_v48  ;;  %v960_v24 = vadd.s32 %v952_v50, %v3418_v35 }
 0x107   :  { %v1197_v57 = vadd.s32 1013904242, %v3545_v1  ;;  %v1208_v28 = vadd.s32 1, %v1204_v38  ;;  %v961_v47 = vadd.s32 4, %v957_v6  ;;  %v962_v54 = vadd.s32 4, %v958_v52 }
 0x108   :  { %v1213_v13 = vshll.u32 %v1205_v61, 17  ;;  %v1217_v20 = vshrl.u32 %v1205_v61, 15  ;;  %v3608_v37 = vmul.f32 %v572_v2, %v3567_v44  ;;  %v963_v4 = vadd.s32 4, %v959_v18 }
 0x109   :  { %v1198_v43 = vadd.s32 1013904242, %v3547_v21  ;;  %v1199_v9 = vadd.s32 1013904242, %v3549_v0  ;;  %v1214_v25 = vshll.u32 %v1206_v41, 17  ;;  %v1215_v39 = vshll.u32 %v1207_v5, 17 }
 0x10a   :  { %v1218_v29 = vshrl.u32 %v1206_v41, 15  ;;  %v1219_v48 = vshrl.u32 %v1207_v5, 15  ;;  %v964_v60 = vadd.s32 4, %v960_v24  ;;  %v1200_v1 = vadd.s32 1013904242, %v3551_v59 }
 0x10b   :  { %v1216_v42 = vshll.u32 %v1208_v28, 17  ;;  %v1220_v32 = vshrl.u32 %v1208_v28, 15  ;;  %v969_v30 = vshll.u32 %v961_v47, 13  ;;  %v970_v14 = vshll.u32 %v962_v54, 13 }
 0x10c   :  { %v1209_v31 = vadd.s32 %v1205_v61, %v1197_v57  ;;  %v1221_v7 = vor.u32 %v1217_v20, %v1213_v13  ;;  %v971_v46 = vshll.u32 %v963_v4, 13  ;;  %v973_v56 = vshrl.u32 %v961_v47, 19 }
 0x10d   :  { %v974_v17 = vshrl.u32 %v962_v54, 19  ;;  %v975_v27 = vshrl.u32 %v963_v4, 19  ;;  %v1210_v21 = vadd.s32 %v1206_v41, %v1198_v43  ;;  %v1211_v63 = vadd.s32 %v1207_v5, %v1199_v9 }
 0x10e   :  { %v1222_v0 = vor.u32 %v1218_v29, %v1214_v25  ;;  %v1223_v53 = vor.u32 %v1219_v48, %v1215_v39  ;;  %v956_v62 = vadd.s32 1013904242, %v3562_v45  ;;  %v965_v36 = vadd.s32 %v961_v47, %v953_v49 }
 0x10f   :  { %v1212_v50 = vadd.s32 %v1208_v28, %v1200_v1  ;;  %v1224_v38 = vor.u32 %v1220_v32, %v1216_v42  ;;  %v966_v59 = vadd.s32 %v962_v54, %v954_v58  ;;  %v972_v2 = vshll.u32 %v964_v60, 13 }
 0x110   :  { %v976_v6 = vshrl.u32 %v964_v60, 19  ;;  %v1225_v52 = vxor.u32 %v1221_v7, %v1209_v31  ;;  %v967_v18 = vadd.s32 %v963_v4, %v955_v34  ;;  %v977_v61 = vor.u32 %v973_v56, %v969_v30 }
 0x111   :  { %v978_v24 = vor.u32 %v974_v17, %v970_v14  ;;  %v979_v57 = vor.u32 %v975_v27, %v971_v46  ;;  %v3238_v41 = vsel %vm576_vm7, 1.0, %v4461_v11  ;;  %vm593_vm8 = vcmp.gt.f32.partialorder %v3594_v33, %v3502_v55 }
 0x112   :  { %v1226_v45 = vxor.u32 %v1222_v0, %v1210_v21  ;;  %v1227_v49 = vxor.u32 %v1223_v53, %v1211_v63  ;;  %vm594_vm9 = vcmp.gt.f32.partialorder %v3597_v23, %v3510_v3  ;;  %vm595_vm10 = vcmp.gt.f32.partialorder %v3600_v12, %v3520_v26 }
 0x113   :  { %vm596_vm11 = vcmp.gt.f32.partialorder %v3608_v37, %v3522_v51  ;;  %v1228_v58 = vxor.u32 %v1224_v38, %v1212_v50  ;;  %v968_v5 = vadd.s32 %v964_v60, %v956_v62  ;;  %v980_v34 = vor.u32 %v976_v6, %v972_v2 }
 0x114   :  { %v1233_v28 = vshll.u32 %v1225_v52, 29  ;;  %v1237_v44 = vshrl.u32 %v1225_v52, 3  ;;  %v3239_v47 = vsel %vm593_vm8, 1.0, %v4461_v11  ;;  %v981_v54 = vxor.u32 %v977_v61, %v965_v36 }
 0x115   :  { %v982_v13 = vxor.u32 %v978_v24, %v966_v59  ;;  %v983_v20 = vxor.u32 %v979_v57, %v967_v18  ;;  %v3240_v4 = vsel %vm594_vm9, 1.0, %v4461_v11  ;;  %v3241_v43 = vsel %vm595_vm10, 1.0, %v4461_v11 }
 0x116   :  { %v1234_v9 = vshll.u32 %v1226_v45, 29  ;;  %v1235_v25 = vshll.u32 %v1227_v49, 29  ;;  %v1236_v39 = vshll.u32 %v1228_v58, 29  ;;  %v1238_v29 = vshrl.u32 %v1226_v45, 3 }
 0x117   :  { %v1239_v48 = vshrl.u32 %v1227_v49, 3  ;;  %v1240_v1 = vshrl.u32 %v1228_v58, 3  ;;  %v3242_v60 = vsel %vm596_vm11, 1.0, %v4461_v11  ;;  %v984_v42 = vxor.u32 %v980_v34, %v968_v5 }
 0x118   :  { %v1229_v32 = vadd.s32 %v1225_v52, %v1209_v31  ;;  %v1241_v30 = vor.u32 %v1237_v44, %v1233_v28  ;;  %v3634_v14 = vadd.f32 %v3239_v47, %v3573_v22  ;;  %v989_v7 = vshll.u32 %v981_v54, 15 }
 0x119   :  { %v990_v46 = vshll.u32 %v982_v13, 15  ;;  %v991_v56 = vshll.u32 %v983_v20, 15  ;;  %v993_v17 = vshrl.u32 %v981_v54, 17  ;;  %v994_v27 = vshrl.u32 %v982_v13, 17 }
 0x11a   :  { %4489 = vst [vmem:[#allocation18_spill] sm:$0xff] %v3634_v14  ;;  %v1230_v0 = vadd.s32 %v1226_v45, %v1210_v21  ;;  %v1231_v53 = vadd.s32 %v1227_v49, %v1211_v63  ;;  %v1232_v62 = vadd.s32 %v1228_v58, %v1212_v50  ;;  %v1242_v38 = vor.u32 %v1238_v29, %v1234_v9 }
 0x11b   :  { %v1243_v2 = vor.u32 %v1239_v48, %v1235_v25  ;;  %v1244_v6 = vor.u32 %v1240_v1, %v1236_v39  ;;  %v992_v61 = vshll.u32 %v984_v42, 15  ;;  %v995_v24 = vshrl.u32 %v983_v20, 17 }
 0x11c   :  { %v996_v57 = vshrl.u32 %v984_v42, 17  ;;  %v1245_v34 = vxor.u32 %v1241_v30, %v1229_v32  ;;  %v3637_v31 = vadd.f32 %v3240_v4, %v3581_v40  ;;  %v3640_v22 = vadd.f32 %v3241_v43, %v3587_v10 }
 0x11d   :  { %v3642_v52 = vadd.f32 %v3242_v60, %v3238_v41  ;;  %v985_v28 = vadd.s32 %v981_v54, %v965_v36  ;;  %v986_v44 = vadd.s32 %v982_v13, %v966_v59  ;;  %v987_v21 = vadd.s32 %v983_v20, %v967_v18 }
 0x11e   :  { %4490 = vst [vmem:[#allocation19_spill] sm:$0xff] %v3637_v31  ;;  %v988_v63 = vadd.s32 %v984_v42, %v968_v5  ;;  %v997_v50 = vor.u32 %v993_v17, %v989_v7  ;;  %v998_v45 = vor.u32 %v994_v27, %v990_v46  ;;  %v1246_v49 = vxor.u32 %v1242_v38, %v1230_v0 }
 0x11f   :  { %4491 = vst [vmem:[#allocation20_spill] sm:$0xff] %v3640_v22  ;;  %v1247_v58 = vxor.u32 %v1243_v2, %v1231_v53  ;;  %v1248_v47 = vxor.u32 %v1244_v6, %v1232_v62  ;;  %v999_v9 = vor.u32 %v995_v24, %v991_v56  ;;  %v1000_v25 = vor.u32 %v996_v57, %v992_v61 }
 0x120   :  { %4492 = vst [vmem:[#allocation21_spill] sm:$0xff] %v3642_v52  ;;  %v1253_v39 = vshll.u32 %v1245_v34, 16  ;;  %v1257_v29 = vshrl.u32 %v1245_v34, 16  ;;  %v1249_v40 = vadd.s32 %v1245_v34, %v1229_v32  ;;  %v1250_v4 = vadd.s32 %v1246_v49, %v1230_v0 }
 0x121   :  { %v1251_v48 = vadd.s32 %v1247_v58, %v1231_v53  ;;  %v1254_v10 = vshll.u32 %v1246_v49, 16  ;;  %v1255_v43 = vshll.u32 %v1247_v58, 16  ;;  %v1256_v41 = vshll.u32 %v1248_v47, 16 }
 0x122   :  { %v1258_v1 = vshrl.u32 %v1246_v49, 16  ;;  %v1259_v36 = vshrl.u32 %v1247_v58, 16  ;;  %v1001_v59 = vxor.u32 %v997_v50, %v985_v28  ;;  %v1252_v18 = vadd.s32 %v1248_v47, %v1232_v62 }
 0x123   :  { %v1260_v5 = vshrl.u32 %v1248_v47, 16  ;;  %v1261_v54 = vor.u32 %v1257_v29, %v1253_v39  ;;  %v1002_v13 = vxor.u32 %v998_v45, %v986_v44  ;;  %v1003_v20 = vxor.u32 %v999_v9, %v987_v21 }
 0x124   :  { %v1262_v60 = vor.u32 %v1258_v1, %v1254_v10  ;;  %v1263_v42 = vor.u32 %v1259_v36, %v1255_v43  ;;  %v1004_v30 = vxor.u32 %v1000_v25, %v988_v63  ;;  %v3644_v7 = vadd.s32 %v1001_v59, %v985_v28 }
 0x125   :  { %v1264_v46 = vor.u32 %v1260_v5, %v1256_v41  ;;  %v1265_v32 = vxor.u32 %v1261_v54, %v1249_v40  ;;  %v3646_v56 = vadd.s32 %v1002_v13, %v986_v44  ;;  %v3648_v17 = vadd.s32 %v1003_v20, %v987_v21 }
 0x126   :  { %v1266_v27 = vxor.u32 %v1262_v60, %v1250_v4  ;;  %v1267_v0 = vxor.u32 %v1263_v42, %v1251_v48  ;;  %v1009_v53 = vshll.u32 %v1001_v59, 26  ;;  %v1013_v49 = vshrl.u32 %v1001_v59, 6 }
 0x127   :  { %v1268_v38 = vxor.u32 %v1264_v46, %v1252_v18  ;;  %v1273_v62 = vshll.u32 %v1265_v32, 24  ;;  %v1277_v2 = vshrl.u32 %v1265_v32, 8  ;;  %v1269_v6 = vadd.s32 %v1265_v32, %v1249_v40 }
 0x128   :  { %v1270_v61 = vadd.s32 %v1266_v27, %v1250_v4  ;;  %v1274_v24 = vshll.u32 %v1266_v27, 24  ;;  %v1275_v57 = vshll.u32 %v1267_v0, 24  ;;  %v1271_v34 = vadd.s32 %v1267_v0, %v1251_v48 }
 0x129   :  { %v1276_v50 = vshll.u32 %v1268_v38, 24  ;;  %v1278_v28 = vshrl.u32 %v1266_v27, 8  ;;  %v1279_v45 = vshrl.u32 %v1267_v0, 8  ;;  %v1272_v58 = vadd.s32 %v1268_v38, %v1252_v18 }
 0x12a   :  { %v1280_v44 = vshrl.u32 %v1268_v38, 8  ;;  %v1281_v47 = vor.u32 %v1277_v2, %v1273_v62  ;;  %v1008_v21 = vadd.s32 %v1004_v30, %v988_v63  ;;  %v1010_v9 = vshll.u32 %v1002_v13, 26 }
 0x12b   :  { %v1282_v25 = vor.u32 %v1278_v28, %v1274_v24  ;;  %v1283_v39 = vor.u32 %v1279_v45, %v1275_v57  ;;  %v1011_v29 = vshll.u32 %v1003_v20, 26  ;;  %v1014_v10 = vshrl.u32 %v1002_v13, 6 }
 0x12c   :  { %v1284_v43 = vor.u32 %v1280_v44, %v1276_v50  ;;  %v1285_v41 = vxor.u32 %v1281_v47, %v1269_v6  ;;  %v1012_v40 = vshll.u32 %v1004_v30, 26  ;;  %v1015_v4 = vshrl.u32 %v1003_v20, 6 }
 0x12d   :  { %v1286_v1 = vxor.u32 %v1282_v25, %v1270_v61  ;;  %v1287_v36 = vxor.u32 %v1283_v39, %v1271_v34  ;;  %v1016_v48 = vshrl.u32 %v1004_v30, 6  ;;  %v1017_v5 = vor.u32 %v1013_v49, %v1009_v53 }
 0x12e   :  { %v1288_v54 = vxor.u32 %v1284_v43, %v1272_v58  ;;  %v1293_v59 = vadd.s32 %v1285_v41, %v3385_v8  ;;  %v1289_v18 = vadd.s32 %v1269_v6, %v3418_v35  ;;  %v1290_v63 = vadd.s32 %v1270_v61, %v3418_v35 }
 0x12f   :  { %v1294_v60 = vadd.s32 %v1286_v1, %v3385_v8  ;;  %v1295_v42 = vadd.s32 %v1287_v36, %v3385_v8  ;;  %v1018_v13 = vor.u32 %v1014_v10, %v1010_v9  ;;  %v1291_v46 = vadd.s32 %v1271_v34, %v3418_v35 }
 0x130   :  { %v1296_v20 = vadd.s32 %v1288_v54, %v3385_v8  ;;  %v1297_v32 = vadd.s32 2, %v1293_v59  ;;  %v1019_v27 = vor.u32 %v1015_v4, %v1011_v29  ;;  %v1292_v30 = vadd.s32 %v1272_v58, %v3418_v35 }
 0x131   :  { %v1298_v0 = vadd.s32 2, %v1294_v60  ;;  %v1299_v53 = vadd.s32 2, %v1295_v42  ;;  %v1020_v38 = vor.u32 %v1016_v48, %v1012_v40  ;;  %v3659_v44 = vxor.u32 %v1017_v5, %v3644_v7 }
 0x132   :  { %v1300_v62 = vadd.s32 2, %v1296_v20  ;;  %v1305_v2 = vshll.u32 %v1297_v32, 13  ;;  %v1309_v6 = vshrl.u32 %v1297_v32, 19  ;;  %v1301_v61 = vadd.s32 %v1297_v32, %v1289_v18 }
 0x133   :  { %v1302_v24 = vadd.s32 %v1298_v0, %v1290_v63  ;;  %v1306_v57 = vshll.u32 %v1298_v0, 13  ;;  %v1307_v50 = vshll.u32 %v1299_v53, 13  ;;  %v1303_v28 = vadd.s32 %v1299_v53, %v1291_v46 }
 0x134   :  { %v1308_v45 = vshll.u32 %v1300_v62, 13  ;;  %v1310_v49 = vshrl.u32 %v1298_v0, 19  ;;  %v1311_v34 = vshrl.u32 %v1299_v53, 19  ;;  %v1304_v47 = vadd.s32 %v1300_v62, %v1292_v30 }
 0x135   :  { %v1312_v9 = vshrl.u32 %v1300_v62, 19  ;;  %v1313_v58 = vor.u32 %v1309_v6, %v1305_v2  ;;  %v3662_v25 = vxor.u32 %v1018_v13, %v3646_v56  ;;  %v3665_v39 = vxor.u32 %v1019_v27, %v3648_v17 }
 0x136   :  { %v1314_v29 = vor.u32 %v1310_v49, %v1306_v57  ;;  %v1315_v10 = vor.u32 %v1311_v34, %v1307_v50  ;;  %v3667_v43 = vxor.u32 %v1020_v38, %v1008_v21  ;;  %v3671_v41 = vadd.s32 %v3659_v44, %v3644_v7 }
 0x137   :  { %v1316_v40 = vor.u32 %v1312_v9, %v1308_v45  ;;  %v1317_v4 = vxor.u32 %v1313_v58, %v1301_v61  ;;  %v3675_v1 = vadd.s32 %v3662_v25, %v3646_v56  ;;  %v3679_v36 = vadd.s32 %v3665_v39, %v3648_v17 }
 0x138   :  { %v1318_v48 = vxor.u32 %v1314_v29, %v1302_v24  ;;  %v1319_v5 = vxor.u32 %v1315_v10, %v1303_v28  ;;  %v3682_v54 = vadd.s32 %v3667_v43, %v1008_v21  ;;  %v1029_v27 = vshll.u32 %v3659_v44, 6 }
 0x139   :  { %v1320_v59 = vxor.u32 %v1316_v40, %v1304_v47  ;;  %v1325_v18 = vshll.u32 %v1317_v4, 15  ;;  %v1329_v63 = vshrl.u32 %v1317_v4, 17  ;;  %v1321_v7 = vadd.s32 %v1317_v4, %v1301_v61 }
 0x13a   :  { %v1322_v60 = vadd.s32 %v1318_v48, %v1302_v24  ;;  %v1326_v42 = vshll.u32 %v1318_v48, 15  ;;  %v1327_v13 = vshll.u32 %v1319_v5, 15  ;;  %v1323_v46 = vadd.s32 %v1319_v5, %v1303_v28 }
 0x13b   :  { %v1328_v20 = vshll.u32 %v1320_v59, 15  ;;  %v1330_v56 = vshrl.u32 %v1318_v48, 17  ;;  %v1331_v32 = vshrl.u32 %v1319_v5, 17  ;;  %v1324_v17 = vadd.s32 %v1320_v59, %v1304_v47 }
 0x13c   :  { %v1332_v30 = vshrl.u32 %v1320_v59, 17  ;;  %v1333_v0 = vor.u32 %v1329_v63, %v1325_v18  ;;  %v1030_v53 = vshll.u32 %v3662_v25, 6  ;;  %v1031_v21 = vshll.u32 %v3665_v39, 6 }
 0x13d   :  { %v1334_v38 = vor.u32 %v1330_v56, %v1326_v42  ;;  %v1335_v62 = vor.u32 %v1331_v32, %v1327_v13  ;;  %v1032_v2 = vshll.u32 %v3667_v43, 6  ;;  %v1033_v6 = vshrl.u32 %v3659_v44, 26 }
 0x13e   :  { %v1336_v61 = vor.u32 %v1332_v30, %v1328_v20  ;;  %v1337_v24 = vxor.u32 %v1333_v0, %v1321_v7  ;;  %v1034_v57 = vshrl.u32 %v3662_v25, 26  ;;  %v1035_v50 = vshrl.u32 %v3665_v39, 26 }
 0x13f   :  { %v1338_v28 = vxor.u32 %v1334_v38, %v1322_v60  ;;  %v1339_v45 = vxor.u32 %v1335_v62, %v1323_v46  ;;  %v1036_v49 = vshrl.u32 %v3667_v43, 26  ;;  %v1045_v25 = vadd.s32 %v3671_v41, %v3418_v35 }
 0x140   :  { %v1340_v34 = vxor.u32 %v1336_v61, %v1324_v17  ;;  %v1345_v47 = vshll.u32 %v1337_v24, 26  ;;  %v1349_v9 = vshrl.u32 %v1337_v24, 6  ;;  %v1341_v58 = vadd.s32 %v1337_v24, %v1321_v7 }
 0x141   :  { %v1342_v29 = vadd.s32 %v1338_v28, %v1322_v60  ;;  %v1346_v10 = vshll.u32 %v1338_v28, 26  ;;  %v1347_v40 = vshll.u32 %v1339_v45, 26  ;;  %v1343_v4 = vadd.s32 %v1339_v45, %v1323_v46 }
 0x142   :  { %v1348_v48 = vshll.u32 %v1340_v34, 26  ;;  %v1350_v44 = vshrl.u32 %v1338_v28, 6  ;;  %v1351_v5 = vshrl.u32 %v1339_v45, 6  ;;  %v1344_v59 = vadd.s32 %v1340_v34, %v1324_v17 }
 0x143   :  { %v1352_v39 = vshrl.u32 %v1340_v34, 6  ;;  %v1353_v18 = vor.u32 %v1349_v9, %v1345_v47  ;;  %v1046_v43 = vadd.s32 %v3675_v1, %v3418_v35  ;;  %v1047_v63 = vadd.s32 %v3679_v36, %v3418_v35 }
 0x144   :  { %v1354_v7 = vor.u32 %v1350_v44, %v1346_v10  ;;  %v1355_v60 = vor.u32 %v1351_v5, %v1347_v40  ;;  %v3698_v42 = vor.u32 %v1033_v6, %v1029_v27  ;;  %v3702_v13 = vadd.s32 %v3682_v54, %v3418_v35 }
 0x145   :  { %v1356_v46 = vor.u32 %v1352_v39, %v1348_v48  ;;  %v1357_v20 = vxor.u32 %v1353_v18, %v1341_v58  ;;  %v3704_v56 = vor.u32 %v1034_v57, %v1030_v53  ;;  %v3706_v32 = vor.u32 %v1035_v50, %v1031_v21 }
 0x146   :  { %v1358_v17 = vxor.u32 %v1354_v7, %v1342_v29  ;;  %v1359_v30 = vxor.u32 %v1355_v60, %v1343_v4  ;;  %v3708_v0 = vor.u32 %v1036_v49, %v1032_v2  ;;  %v1057_v10 = vshrl.u32 %v1045_v25, 8 }
 0x147   :  { %v1360_v38 = vxor.u32 %v1356_v46, %v1344_v59  ;;  %v1365_v62 = vshll.u32 %v1357_v20, 6  ;;  %v1369_v61 = vshrl.u32 %v1357_v20, 26  ;;  %v1361_v24 = vadd.s32 %v1357_v20, %v1341_v58 }
 0x148   :  { %v1362_v27 = vadd.s32 %v1358_v17, %v1342_v29  ;;  %v1366_v6 = vshll.u32 %v1358_v17, 6  ;;  %v1367_v28 = vshll.u32 %v1359_v30, 6  ;;  %v1363_v45 = vadd.s32 %v1359_v30, %v1343_v4 }
 0x149   :  { %v1368_v34 = vshll.u32 %v1360_v38, 6  ;;  %v1370_v47 = vshrl.u32 %v1358_v17, 26  ;;  %v1371_v9 = vshrl.u32 %v1359_v30, 26  ;;  %v1364_v53 = vadd.s32 %v1360_v38, %v1344_v59 }
 0x14a   :  { %v1372_v57 = vshrl.u32 %v1360_v38, 26  ;;  %v1373_v21 = vor.u32 %v1369_v61, %v1365_v62  ;;  %v1058_v50 = vshrl.u32 %v1046_v43, 8  ;;  %v1059_v40 = vshrl.u32 %v1047_v63, 8 }
 0x14b   :  { %v1374_v48 = vor.u32 %v1370_v47, %v1366_v6  ;;  %v1375_v2 = vor.u32 %v1371_v9, %v1367_v28  ;;  %v1041_v49 = vxor.u32 %v3698_v42, %v3671_v41  ;;  %v1060_v58 = vshrl.u32 %v3702_v13, 8 }
 0x14c   :  { %v1376_v29 = vor.u32 %v1372_v57, %v1368_v34  ;;  %v1377_v44 = vxor.u32 %v1373_v21, %v1361_v24  ;;  %v1042_v4 = vxor.u32 %v3704_v56, %v3675_v1  ;;  %v1043_v5 = vxor.u32 %v3706_v32, %v3679_v36 }
 0x14d   :  { %v1378_v25 = vxor.u32 %v1374_v48, %v1362_v27  ;;  %v1379_v59 = vxor.u32 %v1375_v2, %v1363_v45  ;;  %v1044_v39 = vxor.u32 %v3708_v0, %v3682_v54  ;;  %v1061_v18 = vcvt.s32.f32 %v1057_v10  ;;  %v4493_v10 = vld [vmem:[#allocation15_spill] sm:$0xff] }
 0x14e   :  { %v1380_v43 = vxor.u32 %v1376_v29, %v1364_v53  ;;  %v1385_v63 = vadd.s32 1013904242, %v1377_v44  ;;  %v1062_v7 = vcvt.s32.f32 %v1058_v50  ;;  %v1649_v42 = vadd.s32 1013904245, %v3390_v15 }
 0x14f   :  { %v1386_v41 = vadd.s32 1013904242, %v1378_v25  ;;  %v1387_v60 = vadd.s32 1013904242, %v1379_v59  ;;  %v3720_v13 = vcvt.s32.f32 %v1059_v40  ;;  %v1650_v20 = vadd.s32 1013904245, %v3393_v16 }
 0x150   :  { %v1388_v46 = vadd.s32 1013904242, %v1380_v43  ;;  %v1389_v1 = vadd.s32 3, %v1385_v63  ;;  %v1381_v36 = vadd.s32 %v1361_v24, %v3385_v8  ;;  %v1382_v56 = vadd.s32 %v1362_v27, %v3385_v8 }
 0x151   :  { %v1390_v32 = vadd.s32 3, %v1386_v41  ;;  %v1391_v54 = vadd.s32 3, %v1387_v60  ;;  %v1383_v17 = vadd.s32 %v1363_v45, %v3385_v8  ;;  %v1384_v62 = vadd.s32 %v1364_v53, %v3385_v8 }
 0x152   :  { %v1392_v30 = vadd.s32 3, %v1388_v46  ;;  %v1397_v0 = vshll.u32 %v1389_v1, 17  ;;  %v1401_v38 = vshrl.u32 %v1389_v1, 15  ;;  %v1651_v28 = vadd.s32 1013904245, %v3398_v19 }
 0x153   :  { %v1398_v61 = vshll.u32 %v1390_v32, 17  ;;  %v1399_v6 = vshll.u32 %v1391_v54, 17  ;;  %v1402_v47 = vshrl.u32 %v1390_v32, 15  ;;  %v1403_v9 = vshrl.u32 %v1391_v54, 15 }
 0x154   :  { %v1400_v34 = vshll.u32 %v1392_v30, 17  ;;  %v1652_v24 = vadd.s32 1013904245, %v4493_v10  ;;  %v1393_v57 = vadd.s32 %v1389_v1, %v1381_v36  ;;  %v1404_v27 = vshrl.u32 %v1392_v30, 15 }
 0x155   :  { %v1405_v21 = vor.u32 %v1401_v38, %v1397_v0  ;;  %v1653_v50 = vxor.u32 3731793805, %v1649_v42  ;;  %v1394_v40 = vadd.s32 %v1390_v32, %v1382_v56  ;;  %v1395_v45 = vadd.s32 %v1391_v54, %v1383_v17 }
 0x156   :  { %v1406_v48 = vor.u32 %v1402_v47, %v1398_v61  ;;  %v1407_v2 = vor.u32 %v1403_v9, %v1399_v6  ;;  %v3729_v29 = vcvt.s32.f32 %v1060_v58  ;;  %v1396_v53 = vadd.s32 %v1392_v30, %v1384_v62 }
 0x157   :  { %v1408_v44 = vor.u32 %v1404_v27, %v1400_v34  ;;  %v1654_v25 = vxor.u32 3731793805, %v1650_v20  ;;  %v1049_v59 = vadd.s32 %v1041_v49, %v3385_v8  ;;  %v1050_v43 = vadd.s32 %v1042_v4, %v3385_v8 }
 0x158   :  { %v1655_v63 = vxor.u32 3731793805, %v1651_v28  ;;  %v1656_v41 = vxor.u32 3731793805, %v1652_v24  ;;  %v1051_v60 = vadd.s32 %v1043_v5, %v3385_v8  ;;  %v1409_v46 = vxor.u32 %v1405_v21, %v1393_v57 }
 0x159   :  { %v1661_v1 = vshll.u32 %v1653_v50, 15  ;;  %v1665_v36 = vshrl.u32 %v1653_v50, 17  ;;  %v1052_v56 = vadd.s32 %v1044_v39, %v3385_v8  ;;  %v1065_v32 = vadd.f32 1.0, %v1061_v18 }
 0x15a   :  { %v1410_v54 = vxor.u32 %v1406_v48, %v1394_v40  ;;  %v1411_v58 = vxor.u32 %v1407_v2, %v1395_v45  ;;  %v3735_v17 = vadd.f32 1.0, %v1062_v7  ;;  %v1412_v30 = vxor.u32 %v1408_v44, %v1396_v53 }
 0x15b   :  { %v1662_v0 = vshll.u32 %v1654_v25, 15  ;;  %v1666_v38 = vshrl.u32 %v1654_v25, 17  ;;  %v1663_v49 = vshll.u32 %v1655_v63, 15  ;;  %v1664_v62 = vshll.u32 %v1656_v41, 15 }
 0x15c   :  { %v1667_v4 = vshrl.u32 %v1655_v63, 17  ;;  %v1668_v61 = vshrl.u32 %v1656_v41, 17  ;;  %v1417_v6 = vshll.u32 %v1409_v46, 29  ;;  %v1421_v34 = vshrl.u32 %v1409_v46, 3 }
 0x15d   :  { %v1657_v5 = vadd.s32 %v1653_v50, %v1649_v42  ;;  %v1669_v47 = vor.u32 %v1665_v36, %v1661_v1  ;;  %v1418_v9 = vshll.u32 %v1410_v54, 29  ;;  %v1419_v27 = vshll.u32 %v1411_v58, 29 }
 0x15e   :  { %v1422_v21 = vshrl.u32 %v1410_v54, 3  ;;  %v1423_v39 = vshrl.u32 %v1411_v58, 3  ;;  %v1420_v18 = vshll.u32 %v1412_v30, 29  ;;  %v1424_v48 = vshrl.u32 %v1412_v30, 3 }
 0x15f   :  { %v1658_v2 = vadd.s32 %v1654_v25, %v1650_v20  ;;  %v1670_v7 = vor.u32 %v1666_v38, %v1662_v0  ;;  %v1659_v11 = vadd.s32 %v1655_v63, %v1651_v28  ;;  %v1660_v44 = vadd.s32 %v1656_v41, %v1652_v24 }
 0x160   :  { %v1671_v10 = vor.u32 %v1667_v4, %v1663_v49  ;;  %v1672_v19 = vor.u32 %v1668_v61, %v1664_v62  ;;  %v3737_v16 = vadd.s32 5, %v1049_v59  ;;  %v1413_v15 = vadd.s32 %v1409_v46, %v1393_v57 }
 0x161   :  { %v1425_v8 = vor.u32 %v1421_v34, %v1417_v6  ;;  %v1673_v52 = vxor.u32 %v1669_v47, %v1657_v5  ;;  %v1414_v22 = vadd.s32 %v1410_v54, %v1394_v40  ;;  %v1415_v42 = vadd.s32 %v1411_v58, %v1395_v45 }
 0x162   :  { %v1426_v50 = vor.u32 %v1422_v21, %v1418_v9  ;;  %v1427_v1 = vor.u32 %v1423_v39, %v1419_v27  ;;  %v1054_v36 = vadd.s32 5, %v1050_v43  ;;  %v1416_v31 = vadd.s32 %v1412_v30, %v1396_v53 }
 0x163   :  { %v1428_v14 = vor.u32 %v1424_v48, %v1420_v18  ;;  %v1674_v51 = vxor.u32 %v1670_v7, %v1658_v2  ;;  %v1055_v26 = vadd.s32 5, %v1051_v60  ;;  %v3740_v20 = vadd.f32 1.0, %v3720_v13 }
 0x164   :  { %v1675_v28 = vxor.u32 %v1671_v10, %v1659_v11  ;;  %v1676_v24 = vxor.u32 %v1672_v19, %v1660_v44  ;;  %v3742_v25 = vadd.s32 5, %v1052_v56  ;;  %v1429_v59 = vxor.u32 %v1425_v8, %v1413_v15 }
 0x165   :  { %v1681_v57 = vshll.u32 %v1673_v52, 26  ;;  %v1685_v63 = vshrl.u32 %v1673_v52, 6  ;;  %v1069_v41 = vmul.f32 5.9604645e-08, %v1065_v32  ;;  %v1073_v40 = vshrl.u32 %v3737_v16, 8 }
 0x166   :  { %v1430_v45 = vxor.u32 %v1426_v50, %v1414_v22  ;;  %v1431_v46 = vxor.u32 %v1427_v1, %v1415_v42  ;;  %v1074_v43 = vshrl.u32 %v1054_v36, 8  ;;  %v1432_v53 = vxor.u32 %v1428_v14, %v1416_v31 }
 0x167   :  { %v1682_v54 = vshll.u32 %v1674_v51, 26  ;;  %v1686_v58 = vshrl.u32 %v1674_v51, 6  ;;  %v1677_v60 = vadd.s32 %v1673_v52, %v1657_v5  ;;  %v1683_v30 = vshll.u32 %v1675_v28, 26 }
 0x168   :  { %v1684_v13 = vshll.u32 %v1676_v24, 26  ;;  %v1687_v0 = vshrl.u32 %v1675_v28, 6  ;;  %v1437_v10 = vshll.u32 %v1429_v59, 16  ;;  %v1441_v19 = vshrl.u32 %v1429_v59, 16 }
 0x169   :  { %v1688_v56 = vshrl.u32 %v1676_v24, 6  ;;  %v1689_v38 = vor.u32 %v1685_v63, %v1681_v57  ;;  %v1438_v8 = vshll.u32 %v1430_v45, 16  ;;  %v1439_v49 = vshll.u32 %v1431_v46, 16 }
 0x16a   :  { %v1442_v62 = vshrl.u32 %v1430_v45, 16  ;;  %v1443_v32 = vshrl.u32 %v1431_v46, 16  ;;  %v1440_v4 = vshll.u32 %v1432_v53, 16  ;;  %v1444_v16 = vshrl.u32 %v1432_v53, 16 }
 0x16b   :  { %v1678_v61 = vadd.s32 %v1674_v51, %v1658_v2  ;;  %v1690_v6 = vor.u32 %v1686_v58, %v1682_v54  ;;  %v1075_v34 = vshrl.u32 %v1055_v26, 8  ;;  %v1679_v14 = vadd.s32 %v1675_v28, %v1659_v11 }
 0x16c   :  { %v1680_v47 = vadd.s32 %v1676_v24, %v1660_v44  ;;  %v1691_v9 = vor.u32 %v1687_v0, %v1683_v30  ;;  %v1433_v52 = vadd.s32 %v1429_v59, %v1413_v15  ;;  %v1445_v5 = vor.u32 %v1441_v19, %v1437_v10 }
 0x16d   :  { %v1692_v27 = vor.u32 %v1688_v56, %v1684_v13  ;;  %v1693_v21 = vxor.u32 %v1689_v38, %v1677_v60  ;;  %v1434_v39 = vadd.s32 %v1430_v45, %v1414_v22  ;;  %v1435_v18 = vadd.s32 %v1431_v46, %v1415_v42 }
 0x16e   :  { %v1446_v48 = vor.u32 %v1442_v62, %v1438_v8  ;;  %v1447_v7 = vor.u32 %v1443_v32, %v1439_v49  ;;  %v1068_v50 = vadd.f32 1.0, %v3729_v29  ;;  %v1436_v1 = vadd.s32 %v1432_v53, %v1416_v31 }
 0x16f   :  { %v1448_v36 = vor.u32 %v1444_v16, %v1440_v4  ;;  %v1694_v57 = vxor.u32 %v1690_v6, %v1678_v61  ;;  %v1070_v51 = vmul.f32 5.9604645e-08, %v3735_v17  ;;  %v1076_v26 = vshrl.u32 %v3742_v25, 8 }
 0x170   :  { %v3749_v11 = vmul.f32 %v1069_v41, %v3594_v33  ;;  %v1695_v15 = vxor.u32 %v1691_v9, %v1679_v14  ;;  %v1077_v2 = vcvt.s32.f32 %v1073_v40  ;;  %v1078_v44 = vcvt.s32.f32 %v1074_v43 }
 0x171   :  { %v1449_v28 = vxor.u32 %v1445_v5, %v1433_v52  ;;  %v1696_v22 = vxor.u32 %v1692_v27, %v1680_v47  ;;  %v1079_v42 = vcvt.s32.f32 %v1075_v34  ;;  %v1450_v24 = vxor.u32 %v1446_v48, %v1434_v39 }
 0x172   :  { %v1451_v59 = vxor.u32 %v1447_v7, %v1435_v18  ;;  %v1701_v63 = vshll.u32 %v1693_v21, 6  ;;  %v1452_v29 = vxor.u32 %v1448_v36, %v1436_v1  ;;  %v1702_v31 = vshll.u32 %v1694_v57, 6 }
 0x173   :  { %v1705_v45 = vshrl.u32 %v1693_v21, 26  ;;  %v1706_v46 = vshrl.u32 %v1694_v57, 26  ;;  %v1697_v53 = vadd.s32 %v1693_v21, %v1677_v60  ;;  %v3751_v17 = vadd.s32 %v1694_v57, %v1678_v61 }
 0x174   :  { %v1703_v25 = vshll.u32 %v1695_v15, 6  ;;  %v1707_v54 = vshrl.u32 %v1695_v15, 26  ;;  %v1457_v33 = vshll.u32 %v1449_v28, 24  ;;  %v1461_v41 = vshrl.u32 %v1449_v28, 8 }
 0x175   :  { %v1704_v58 = vshll.u32 %v1696_v22, 6  ;;  %v1708_v40 = vshrl.u32 %v1696_v22, 26  ;;  %v1458_v43 = vshll.u32 %v1450_v24, 24  ;;  %v1459_v30 = vshll.u32 %v1451_v59, 24 }
 0x176   :  { %v1462_v13 = vshrl.u32 %v1450_v24, 8  ;;  %v1463_v0 = vshrl.u32 %v1451_v59, 8  ;;  %v1460_v10 = vshll.u32 %v1452_v29, 24  ;;  %v1464_v19 = vshrl.u32 %v1452_v29, 8 }
 0x177   :  { %v1709_v56 = vor.u32 %v1705_v45, %v1701_v63  ;;  %v1710_v38 = vor.u32 %v1706_v46, %v1702_v31  ;;  %v1080_v8 = vcvt.s32.f32 %v1076_v26  ;;  %v1081_v49 = vadd.f32 1.0, %v1077_v2 }
 0x178   :  { %v1699_v62 = vadd.s32 %v1695_v15, %v1679_v14  ;;  %v1711_v60 = vor.u32 %v1707_v54, %v1703_v25  ;;  %v1453_v32 = vadd.s32 %v1449_v28, %v1433_v52  ;;  %v1465_v4 = vor.u32 %v1461_v41, %v1457_v33 }
 0x179   :  { %v1700_v16 = vadd.s32 %v1696_v22, %v1680_v47  ;;  %v1712_v61 = vor.u32 %v1708_v40, %v1704_v58  ;;  %v1454_v6 = vadd.s32 %v1450_v24, %v1434_v39  ;;  %v1455_v34 = vadd.s32 %v1451_v59, %v1435_v18 }
 0x17a   :  { %v1466_v9 = vor.u32 %v1462_v13, %v1458_v43  ;;  %v1467_v5 = vor.u32 %v1463_v0, %v1459_v30  ;;  %v3753_v27 = vadd.s32 %v1452_v29, %v1436_v1  ;;  %v1468_v21 = vor.u32 %v1464_v19, %v1460_v10  ;;  %v4496_v19 = vld [vmem:[#allocation17_spill] sm:$0xff] }
 0x17b   :  { %v1713_v48 = vxor.u32 %v1709_v56, %v1697_v53  ;;  %v1714_v7 = vxor.u32 %v1710_v38, %v3751_v17  ;;  %v1071_v36 = vmul.f32 5.9604645e-08, %v3740_v20  ;;  %v1072_v57 = vmul.f32 5.9604645e-08, %v1068_v50 }
 0x17c   :  { %v1082_v26 = vadd.f32 1.0, %v1078_v44  ;;  %v1715_v14 = vxor.u32 %v1711_v60, %v1699_v62  ;;  %v3758_v52 = vmul.f32 %v1070_v51, %v3597_v23  ;;  %vm1093_vm12 = vcmp.gt.f32.partialorder %v3749_v11, %v3502_v55 }
 0x17d   :  { %v1469_v47 = vxor.u32 %v1465_v4, %v1453_v32  ;;  %v1716_v39 = vxor.u32 %v1712_v61, %v1700_v16  ;;  %v1083_v18 = vadd.f32 1.0, %v1079_v42  ;;  %v1084_v1 = vadd.f32 1.0, %v1080_v8 }
 0x17e   :  { %v1470_v15 = vxor.u32 %v1466_v9, %v1454_v6  ;;  %v1471_v2 = vxor.u32 %v1467_v5, %v1455_v34  ;;  %v1085_v28 = vmul.f32 5.9604645e-08, %v1081_v49  ;;  %v1472_v22 = vxor.u32 %v1468_v21, %v3753_v27 }
 0x17f   :  { %v1721_v20 = vadd.s32 %v1713_v48, %v3418_v35  ;;  %v1722_v50 = vadd.s32 %v1714_v7, %v3418_v35  ;;  %v1086_v44 = vmul.f32 5.9604645e-08, %v1082_v26  ;;  %v3766_v23 = vmul.f32 %v1071_v36, %v3600_v12 }
 0x180   :  { %v3769_v51 = vmul.f32 %v1072_v57, %v3608_v37  ;;  %v1723_v24 = vadd.s32 %v1715_v14, %v3418_v35  ;;  %v4494_v42 = vmov 0.0   ;;  %v1477_v63 = vadd.s32 %v1469_v47, %v3418_v35 }
 0x181   :  { %v3773_v59 = vsel %vm1093_vm12, 1.0, %v4494_v42  ;;  %v1717_v29 = vadd.s32 1013904242, %v1697_v53  ;;  %v1724_v31 = vadd.s32 %v1716_v39, %v3418_v35  ;;  %v1087_v45 = vmul.f32 5.9604645e-08, %v1083_v18 }
 0x182   :  { %v1088_v46 = vmul.f32 5.9604645e-08, %v1084_v1  ;;  %v1478_v25 = vadd.s32 %v1470_v15, %v3418_v35  ;;  %v1479_v12 = vadd.s32 %v1471_v2, %v3418_v35  ;;  %v3780_v54 = vmul.f32 %v3749_v11, %v1085_v28  ;;  %v4495_v11 = vld [vmem:[#allocation16_spill] sm:$0xff] }
 0x183   :  { %v1480_v37 = vadd.s32 %v1472_v22, %v3418_v35  ;;  %v1725_v33 = vadd.s32 1, %v1721_v20  ;;  %v1726_v41 = vadd.s32 1, %v1722_v50  ;;  %v3784_v58 = vmul.f32 %v3758_v52, %v1086_v44 }
 0x184   :  { %v1718_v53 = vadd.s32 1013904242, %v3751_v17  ;;  %v1719_v40 = vadd.s32 1013904242, %v1699_v62  ;;  %v1727_v43 = vadd.s32 1, %v1723_v24  ;;  %v1481_v30 = vadd.s32 4, %v1477_v63 }
 0x185   :  { %v1720_v13 = vadd.s32 1013904242, %v1700_v16  ;;  %v1728_v0 = vadd.s32 1, %v1724_v31  ;;  %v3787_v10 = vadd.s32 %v1725_v33, %v1717_v29  ;;  %vm1094_vm13 = vcmp.gt.f32.partialorder %v3758_v52, %v3510_v3 }
 0x186   :  { %vm1095_vm14 = vcmp.gt.f32.partialorder %v3766_v23, %v4495_v11  ;;  %vm1096_vm15 = vcmp.gt.f32.partialorder %v3769_v51, %v4496_v19  ;;  %v1473_v56 = vadd.s32 1013904242, %v1453_v32  ;;  %v1474_v38 = vadd.s32 1013904242, %v1454_v6 }
 0x187   :  { %v1482_v8 = vadd.s32 4, %v1478_v25  ;;  %v1483_v17 = vadd.s32 4, %v1479_v12  ;;  %v1475_v49 = vadd.s32 1013904242, %v1455_v34  ;;  %v1484_v62 = vadd.s32 4, %v1480_v37 }
 0x188   :  { %v1733_v60 = vshll.u32 %v1725_v33, 17  ;;  %v1734_v4 = vshll.u32 %v1726_v41, 17  ;;  %v1735_v16 = vshll.u32 %v1727_v43, 17  ;;  %v1737_v61 = vshrl.u32 %v1725_v33, 15 }
 0x189   :  { %v1738_v9 = vshrl.u32 %v1726_v41, 15  ;;  %v1739_v5 = vshrl.u32 %v1727_v43, 15  ;;  %v1489_v21 = vshll.u32 %v1481_v30, 13  ;;  %v1493_v48 = vshrl.u32 %v1481_v30, 19 }
 0x18a   :  { %v1736_v7 = vshll.u32 %v1728_v0, 17  ;;  %v1740_v36 = vshrl.u32 %v1728_v0, 15  ;;  %v1490_v57 = vshll.u32 %v1482_v8, 13  ;;  %v1491_v26 = vshll.u32 %v1483_v17, 13 }
 0x18b   :  { %v1494_v14 = vshrl.u32 %v1482_v8, 19  ;;  %v1495_v47 = vshrl.u32 %v1483_v17, 19  ;;  %v1476_v32 = vadd.s32 1013904242, %v3753_v27  ;;  %v1492_v6 = vshll.u32 %v1484_v62, 13 }
 0x18c   :  { %v1496_v39 = vshrl.u32 %v1484_v62, 19  ;;  %v1730_v34 = vadd.s32 %v1726_v41, %v1718_v53  ;;  %v1731_v18 = vadd.s32 %v1727_v43, %v1719_v40  ;;  %v1741_v1 = vor.u32 %v1737_v61, %v1733_v60  ;;  %v4497_v43 = vld [vmem:[#allocation18_spill] sm:$0xff] }
 0x18d   :  { %v1742_v15 = vor.u32 %v1738_v9, %v1734_v4  ;;  %v1743_v2 = vor.u32 %v1739_v5, %v1735_v16  ;;  %v1485_v28 = vadd.s32 %v1481_v30, %v1473_v56  ;;  %v1486_v22 = vadd.s32 %v1482_v8, %v1474_v38 }
 0x18e   :  { %v1732_v20 = vadd.s32 %v1728_v0, %v1720_v13  ;;  %v1744_v50 = vor.u32 %v1740_v36, %v1736_v7  ;;  %v1487_v44 = vadd.s32 %v1483_v17, %v1475_v49  ;;  %v1497_v24 = vor.u32 %v1493_v48, %v1489_v21 }
 0x18f   :  { %v1498_v63 = vor.u32 %v1494_v14, %v1490_v57  ;;  %v1499_v29 = vor.u32 %v1495_v47, %v1491_v26  ;;  %v3797_v31 = vmul.f32 %v3766_v23, %v1087_v45  ;;  %v3800_v27 = vmul.f32 %v3769_v51, %v1088_v46 }
 0x190   :  { %v1488_v25 = vadd.s32 %v1484_v62, %v1476_v32  ;;  %v1500_v12 = vor.u32 %v1496_v39, %v1492_v6  ;;  %vm1113_vm0 = vcmp.gt.f32.partialorder %v3780_v54, %v3502_v55  ;;  %v1745_v37 = vxor.u32 %v1741_v1, %v3787_v10 }
 0x191   :  { %v1746_v33 = vxor.u32 %v1742_v15, %v1730_v34  ;;  %v1747_v41 = vxor.u32 %v1743_v2, %v1731_v18  ;;  %v3244_v53 = vsel %vm1094_vm13, 1.0, %v4494_v42  ;;  %v3245_v45 = vsel %vm1095_vm14, 1.0, %v4494_v42 }
 0x192   :  { %v3246_v46 = vsel %vm1096_vm15, 1.0, %v4494_v42  ;;  %v1748_v40 = vxor.u32 %v1744_v50, %v1732_v20  ;;  %v1105_v30 = vadd.f32 %v3773_v59, %v4497_v43  ;;  %v1501_v13 = vxor.u32 %v1497_v24, %v1485_v28 }
 0x193   :  { %v1502_v0 = vxor.u32 %v1498_v63, %v1486_v22  ;;  %v1503_v56 = vxor.u32 %v1499_v29, %v1487_v44  ;;  %vm1114_vm1 = vcmp.gt.f32.partialorder %v3784_v58, %v3510_v3  ;;  %vm1115_vm2 = vcmp.gt.f32.partialorder %v3797_v31, %v4495_v11 }
 0x194   :  { %vm1116_vm3 = vcmp.gt.f32.partialorder %v3800_v27, %v4496_v19  ;;  %v3247_v52 = vsel %vm1113_vm0, 1.0, %v4494_v42  ;;  %v1504_v23 = vxor.u32 %v1500_v12, %v1488_v25  ;;  %v1753_v51 = vshll.u32 %v1745_v37, 29 }
 0x195   :  { %v1754_v38 = vshll.u32 %v1746_v33, 29  ;;  %v1755_v8 = vshll.u32 %v1747_v41, 29  ;;  %v1757_v17 = vshrl.u32 %v1745_v37, 3  ;;  %v1756_v59 = vshll.u32 %v1748_v40, 29 }
 0x196   :  { %v1758_v49 = vshrl.u32 %v1746_v33, 3  ;;  %v1759_v62 = vshrl.u32 %v1747_v41, 3  ;;  %v1760_v60 = vshrl.u32 %v1748_v40, 3  ;;  %v1509_v4 = vshll.u32 %v1501_v13, 15 }
 0x197   :  { %v1510_v16 = vshll.u32 %v1502_v0, 15  ;;  %v1511_v61 = vshll.u32 %v1503_v56, 15  ;;  %v1513_v9 = vshrl.u32 %v1501_v13, 17  ;;  %v1512_v5 = vshll.u32 %v1504_v23, 15 }
 0x198   :  { %v1514_v21 = vshrl.u32 %v1502_v0, 17  ;;  %v1515_v48 = vshrl.u32 %v1503_v56, 17  ;;  %v1516_v7 = vshrl.u32 %v1504_v23, 17  ;;  %v1749_v36 = vadd.s32 %v1745_v37, %v3787_v10  ;;  %v4498_v10 = vld [vmem:[#allocation19_spill] sm:$0xff] }
 0x199   :  { %v1750_v57 = vadd.s32 %v1746_v33, %v1730_v34  ;;  %v1751_v26 = vadd.s32 %v1747_v41, %v1731_v18  ;;  %v1761_v14 = vor.u32 %v1757_v17, %v1753_v51  ;;  %v1752_v47 = vadd.s32 %v1748_v40, %v1732_v20  ;;  %v4499_v18 = vld [vmem:[#allocation20_spill] sm:$0xff]  ;;  %v4500_v33 = vld [vmem:[#allocation21_spill] sm:$0xff] }
 0x19a   :  { %v1762_v32 = vor.u32 %v1758_v49, %v1754_v38  ;;  %v1763_v6 = vor.u32 %v1759_v62, %v1755_v8  ;;  %v1764_v39 = vor.u32 %v1760_v60, %v1756_v59  ;;  %v3827_v1 = vadd.s32 %v1501_v13, %v1485_v28 }
 0x19b   :  { %v3829_v15 = vadd.s32 %v1502_v0, %v1486_v22  ;;  %v3831_v2 = vadd.s32 %v1503_v56, %v1487_v44  ;;  %v3833_v50 = vadd.s32 %v1504_v23, %v1488_v25  ;;  %v1517_v24 = vor.u32 %v1513_v9, %v1509_v4 }
 0x19c   :  { %v1518_v63 = vor.u32 %v1514_v21, %v1510_v16  ;;  %v1519_v29 = vor.u32 %v1515_v48, %v1511_v61  ;;  %v1520_v12 = vor.u32 %v1516_v7, %v1512_v5  ;;  %v1106_v34 = vadd.f32 %v3244_v53, %v4498_v10 }
 0x19d   :  { %v1107_v37 = vadd.f32 %v3245_v45, %v4499_v18  ;;  %v1765_v20 = vxor.u32 %v1761_v14, %v1749_v36  ;;  %v1108_v41 = vadd.f32 %v3246_v46, %v4500_v33  ;;  %v1766_v40 = vxor.u32 %v1762_v32, %v1750_v57 }
 0x19e   :  { %v1767_v28 = vxor.u32 %v1763_v6, %v1751_v26  ;;  %v1768_v43 = vxor.u32 %v1764_v39, %v1752_v47  ;;  %v3248_v22 = vsel %vm1114_vm1, 1.0, %v4494_v42  ;;  %v3249_v44 = vsel %vm1115_vm2, 1.0, %v4494_v42 }
 0x19f   :  { %v3250_v25 = vsel %vm1116_vm3, 1.0, %v4494_v42  ;;  %v3850_v53 = vadd.f32 %v3247_v52, %v1105_v30  ;;  %v1521_v45 = vxor.u32 %v1517_v24, %v3827_v1  ;;  %v1522_v46 = vxor.u32 %v1518_v63, %v3829_v15 }
 0x1a0   :  { %v1523_v13 = vxor.u32 %v1519_v29, %v3831_v2  ;;  %v1524_v0 = vxor.u32 %v1520_v12, %v3833_v50  ;;  %v1769_v56 = vadd.s32 %v1765_v20, %v1749_v36  ;;  %v1770_v23 = vadd.s32 %v1766_v40, %v1750_v57 }
 0x1a1   :  { %4501 = vst [vmem:[#allocation18_spill] sm:$0xff] %v3850_v53  ;;  %v1771_v51 = vadd.s32 %v1767_v28, %v1751_v26  ;;  %v1773_v38 = vshll.u32 %v1765_v20, 16  ;;  %v1774_v8 = vshll.u32 %v1766_v40, 16  ;;  %v1775_v17 = vshll.u32 %v1767_v28, 16 }
 0x1a2   :  { %v1776_v59 = vshll.u32 %v1768_v43, 16  ;;  %v1777_v49 = vshrl.u32 %v1765_v20, 16  ;;  %v1772_v62 = vadd.s32 %v1768_v43, %v1752_v47  ;;  %v1778_v60 = vshrl.u32 %v1766_v40, 16 }
 0x1a3   :  { %v1779_v30 = vshrl.u32 %v1767_v28, 16  ;;  %v1780_v52 = vshrl.u32 %v1768_v43, 16  ;;  %v3856_v4 = vadd.f32 %v3248_v22, %v1106_v34  ;;  %v3858_v16 = vadd.f32 %v3249_v44, %v1107_v37 }
 0x1a4   :  { %v3860_v61 = vadd.f32 %v3250_v25, %v1108_v41  ;;  %v1781_v9 = vor.u32 %v1777_v49, %v1773_v38  ;;  %v1529_v5 = vshll.u32 %v1521_v45, 26  ;;  %v1782_v21 = vor.u32 %v1778_v60, %v1774_v8 }
 0x1a5   :  { %4502 = vst [vmem:[#allocation19_spill] sm:$0xff] %v3856_v4  ;;  %v1783_v48 = vor.u32 %v1779_v30, %v1775_v17  ;;  %v1784_v7 = vor.u32 %v1780_v52, %v1776_v59  ;;  %v1530_v36 = vshll.u32 %v1522_v46, 26  ;;  %v1531_v57 = vshll.u32 %v1523_v13, 26 }
 0x1a6   :  { %4503 = vst [vmem:[#allocation20_spill] sm:$0xff] %v3858_v16  ;;  %v1533_v26 = vshrl.u32 %v1521_v45, 6  ;;  %v1785_v14 = vxor.u32 %v1781_v9, %v1769_v56  ;;  %v1532_v32 = vshll.u32 %v1524_v0, 26  ;;  %v1786_v47 = vxor.u32 %v1782_v21, %v1770_v23 }
 0x1a7   :  { %4504 = vst [vmem:[#allocation21_spill] sm:$0xff] %v3860_v61  ;;  %v1787_v6 = vxor.u32 %v1783_v48, %v1771_v51  ;;  %v1788_v39 = vxor.u32 %v1784_v7, %v1772_v62  ;;  %v1534_v24 = vshrl.u32 %v1522_v46, 6  ;;  %v1535_v63 = vshrl.u32 %v1523_v13, 6  ;;  %v4505_v48 = vld [vmem:[#allocation11_spill] sm:$0xff] }
 0x1a8   :  { %v1793_v29 = vshll.u32 %v1785_v14, 24  ;;  %v1797_v12 = vshrl.u32 %v1785_v14, 8  ;;  %v1789_v10 = vadd.s32 %v1785_v14, %v1769_v56  ;;  %v1790_v34 = vadd.s32 %v1786_v47, %v1770_v23 }
 0x1a9   :  { %v1791_v18 = vadd.s32 %v1787_v6, %v1771_v51  ;;  %v1794_v37 = vshll.u32 %v1786_v47, 24  ;;  %v1795_v20 = vshll.u32 %v1787_v6, 24  ;;  %v1796_v33 = vshll.u32 %v1788_v39, 24 }
 0x1aa   :  { %v1798_v41 = vshrl.u32 %v1786_v47, 8  ;;  %v1799_v40 = vshrl.u32 %v1787_v6, 8  ;;  %v1536_v28 = vshrl.u32 %v1524_v0, 6  ;;  %v1792_v43 = vadd.s32 %v1788_v39, %v1772_v62 }
 0x1ab   :  { %v1800_v22 = vshrl.u32 %v1788_v39, 8  ;;  %v1801_v44 = vor.u32 %v1797_v12, %v1793_v29  ;;  %v1525_v25 = vadd.s32 %v1521_v45, %v3827_v1  ;;  %v1526_v38 = vadd.s32 %v1522_v46, %v3829_v15 }
 0x1ac   :  { %v1802_v8 = vor.u32 %v1798_v41, %v1794_v37  ;;  %v1803_v17 = vor.u32 %v1799_v40, %v1795_v20  ;;  %v1527_v59 = vadd.s32 %v1523_v13, %v3831_v2  ;;  %v1537_v56 = vor.u32 %v1533_v26, %v1529_v5 }
 0x1ad   :  { %v1804_v23 = vor.u32 %v1800_v22, %v1796_v33  ;;  %v1805_v51 = vxor.u32 %v1801_v44, %v1789_v10  ;;  %v1528_v49 = vadd.s32 %v1524_v0, %v3833_v50  ;;  %v1538_v60 = vor.u32 %v1534_v24, %v1530_v36 }
 0x1ae   :  { %v1806_v30 = vxor.u32 %v1802_v8, %v1790_v34  ;;  %v1807_v52 = vxor.u32 %v1803_v17, %v1791_v18  ;;  %v1539_v9 = vor.u32 %v1535_v63, %v1531_v57  ;;  %v1540_v62 = vor.u32 %v1536_v28, %v1532_v32 }
 0x1af   :  { %v1808_v21 = vxor.u32 %v1804_v23, %v1792_v43  ;;  %v1813_v7 = vadd.s32 %v1805_v51, %v4505_v48  ;;  %v1809_v1 = vadd.s32 %v1789_v10, %v3418_v35  ;;  %v1810_v15 = vadd.s32 %v1790_v34, %v3418_v35 }
 0x1b0   :  { %v1814_v45 = vadd.s32 %v1806_v30, %v4505_v48  ;;  %v1815_v2 = vadd.s32 %v1807_v52, %v4505_v48  ;;  %v1541_v46 = vxor.u32 %v1537_v56, %v1525_v25  ;;  %v1811_v13 = vadd.s32 %v1791_v18, %v3418_v35 }
 0x1b1   :  { %v1816_v50 = vadd.s32 %v1808_v21, %v4505_v48  ;;  %v1817_v0 = vadd.s32 2, %v1813_v7  ;;  %v3873_v5 = vxor.u32 %v1538_v60, %v1526_v38  ;;  %v1812_v36 = vadd.s32 %v1792_v43, %v3418_v35 }
 0x1b2   :  { %v1818_v57 = vadd.s32 2, %v1814_v45  ;;  %v1819_v26 = vadd.s32 2, %v1815_v2  ;;  %v3876_v14 = vxor.u32 %v1539_v9, %v1527_v59  ;;  %v3878_v37 = vxor.u32 %v1540_v62, %v1528_v49 }
 0x1b3   :  { %v1820_v32 = vadd.s32 2, %v1816_v50  ;;  %v1825_v47 = vshll.u32 %v1817_v0, 13  ;;  %v1829_v6 = vshrl.u32 %v1817_v0, 19  ;;  %v1821_v39 = vadd.s32 %v1817_v0, %v1809_v1 }
 0x1b4   :  { %v1822_v24 = vadd.s32 %v1818_v57, %v1810_v15  ;;  %v1826_v63 = vshll.u32 %v1818_v57, 13  ;;  %v1827_v29 = vshll.u32 %v1819_v26, 13  ;;  %v1823_v12 = vadd.s32 %v1819_v26, %v1811_v13 }
 0x1b5   :  { %v1828_v10 = vshll.u32 %v1820_v32, 13  ;;  %v1830_v34 = vshrl.u32 %v1818_v57, 19  ;;  %v1831_v18 = vshrl.u32 %v1819_v26, 19  ;;  %v1824_v20 = vadd.s32 %v1820_v32, %v1812_v36 }
 0x1b6   :  { %v1832_v33 = vshrl.u32 %v1820_v32, 19  ;;  %v1833_v41 = vor.u32 %v1829_v6, %v1825_v47  ;;  %v3880_v40 = vadd.s32 %v1541_v46, %v1525_v25  ;;  %v1549_v28 = vshll.u32 %v1541_v46, 6 }
 0x1b7   :  { %v1834_v43 = vor.u32 %v1830_v34, %v1826_v63  ;;  %v1835_v22 = vor.u32 %v1831_v18, %v1827_v29  ;;  %v3883_v44 = vadd.s32 %v3873_v5, %v1526_v38  ;;  %v1553_v8 = vshrl.u32 %v1541_v46, 26 }
 0x1b8   :  { %v1836_v17 = vor.u32 %v1832_v33, %v1828_v10  ;;  %v1837_v56 = vxor.u32 %v1833_v41, %v1821_v39  ;;  %v3886_v23 = vadd.s32 %v3876_v14, %v1527_v59  ;;  %v1550_v51 = vshll.u32 %v3873_v5, 6 }
 0x1b9   :  { %v1838_v60 = vxor.u32 %v1834_v43, %v1822_v24  ;;  %v1839_v30 = vxor.u32 %v1835_v22, %v1823_v12  ;;  %v1551_v52 = vshll.u32 %v3876_v14, 6  ;;  %v3891_v59 = vadd.s32 %v3878_v37, %v1528_v49 }
 0x1ba   :  { %v1840_v25 = vxor.u32 %v1836_v17, %v1824_v20  ;;  %v1845_v9 = vshll.u32 %v1837_v56, 15  ;;  %v1849_v62 = vshrl.u32 %v1837_v56, 17  ;;  %v1841_v21 = vadd.s32 %v1837_v56, %v1821_v39 }
 0x1bb   :  { %v1842_v7 = vadd.s32 %v1838_v60, %v1822_v24  ;;  %v1846_v1 = vshll.u32 %v1838_v60, 15  ;;  %v1847_v38 = vshll.u32 %v1839_v30, 15  ;;  %v1843_v15 = vadd.s32 %v1839_v30, %v1823_v12 }
 0x1bc   :  { %v1848_v45 = vshll.u32 %v1840_v25, 15  ;;  %v1850_v2 = vshrl.u32 %v1838_v60, 17  ;;  %v1851_v46 = vshrl.u32 %v1839_v30, 17  ;;  %v1844_v13 = vadd.s32 %v1840_v25, %v1824_v20 }
 0x1bd   :  { %v1852_v50 = vshrl.u32 %v1840_v25, 17  ;;  %v1853_v0 = vor.u32 %v1849_v62, %v1845_v9  ;;  %v1552_v36 = vshll.u32 %v3878_v37, 6  ;;  %v1554_v57 = vshrl.u32 %v3873_v5, 26 }
 0x1be   :  { %v1854_v26 = vor.u32 %v1850_v2, %v1846_v1  ;;  %v1855_v32 = vor.u32 %v1851_v46, %v1847_v38  ;;  %v1555_v47 = vshrl.u32 %v3876_v14, 26  ;;  %v1556_v6 = vshrl.u32 %v3878_v37, 26 }
 0x1bf   :  { %v1856_v39 = vor.u32 %v1852_v50, %v1848_v45  ;;  %v1857_v24 = vxor.u32 %v1853_v0, %v1841_v21  ;;  %v1557_v63 = vor.u32 %v1553_v8, %v1549_v28  ;;  %v1565_v49 = vadd.s32 %v3880_v40, %v3418_v35 }
 0x1c0   :  { %v1858_v29 = vxor.u32 %v1854_v26, %v1842_v7  ;;  %v1859_v12 = vxor.u32 %v1855_v32, %v1843_v15  ;;  %v1566_v10 = vadd.s32 %v3883_v44, %v3418_v35  ;;  %v1558_v28 = vor.u32 %v1554_v57, %v1550_v51 }
 0x1c1   :  { %v1860_v34 = vxor.u32 %v1856_v39, %v1844_v13  ;;  %v1865_v18 = vshll.u32 %v1857_v24, 26  ;;  %v1869_v5 = vshrl.u32 %v1857_v24, 6  ;;  %v1861_v20 = vadd.s32 %v1857_v24, %v1841_v21 }
 0x1c2   :  { %v1862_v33 = vadd.s32 %v1858_v29, %v1842_v7  ;;  %v1866_v41 = vshll.u32 %v1858_v29, 26  ;;  %v1867_v14 = vshll.u32 %v1859_v12, 26  ;;  %v1863_v43 = vadd.s32 %v1859_v12, %v1843_v15 }
 0x1c3   :  { %v1868_v37 = vshll.u32 %v1860_v34, 26  ;;  %v1870_v22 = vshrl.u32 %v1858_v29, 6  ;;  %v1871_v17 = vshrl.u32 %v1859_v12, 6  ;;  %v1864_v8 = vadd.s32 %v1860_v34, %v1844_v13 }
 0x1c4   :  { %v1872_v56 = vshrl.u32 %v1860_v34, 6  ;;  %v1873_v60 = vor.u32 %v1869_v5, %v1865_v18  ;;  %v1559_v30 = vor.u32 %v1555_v47, %v1551_v52  ;;  %v3903_v25 = vadd.s32 %v3886_v23, %v3418_v35 }
 0x1c5   :  { %v1874_v9 = vor.u32 %v1870_v22, %v1866_v41  ;;  %v1875_v62 = vor.u32 %v1871_v17, %v1867_v14  ;;  %v3905_v1 = vor.u32 %v1556_v6, %v1552_v36  ;;  %v3909_v21 = vadd.s32 %v3891_v59, %v3418_v35 }
 0x1c6   :  { %v1876_v7 = vor.u32 %v1872_v56, %v1868_v37  ;;  %v1877_v38 = vxor.u32 %v1873_v60, %v1861_v20  ;;  %v1561_v51 = vxor.u32 %v1557_v63, %v3880_v40  ;;  %v1577_v15 = vshrl.u32 %v1565_v49, 8 }
 0x1c7   :  { %v1878_v45 = vxor.u32 %v1874_v9, %v1862_v33  ;;  %v1879_v2 = vxor.u32 %v1875_v62, %v1863_v43  ;;  %v1578_v52 = vshrl.u32 %v1566_v10, 8  ;;  %v1562_v24 = vxor.u32 %v1558_v28, %v3883_v44  ;;  %v4507_v62 = vld [vmem:[#allocation13_spill] sm:$0xff] }
 0x1c8   :  { %v1880_v46 = vxor.u32 %v1876_v7, %v1864_v8  ;;  %v1885_v13 = vshll.u32 %v1877_v38, 6  ;;  %v1889_v50 = vshrl.u32 %v1877_v38, 26  ;;  %v1881_v0 = vadd.s32 %v1877_v38, %v1861_v20 }
 0x1c9   :  { %v1882_v57 = vadd.s32 %v1878_v45, %v1862_v33  ;;  %v1886_v26 = vshll.u32 %v1878_v45, 6  ;;  %v1887_v36 = vshll.u32 %v1879_v2, 6  ;;  %v1883_v32 = vadd.s32 %v1879_v2, %v1863_v43 }
 0x1ca   :  { %v1888_v47 = vshll.u32 %v1880_v46, 6  ;;  %v1890_v6 = vshrl.u32 %v1878_v45, 26  ;;  %v1891_v39 = vshrl.u32 %v1879_v2, 26  ;;  %v1884_v29 = vadd.s32 %v1880_v46, %v1864_v8 }
 0x1cb   :  { %v1892_v12 = vshrl.u32 %v1880_v46, 26  ;;  %v1893_v40 = vor.u32 %v1889_v50, %v1885_v13  ;;  %v1563_v63 = vxor.u32 %v1559_v30, %v3886_v23  ;;  %v1579_v49 = vshrl.u32 %v3903_v25, 8 }
 0x1cc   :  { %v1894_v10 = vor.u32 %v1890_v6, %v1886_v26  ;;  %v1895_v34 = vor.u32 %v1891_v39, %v1887_v36  ;;  %v1564_v18 = vxor.u32 %v3905_v1, %v3891_v59  ;;  %v1580_v5 = vshrl.u32 %v3909_v21, 8  ;;  %v4506_v59 = vld [vmem:[#allocation12_spill] sm:$0xff]  ;;  %v4509_v39 = vld [vmem:[#allocation15_spill] sm:$0xff] }
 0x1cd   :  { %v1896_v20 = vor.u32 %v1892_v12, %v1888_v47  ;;  %v1897_v33 = vxor.u32 %v1893_v40, %v1881_v0  ;;  %v1569_v41 = vadd.s32 %v1561_v51, %v4505_v48  ;;  %v1581_v14 = vcvt.s32.f32 %v1577_v15  ;;  %v4508_v51 = vld [vmem:[#allocation14_spill] sm:$0xff] }
 0x1ce   :  { %v1898_v44 = vxor.u32 %v1894_v10, %v1882_v57  ;;  %v1899_v43 = vxor.u32 %v1895_v34, %v1883_v32  ;;  %v3920_v37 = vadd.s32 %v1562_v24, %v4505_v48  ;;  %v1582_v23 = vcvt.s32.f32 %v1578_v52 }
 0x1cf   :  { %v1900_v22 = vxor.u32 %v1896_v20, %v1884_v29  ;;  %v1905_v17 = vadd.s32 1013904242, %v1897_v33  ;;  %v1901_v28 = vadd.s32 %v1881_v0, %v4505_v48  ;;  %v2169_v60 = vadd.s32 1013904246, %v4506_v59 }
 0x1d0   :  { %v1906_v8 = vadd.s32 1013904242, %v1898_v44  ;;  %v1907_v56 = vadd.s32 1013904242, %v1899_v43  ;;  %v3925_v30 = vadd.s32 %v1563_v63, %v4505_v48  ;;  %v2170_v1 = vadd.s32 1013904246, %v4507_v62 }
 0x1d1   :  { %v1908_v25 = vadd.s32 1013904242, %v1900_v22  ;;  %v1909_v9 = vadd.s32 3, %v1905_v17  ;;  %v1902_v21 = vadd.s32 %v1882_v57, %v4505_v48  ;;  %v2171_v15 = vadd.s32 1013904246, %v4508_v51 }
 0x1d2   :  { %v1910_v7 = vadd.s32 3, %v1906_v8  ;;  %v1911_v38 = vadd.s32 3, %v1907_v56  ;;  %v1903_v45 = vadd.s32 %v1883_v32, %v4505_v48  ;;  %v1904_v13 = vadd.s32 %v1884_v29, %v4505_v48 }
 0x1d3   :  { %v1912_v2 = vadd.s32 3, %v1908_v25  ;;  %v1917_v52 = vshll.u32 %v1909_v9, 17  ;;  %v1921_v46 = vshrl.u32 %v1909_v9, 15  ;;  %v1913_v50 = vadd.s32 %v1909_v9, %v1901_v28 }
 0x1d4   :  { %v1918_v0 = vshll.u32 %v1910_v7, 17  ;;  %v1919_v26 = vshll.u32 %v1911_v38, 17  ;;  %v1922_v47 = vshrl.u32 %v1910_v7, 15  ;;  %v1923_v6 = vshrl.u32 %v1911_v38, 15 }
 0x1d5   :  { %v1920_v36 = vshll.u32 %v1912_v2, 17  ;;  %v2172_v24 = vadd.s32 1013904246, %v4509_v39  ;;  %v1924_v57 = vshrl.u32 %v1912_v2, 15  ;;  %v1925_v12 = vor.u32 %v1921_v46, %v1917_v52 }
 0x1d6   :  { %v2173_v40 = vxor.u32 3731801997, %v2169_v60  ;;  %v2174_v63 = vxor.u32 3731801997, %v2170_v1  ;;  %v1914_v10 = vadd.s32 %v1910_v7, %v1902_v21  ;;  %v1915_v34 = vadd.s32 %v1911_v38, %v1903_v45 }
 0x1d7   :  { %v1926_v32 = vor.u32 %v1922_v47, %v1918_v0  ;;  %v1927_v20 = vor.u32 %v1923_v6, %v1919_v26  ;;  %v1583_v33 = vcvt.s32.f32 %v1579_v49  ;;  %v1916_v44 = vadd.s32 %v1912_v2, %v1904_v13 }
 0x1d8   :  { %v1928_v43 = vor.u32 %v1924_v57, %v1920_v36  ;;  %v1929_v29 = vxor.u32 %v1925_v12, %v1913_v50  ;;  %v1572_v22 = vadd.s32 %v1564_v18, %v4505_v48  ;;  %v1584_v17 = vcvt.s32.f32 %v1580_v5 }
 0x1d9   :  { %v2175_v28 = vxor.u32 3731801997, %v2171_v15  ;;  %v2176_v8 = vxor.u32 3731801997, %v2172_v24  ;;  %v2181_v56 = vshll.u32 %v2173_v40, 15  ;;  %v2182_v25 = vshll.u32 %v2174_v63, 15 }
 0x1da   :  { %v2185_v9 = vshrl.u32 %v2173_v40, 17  ;;  %v2186_v39 = vshrl.u32 %v2174_v63, 17  ;;  %v3934_v52 = vadd.s32 5, %v1569_v41  ;;  %v1585_v46 = vadd.f32 1.0, %v1581_v14 }
 0x1db   :  { %v1930_v21 = vxor.u32 %v1926_v32, %v1914_v10  ;;  %v1931_v7 = vxor.u32 %v1927_v20, %v1915_v34  ;;  %v1586_v38 = vadd.f32 1.0, %v1582_v23  ;;  %v1932_v45 = vxor.u32 %v1928_v43, %v1916_v44 }
 0x1dc   :  { %v1937_v49 = vshll.u32 %v1929_v29, 29  ;;  %v1941_v2 = vshrl.u32 %v1929_v29, 3  ;;  %v2183_v13 = vshll.u32 %v2175_v28, 15  ;;  %v2184_v0 = vshll.u32 %v2176_v8, 15 }
 0x1dd   :  { %v2187_v26 = vshrl.u32 %v2175_v28, 17  ;;  %v2188_v18 = vshrl.u32 %v2176_v8, 17  ;;  %v2177_v5 = vadd.s32 %v2173_v40, %v2169_v60  ;;  %v2178_v36 = vadd.s32 %v2174_v63, %v2170_v1 }
 0x1de   :  { %v2189_v47 = vor.u32 %v2185_v9, %v2181_v56  ;;  %v2190_v6 = vor.u32 %v2186_v39, %v2182_v25  ;;  %v1938_v57 = vshll.u32 %v1930_v21, 29  ;;  %v1939_v12 = vshll.u32 %v1931_v7, 29 }
 0x1df   :  { %v1942_v51 = vshrl.u32 %v1930_v21, 3  ;;  %v1943_v41 = vshrl.u32 %v1931_v7, 3  ;;  %v1933_v62 = vadd.s32 %v1929_v29, %v1913_v50  ;;  %v1940_v14 = vshll.u32 %v1932_v45, 29 }
 0x1e0   :  { %v1944_v32 = vshrl.u32 %v1932_v45, 3  ;;  %v1945_v20 = vor.u32 %v1941_v2, %v1937_v49  ;;  %v2179_v23 = vadd.s32 %v2175_v28, %v2171_v15  ;;  %v2180_v43 = vadd.s32 %v2176_v8, %v2172_v24 }
 0x1e1   :  { %v2191_v59 = vor.u32 %v2187_v26, %v2183_v13  ;;  %v2192_v48 = vor.u32 %v2188_v18, %v2184_v0  ;;  %v3937_v61 = vadd.s32 5, %v3920_v37  ;;  %v3940_v60 = vadd.s32 5, %v3925_v30 }
 0x1e2   :  { %v2193_v1 = vxor.u32 %v2189_v47, %v2177_v5  ;;  %v2194_v39 = vxor.u32 %v2190_v6, %v2178_v36  ;;  %v1934_v40 = vadd.s32 %v1930_v21, %v1914_v10  ;;  %v1935_v63 = vadd.s32 %v1931_v7, %v1915_v34 }
 0x1e3   :  { %v1946_v56 = vor.u32 %v1942_v51, %v1938_v57  ;;  %v1947_v25 = vor.u32 %v1943_v41, %v1939_v12  ;;  %v1587_v50 = vadd.f32 1.0, %v1583_v33  ;;  %v1936_v29 = vadd.s32 %v1932_v45, %v1916_v44 }
 0x1e4   :  { %v1948_v9 = vor.u32 %v1944_v32, %v1940_v14  ;;  %v1949_v49 = vxor.u32 %v1945_v20, %v1933_v62  ;;  %v3942_v15 = vadd.s32 5, %v1572_v22  ;;  %v1588_v24 = vadd.f32 1.0, %v1584_v17 }
 0x1e5   :  { %v2195_v28 = vxor.u32 %v2191_v59, %v2179_v23  ;;  %v2196_v8 = vxor.u32 %v2192_v48, %v2180_v43  ;;  %v2201_v37 = vshll.u32 %v2193_v1, 26  ;;  %v2202_v2 = vshll.u32 %v2194_v39, 26 }
 0x1e6   :  { %v2205_v13 = vshrl.u32 %v2193_v1, 6  ;;  %v2206_v30 = vshrl.u32 %v2194_v39, 6  ;;  %v1589_v0 = vmul.f32 5.9604645e-08, %v1585_v46  ;;  %v1590_v26 = vmul.f32 5.9604645e-08, %v1586_v38 }
 0x1e7   :  { %v1950_v18 = vxor.u32 %v1946_v56, %v1934_v40  ;;  %v1951_v10 = vxor.u32 %v1947_v25, %v1935_v63  ;;  %v1593_v51 = vshrl.u32 %v3934_v52, 8  ;;  %v1952_v34 = vxor.u32 %v1948_v9, %v1936_v29 }
 0x1e8   :  { %v1957_v33 = vshll.u32 %v1949_v49, 16  ;;  %v1961_v44 = vshrl.u32 %v1949_v49, 16  ;;  %v2203_v21 = vshll.u32 %v2195_v28, 26  ;;  %v2204_v7 = vshll.u32 %v2196_v8, 26 }
 0x1e9   :  { %v2207_v22 = vshrl.u32 %v2195_v28, 6  ;;  %v2208_v45 = vshrl.u32 %v2196_v8, 6  ;;  %v2197_v17 = vadd.s32 %v2193_v1, %v2177_v5  ;;  %v2198_v59 = vadd.s32 %v2194_v39, %v2178_v36 }
 0x1ea   :  { %v2209_v48 = vor.u32 %v2205_v13, %v2201_v37  ;;  %v2210_v47 = vor.u32 %v2206_v30, %v2202_v2  ;;  %v1958_v6 = vshll.u32 %v1950_v18, 16  ;;  %v1959_v57 = vshll.u32 %v1951_v10, 16 }
 0x1eb   :  { %v1962_v12 = vshrl.u32 %v1950_v18, 16  ;;  %v1963_v46 = vshrl.u32 %v1951_v10, 16  ;;  %v1953_v38 = vadd.s32 %v1949_v49, %v1933_v62  ;;  %v1960_v41 = vshll.u32 %v1952_v34, 16 }
 0x1ec   :  { %v1964_v14 = vshrl.u32 %v1952_v34, 16  ;;  %v1965_v32 = vor.u32 %v1961_v44, %v1957_v33  ;;  %v2199_v52 = vadd.s32 %v2195_v28, %v2179_v23  ;;  %v2200_v20 = vadd.s32 %v2196_v8, %v2180_v43 }
 0x1ed   :  { %v2211_v56 = vor.u32 %v2207_v22, %v2203_v21  ;;  %v2212_v25 = vor.u32 %v2208_v45, %v2204_v7  ;;  %v1591_v9 = vmul.f32 5.9604645e-08, %v1587_v50  ;;  %v1592_v16 = vmul.f32 5.9604645e-08, %v1588_v24 }
 0x1ee   :  { %v2213_v4 = vxor.u32 %v2209_v48, %v2197_v17  ;;  %v2214_v53 = vxor.u32 %v2210_v47, %v2198_v59  ;;  %v1954_v5 = vadd.s32 %v1950_v18, %v1934_v40  ;;  %v1955_v36 = vadd.s32 %v1951_v10, %v1935_v63 }
 0x1ef   :  { %v1966_v1 = vor.u32 %v1962_v12, %v1958_v6  ;;  %v1967_v39 = vor.u32 %v1963_v46, %v1959_v57  ;;  %v1594_v37 = vshrl.u32 %v3937_v61, 8  ;;  %v1956_v2 = vadd.s32 %v1952_v34, %v1936_v29 }
 0x1f0   :  { %v1968_v13 = vor.u32 %v1964_v14, %v1960_v41  ;;  %v1969_v62 = vxor.u32 %v1965_v32, %v1953_v38  ;;  %v1595_v49 = vshrl.u32 %v3940_v60, 8  ;;  %v1596_v23 = vshrl.u32 %v3942_v15, 8 }
 0x1f1   :  { %v2215_v43 = vxor.u32 %v2211_v56, %v2199_v52  ;;  %v2216_v28 = vxor.u32 %v2212_v25, %v2200_v20  ;;  %v2221_v8 = vshll.u32 %v2213_v4, 6  ;;  %v2222_v50 = vshll.u32 %v2214_v53, 6 }
 0x1f2   :  { %v2225_v24 = vshrl.u32 %v2213_v4, 26  ;;  %v2226_v30 = vshrl.u32 %v2214_v53, 26  ;;  %v1597_v33 = vcvt.s32.f32 %v1593_v51  ;;  %v3949_v40 = vmul.f32 %v1589_v0, %v3780_v54 }
 0x1f3   :  { %v1970_v63 = vxor.u32 %v1966_v1, %v1954_v5  ;;  %v1971_v18 = vxor.u32 %v1967_v39, %v1955_v36  ;;  %v3952_v61 = vmul.f32 %v1590_v26, %v3784_v58  ;;  %v1972_v29 = vxor.u32 %v1968_v13, %v1956_v2 }
 0x1f4   :  { %v1977_v10 = vshll.u32 %v1969_v62, 24  ;;  %v1981_v60 = vshrl.u32 %v1969_v62, 8  ;;  %v2217_v34 = vadd.s32 %v2213_v4, %v2197_v17  ;;  %v2218_v15 = vadd.s32 %v2214_v53, %v2198_v59 }
 0x1f5   :  { %v2223_v44 = vshll.u32 %v2215_v43, 6  ;;  %v2227_v21 = vshrl.u32 %v2215_v43, 26  ;;  %v2224_v7 = vshll.u32 %v2216_v28, 6  ;;  %v2228_v22 = vshrl.u32 %v2216_v28, 26 }
 0x1f6   :  { %v2229_v45 = vor.u32 %v2225_v24, %v2221_v8  ;;  %v2230_v48 = vor.u32 %v2226_v30, %v2222_v50  ;;  %v1978_v51 = vshll.u32 %v1970_v63, 24  ;;  %v1979_v47 = vshll.u32 %v1971_v18, 24 }
 0x1f7   :  { %v1982_v54 = vshrl.u32 %v1970_v63, 8  ;;  %v1983_v0 = vshrl.u32 %v1971_v18, 8  ;;  %v1973_v6 = vadd.s32 %v1969_v62, %v1953_v38  ;;  %v1980_v57 = vshll.u32 %v1972_v29, 24 }
 0x1f8   :  { %v1984_v12 = vshrl.u32 %v1972_v29, 8  ;;  %v1985_v58 = vor.u32 %v1981_v60, %v1977_v10  ;;  %v1598_v26 = vcvt.s32.f32 %v1594_v37  ;;  %v1599_v46 = vcvt.s32.f32 %v1595_v49 }
 0x1f9   :  { %v2219_v41 = vadd.s32 %v2215_v43, %v2199_v52  ;;  %v2231_v14 = vor.u32 %v2227_v21, %v2223_v44  ;;  %v1600_v4 = vcvt.s32.f32 %v1596_v23  ;;  %v2220_v53 = vadd.s32 %v2216_v28, %v2200_v20 }
 0x1fa   :  { %v2232_v17 = vor.u32 %v2228_v22, %v2224_v7  ;;  %v2233_v59 = vxor.u32 %v2229_v45, %v2217_v34  ;;  %v1974_v32 = vadd.s32 %v1970_v63, %v1954_v5  ;;  %v1975_v56 = vadd.s32 %v1971_v18, %v1955_v36 }
 0x1fb   :  { %v1986_v25 = vor.u32 %v1982_v54, %v1978_v51  ;;  %v1987_v1 = vor.u32 %v1983_v0, %v1979_v47  ;;  %v1976_v39 = vadd.s32 %v1972_v29, %v1956_v2  ;;  %v1988_v13 = vor.u32 %v1984_v12, %v1980_v57 }
 0x1fc   :  { %v1989_v8 = vxor.u32 %v1985_v58, %v1973_v6  ;;  %v2234_v50 = vxor.u32 %v2230_v48, %v2218_v15  ;;  %v1601_v38 = vadd.f32 1.0, %v1597_v33  ;;  %v3955_v62 = vmul.f32 %v1591_v9, %v3797_v31 }
 0x1fd   :  { %v3958_v37 = vmul.f32 %v1592_v16, %v3800_v27  ;;  %v2235_v52 = vxor.u32 %v2231_v14, %v2219_v41  ;;  %v1602_v49 = vadd.f32 1.0, %v1598_v26  ;;  %vm1613_vm4 = vcmp.gt.f32.partialorder %v3949_v40, %v3502_v55 }
 0x1fe   :  { %vm1614_vm5 = vcmp.gt.f32.partialorder %v3952_v61, %v3510_v3  ;;  %v2236_v20 = vxor.u32 %v2232_v17, %v2220_v53  ;;  %v1603_v5 = vadd.f32 1.0, %v1599_v46  ;;  %v1990_v36 = vxor.u32 %v1986_v25, %v1974_v32 }
 0x1ff   :  { %v1991_v2 = vxor.u32 %v1987_v1, %v1975_v56  ;;  %v2241_v23 = vadd.s32 %v2233_v59, %v3418_v35  ;;  %v1604_v43 = vadd.f32 1.0, %v1600_v4  ;;  %v1992_v31 = vxor.u32 %v1988_v13, %v1976_v39 }
 0x200   :  { %v1997_v9 = vadd.s32 %v1989_v8, %v3418_v35  ;;  %v2242_v27 = vadd.s32 %v2234_v50, %v3418_v35  ;;  %v1605_v16 = vmul.f32 5.9604645e-08, %v1601_v38  ;;  %v3968_v28 = vsel %vm1613_vm4, 1.0, %v4494_v42 }
 0x201   :  { %v3971_v24 = vsel %vm1614_vm5, 1.0, %v4494_v42  ;;  %v2243_v30 = vadd.s32 %v2235_v52, %v3418_v35  ;;  %v1606_v33 = vmul.f32 5.9604645e-08, %v1602_v49  ;;  %v2237_v63 = vadd.s32 1013904242, %v2217_v34 }
 0x202   :  { %v2238_v18 = vadd.s32 1013904242, %v2218_v15  ;;  %v2244_v29 = vadd.s32 %v2236_v20, %v3418_v35  ;;  %v1607_v10 = vmul.f32 5.9604645e-08, %v1603_v5  ;;  %v1998_v60 = vadd.s32 %v1990_v36, %v3418_v35 }
 0x203   :  { %v1999_v44 = vadd.s32 %v1991_v2, %v3418_v35  ;;  %v2245_v21 = vadd.s32 1, %v2241_v23  ;;  %v1608_v7 = vmul.f32 5.9604645e-08, %v1604_v43  ;;  %v2000_v22 = vadd.s32 %v1992_v31, %v3418_v35 }
 0x204   :  { %v2001_v45 = vadd.s32 4, %v1997_v9  ;;  %v2246_v48 = vadd.s32 1, %v2242_v27  ;;  %v3979_v51 = vmul.f32 %v3949_v40, %v1605_v16  ;;  %v2239_v47 = vadd.s32 1013904242, %v2219_v41 }
 0x205   :  { %v2240_v54 = vadd.s32 1013904242, %v2220_v53  ;;  %v2247_v34 = vadd.s32 1, %v2243_v30  ;;  %vm1615_vm6 = vcmp.gt.f32.partialorder %v3955_v62, %v4495_v11  ;;  %v1993_v15 = vadd.s32 1013904242, %v1973_v6 }
 0x206   :  { %v2248_v0 = vadd.s32 1, %v2244_v29  ;;  %v3983_v57 = vadd.s32 %v2245_v21, %v2237_v63  ;;  %v3985_v12 = vadd.s32 %v2246_v48, %v2238_v18  ;;  %vm1616_vm7 = vcmp.gt.f32.partialorder %v3958_v37, %v4496_v19 }
 0x207   :  { %v1994_v58 = vadd.s32 1013904242, %v1974_v32  ;;  %v2002_v26 = vadd.s32 4, %v1998_v60  ;;  %v2003_v46 = vadd.s32 4, %v1999_v44  ;;  %v2253_v40 = vshll.u32 %v2245_v21, 17 }
 0x208   :  { %v2004_v14 = vadd.s32 4, %v2000_v22  ;;  %v2009_v41 = vshll.u32 %v2001_v45, 13  ;;  %v2013_v4 = vshrl.u32 %v2001_v45, 19  ;;  %v2254_v53 = vshll.u32 %v2246_v48, 17 }
 0x209   :  { %v2255_v17 = vshll.u32 %v2247_v34, 17  ;;  %v2257_v59 = vshrl.u32 %v2245_v21, 15  ;;  %v2258_v25 = vshrl.u32 %v2246_v48, 15  ;;  %v2259_v6 = vshrl.u32 %v2247_v34, 15 }
 0x20a   :  { %v1995_v1 = vadd.s32 1013904242, %v1975_v56  ;;  %v1996_v13 = vadd.s32 1013904242, %v1976_v39  ;;  %v2256_v8 = vshll.u32 %v2248_v0, 17  ;;  %v2260_v50 = vshrl.u32 %v2248_v0, 15 }
 0x20b   :  { %v2010_v38 = vshll.u32 %v2002_v26, 13  ;;  %v2011_v52 = vshll.u32 %v2003_v46, 13  ;;  %v2014_v49 = vshrl.u32 %v2002_v26, 19  ;;  %v2015_v20 = vshrl.u32 %v2003_v46, 19 }
 0x20c   :  { %v2005_v32 = vadd.s32 %v2001_v45, %v1993_v15  ;;  %v2012_v5 = vshll.u32 %v2004_v14, 13  ;;  %v2016_v36 = vshrl.u32 %v2004_v14, 19  ;;  %v2017_v2 = vor.u32 %v2013_v4, %v2009_v41 }
 0x20d   :  { %v2251_v23 = vadd.s32 %v2247_v34, %v2239_v47  ;;  %v2261_v43 = vor.u32 %v2257_v59, %v2253_v40  ;;  %v2262_v31 = vor.u32 %v2258_v25, %v2254_v53  ;;  %v2263_v9 = vor.u32 %v2259_v6, %v2255_v17 }
 0x20e   :  { %v3990_v27 = vmul.f32 %v3952_v61, %v1606_v33  ;;  %v3993_v56 = vmul.f32 %v3955_v62, %v1607_v10  ;;  %v2252_v39 = vadd.s32 %v2248_v0, %v2240_v54  ;;  %v2264_v16 = vor.u32 %v2260_v50, %v2256_v8  ;;  %v4511_v54 = vld [vmem:[#allocation19_spill] sm:$0xff] }
 0x20f   :  { %v2006_v30 = vadd.s32 %v2002_v26, %v1994_v58  ;;  %v2007_v63 = vadd.s32 %v2003_v46, %v1995_v1  ;;  %v2018_v18 = vor.u32 %v2014_v49, %v2010_v38  ;;  %v2019_v29 = vor.u32 %v2015_v20, %v2011_v52 }
 0x210   :  { %v3996_v60 = vmul.f32 %v3958_v37, %v1608_v7  ;;  %v2008_v44 = vadd.s32 %v2004_v14, %v1996_v13  ;;  %v2020_v21 = vor.u32 %v2016_v36, %v2012_v5  ;;  %v2021_v22 = vxor.u32 %v2017_v2, %v2005_v32  ;;  %v4510_v7 = vld [vmem:[#allocation18_spill] sm:$0xff] }
 0x211   :  { %v3253_v61 = vsel %vm1615_vm6, 1.0, %v4494_v42  ;;  %v2265_v33 = vxor.u32 %v2261_v43, %v3983_v57  ;;  %v2266_v10 = vxor.u32 %v2262_v31, %v3985_v12  ;;  %v2267_v45 = vxor.u32 %v2263_v9, %v2251_v23 }
 0x212   :  { %v3254_v48 = vsel %vm1616_vm7, 1.0, %v4494_v42  ;;  %v1625_v47 = vadd.f32 %v3968_v28, %v4510_v7  ;;  %v1626_v34 = vadd.f32 %v3971_v24, %v4511_v54  ;;  %v2268_v15 = vxor.u32 %v2264_v16, %v2252_v39 }
 0x213   :  { %vm1633_vm8 = vcmp.gt.f32.partialorder %v3979_v51, %v3502_v55  ;;  %vm1634_vm9 = vcmp.gt.f32.partialorder %v3990_v27, %v3510_v3  ;;  %v2022_v62 = vxor.u32 %v2018_v18, %v2006_v30  ;;  %v2023_v0 = vxor.u32 %v2019_v29, %v2007_v63  ;;  %v4512_v18 = vld [vmem:[#allocation20_spill] sm:$0xff] }
 0x214   :  { %vm1635_vm10 = vcmp.gt.f32.partialorder %v3993_v56, %v4495_v11  ;;  %vm1636_vm11 = vcmp.gt.f32.partialorder %v3996_v60, %v4496_v19  ;;  %v2024_v37 = vxor.u32 %v2020_v21, %v2008_v44  ;;  %v2029_v28 = vshll.u32 %v2021_v22, 15  ;;  %v4513_v21 = vld [vmem:[#allocation21_spill] sm:$0xff] }
 0x215   :  { %v2033_v58 = vshrl.u32 %v2021_v22, 17  ;;  %v2273_v26 = vshll.u32 %v2265_v33, 29  ;;  %v2274_v24 = vshll.u32 %v2266_v10, 29  ;;  %v2275_v46 = vshll.u32 %v2267_v45, 29 }
 0x216   :  { %v2277_v40 = vshrl.u32 %v2265_v33, 3  ;;  %v2276_v14 = vshll.u32 %v2268_v15, 29  ;;  %v2278_v41 = vshrl.u32 %v2266_v10, 3  ;;  %v2279_v4 = vshrl.u32 %v2267_v45, 3 }
 0x217   :  { %v2280_v53 = vshrl.u32 %v2268_v15, 3  ;;  %v2030_v17 = vshll.u32 %v2022_v62, 15  ;;  %v2031_v59 = vshll.u32 %v2023_v0, 15  ;;  %v2269_v25 = vadd.s32 %v2265_v33, %v3983_v57 }
 0x218   :  { %v2270_v6 = vadd.s32 %v2266_v10, %v3985_v12  ;;  %v2032_v1 = vshll.u32 %v2024_v37, 15  ;;  %v2034_v13 = vshrl.u32 %v2022_v62, 17  ;;  %v2035_v8 = vshrl.u32 %v2023_v0, 17 }
 0x219   :  { %v2036_v50 = vshrl.u32 %v2024_v37, 17  ;;  %v2025_v38 = vadd.s32 %v2021_v22, %v2005_v32  ;;  %v2037_v52 = vor.u32 %v2033_v58, %v2029_v28  ;;  %v2271_v49 = vadd.s32 %v2267_v45, %v2251_v23 }
 0x21a   :  { %v2281_v20 = vor.u32 %v2277_v40, %v2273_v26  ;;  %v2272_v5 = vadd.s32 %v2268_v15, %v2252_v39  ;;  %v2282_v36 = vor.u32 %v2278_v41, %v2274_v24  ;;  %v2283_v2 = vor.u32 %v2279_v4, %v2275_v46 }
 0x21b   :  { %v2284_v43 = vor.u32 %v2280_v53, %v2276_v14  ;;  %v3255_v31 = vsel %vm1633_vm8, 1.0, %v4494_v42  ;;  %v3256_v57 = vsel %vm1634_vm9, 1.0, %v4494_v42  ;;  %v2026_v12 = vadd.s32 %v2022_v62, %v2006_v30 }
 0x21c   :  { %v4030_v9 = vadd.s32 %v2023_v0, %v2007_v63  ;;  %v4032_v32 = vadd.s32 %v2024_v37, %v2008_v44  ;;  %v2038_v23 = vor.u32 %v2034_v13, %v2030_v17  ;;  %v2039_v39 = vor.u32 %v2035_v8, %v2031_v59 }
 0x21d   :  { %v2040_v16 = vor.u32 %v2036_v50, %v2032_v1  ;;  %v1627_v29 = vadd.f32 %v3253_v61, %v4512_v18  ;;  %v1628_v22 = vadd.f32 %v3254_v48, %v4513_v21  ;;  %v2285_v33 = vxor.u32 %v2281_v20, %v2269_v25 }
 0x21e   :  { %v2041_v10 = vxor.u32 %v2037_v52, %v2025_v38  ;;  %v2286_v45 = vxor.u32 %v2282_v36, %v2270_v6  ;;  %v2287_v7 = vxor.u32 %v2283_v2, %v2271_v49  ;;  %v2288_v54 = vxor.u32 %v2284_v43, %v2272_v5 }
 0x21f   :  { %v3257_v30 = vsel %vm1635_vm10, 1.0, %v4494_v42  ;;  %v3258_v63 = vsel %vm1636_vm11, 1.0, %v4494_v42  ;;  %v4044_v44 = vadd.f32 %v3255_v31, %v1625_v47  ;;  %v4046_v61 = vadd.f32 %v3256_v57, %v1626_v34 }
 0x220   :  { %v2042_v48 = vxor.u32 %v2038_v23, %v2026_v12  ;;  %v2043_v15 = vxor.u32 %v2039_v39, %v4030_v9  ;;  %v2044_v62 = vxor.u32 %v2040_v16, %v4032_v32  ;;  %v4050_v0 = vadd.s32 %v2041_v10, %v2025_v38 }
 0x221   :  { %4514 = vst [vmem:[#allocation18_spill] sm:$0xff] %v4044_v44  ;;  %v2289_v37 = vadd.s32 %v2285_v33, %v2269_v25  ;;  %v2290_v28 = vadd.s32 %v2286_v45, %v2270_v6  ;;  %v2291_v58 = vadd.s32 %v2287_v7, %v2271_v49  ;;  %v2293_v26 = vshll.u32 %v2285_v33, 16 }
 0x222   :  { %4515 = vst [vmem:[#allocation19_spill] sm:$0xff] %v4046_v61  ;;  %v2294_v24 = vshll.u32 %v2286_v45, 16  ;;  %v2295_v46 = vshll.u32 %v2287_v7, 16  ;;  %v2296_v40 = vshll.u32 %v2288_v54, 16  ;;  %v2297_v14 = vshrl.u32 %v2285_v33, 16 }
 0x223   :  { %v2292_v41 = vadd.s32 %v2288_v54, %v2272_v5  ;;  %v2298_v47 = vshrl.u32 %v2286_v45, 16  ;;  %v2299_v4 = vshrl.u32 %v2287_v7, 16  ;;  %v2300_v34 = vshrl.u32 %v2288_v54, 16 }
 0x224   :  { %v4052_v53 = vadd.s32 %v2042_v48, %v2026_v12  ;;  %v2049_v17 = vshll.u32 %v2041_v10, 26  ;;  %v2053_v59 = vshrl.u32 %v2041_v10, 6  ;;  %v2301_v1 = vor.u32 %v2297_v14, %v2293_v26 }
 0x225   :  { %v2050_v13 = vshll.u32 %v2042_v48, 26  ;;  %v2302_v8 = vor.u32 %v2298_v47, %v2294_v24  ;;  %v2303_v50 = vor.u32 %v2299_v4, %v2295_v46  ;;  %v2304_v25 = vor.u32 %v2300_v34, %v2296_v40 }
 0x226   :  { %v2051_v6 = vshll.u32 %v2043_v15, 26  ;;  %v2052_v38 = vshll.u32 %v2044_v62, 26  ;;  %v2054_v52 = vshrl.u32 %v2042_v48, 6  ;;  %v2305_v49 = vxor.u32 %v2301_v1, %v2289_v37 }
 0x227   :  { %v2055_v20 = vshrl.u32 %v2043_v15, 6  ;;  %v2306_v36 = vxor.u32 %v2302_v8, %v2290_v28  ;;  %v2307_v2 = vxor.u32 %v2303_v50, %v2291_v58  ;;  %v2308_v5 = vxor.u32 %v2304_v25, %v2292_v41 }
 0x228   :  { %v2056_v43 = vshrl.u32 %v2044_v62, 6  ;;  %v2057_v31 = vor.u32 %v2053_v59, %v2049_v17  ;;  %v2313_v57 = vshll.u32 %v2305_v49, 24  ;;  %v2317_v12 = vshrl.u32 %v2305_v49, 8 }
 0x229   :  { %v2309_v23 = vadd.s32 %v2305_v49, %v2289_v37  ;;  %v2310_v39 = vadd.s32 %v2306_v36, %v2290_v28  ;;  %v2311_v16 = vadd.s32 %v2307_v2, %v2291_v58  ;;  %v2314_v18 = vshll.u32 %v2306_v36, 24 }
 0x22a   :  { %v2315_v21 = vshll.u32 %v2307_v2, 24  ;;  %v2316_v33 = vshll.u32 %v2308_v5, 24  ;;  %v2318_v10 = vshrl.u32 %v2306_v36, 8  ;;  %v2319_v45 = vshrl.u32 %v2307_v2, 8 }
 0x22b   :  { %v2058_v7 = vor.u32 %v2054_v52, %v2050_v13  ;;  %v2312_v54 = vadd.s32 %v2308_v5, %v2292_v41  ;;  %v2320_v48 = vshrl.u32 %v2308_v5, 8  ;;  %v2321_v26 = vor.u32 %v2317_v12, %v2313_v57 }
 0x22c   :  { %v4054_v24 = vadd.f32 %v3257_v30, %v1627_v29  ;;  %v4056_v46 = vadd.f32 %v3258_v63, %v1628_v22  ;;  %v2322_v40 = vor.u32 %v2318_v10, %v2314_v18  ;;  %v2323_v14 = vor.u32 %v2319_v45, %v2315_v21  ;;  %v4518_v30 = vld [vmem:[#allocation11_spill] sm:$0xff] }
 0x22d   :  { %v2047_v47 = vadd.s32 %v2043_v15, %v4030_v9  ;;  %v2059_v37 = vor.u32 %v2055_v20, %v2051_v6  ;;  %v2324_v28 = vor.u32 %v2320_v48, %v2316_v33  ;;  %v2325_v58 = vxor.u32 %v2321_v26, %v2309_v23 }
 0x22e   :  { %4516 = vst [vmem:[#allocation20_spill] sm:$0xff] %v4054_v24  ;;  %v2048_v4 = vadd.s32 %v2044_v62, %v4032_v32  ;;  %v2060_v34 = vor.u32 %v2056_v43, %v2052_v38  ;;  %v2326_v17 = vxor.u32 %v2322_v40, %v2310_v39  ;;  %v2327_v59 = vxor.u32 %v2323_v14, %v2311_v16 }
 0x22f   :  { %4517 = vst [vmem:[#allocation21_spill] sm:$0xff] %v4056_v46  ;;  %v4061_v41 = vxor.u32 %v2057_v31, %v4050_v0  ;;  %v4064_v29 = vxor.u32 %v2058_v7, %v4052_v53  ;;  %v2328_v22 = vxor.u32 %v2324_v28, %v2312_v54  ;;  %v2333_v63 = vadd.s32 %v2325_v58, %v4518_v30 }
 0x230   :  { %v2329_v1 = vadd.s32 %v2309_v23, %v3418_v35  ;;  %v2330_v9 = vadd.s32 %v2310_v39, %v3418_v35  ;;  %v2334_v15 = vadd.s32 %v2326_v17, %v4518_v30  ;;  %v2335_v32 = vadd.s32 %v2327_v59, %v4518_v30 }
 0x231   :  { %v4071_v62 = vxor.u32 %v2059_v37, %v2047_v47  ;;  %v2331_v13 = vadd.s32 %v2311_v16, %v3418_v35  ;;  %v2336_v8 = vadd.s32 %v2328_v22, %v4518_v30  ;;  %v2337_v50 = vadd.s32 2, %v2333_v63 }
 0x232   :  { %v4075_v25 = vxor.u32 %v2060_v34, %v2048_v4  ;;  %v2332_v6 = vadd.s32 %v2312_v54, %v3418_v35  ;;  %v2338_v38 = vadd.s32 2, %v2334_v15  ;;  %v2339_v52 = vadd.s32 2, %v2335_v32 }
 0x233   :  { %v4080_v49 = vadd.s32 %v4061_v41, %v4050_v0  ;;  %v2340_v20 = vadd.s32 2, %v2336_v8  ;;  %v2345_v36 = vshll.u32 %v2337_v50, 13  ;;  %v2349_v2 = vshrl.u32 %v2337_v50, 19 }
 0x234   :  { %v2341_v5 = vadd.s32 %v2337_v50, %v2329_v1  ;;  %v2342_v43 = vadd.s32 %v2338_v38, %v2330_v9  ;;  %v2346_v31 = vshll.u32 %v2338_v38, 13  ;;  %v2347_v57 = vshll.u32 %v2339_v52, 13 }
 0x235   :  { %v2343_v12 = vadd.s32 %v2339_v52, %v2331_v13  ;;  %v2348_v23 = vshll.u32 %v2340_v20, 13  ;;  %v2350_v39 = vshrl.u32 %v2338_v38, 19  ;;  %v2351_v16 = vshrl.u32 %v2339_v52, 19 }
 0x236   :  { %v2069_v18 = vshll.u32 %v4061_v41, 6  ;;  %v2344_v21 = vadd.s32 %v2340_v20, %v2332_v6  ;;  %v2352_v33 = vshrl.u32 %v2340_v20, 19  ;;  %v2353_v10 = vor.u32 %v2349_v2, %v2345_v36 }
 0x237   :  { %v4085_v0 = vadd.s32 %v4064_v29, %v4052_v53  ;;  %v2073_v45 = vshrl.u32 %v4061_v41, 26  ;;  %v2354_v7 = vor.u32 %v2350_v39, %v2346_v31  ;;  %v2355_v54 = vor.u32 %v2351_v16, %v2347_v57 }
 0x238   :  { %v4089_v48 = vadd.s32 %v4071_v62, %v2047_v47  ;;  %v2070_v26 = vshll.u32 %v4064_v29, 6  ;;  %v2356_v40 = vor.u32 %v2352_v33, %v2348_v23  ;;  %v2357_v14 = vxor.u32 %v2353_v10, %v2341_v5 }
 0x239   :  { %v4093_v37 = vadd.s32 %v4075_v25, %v2048_v4  ;;  %v2071_v28 = vshll.u32 %v4071_v62, 6  ;;  %v2358_v58 = vxor.u32 %v2354_v7, %v2342_v43  ;;  %v2359_v34 = vxor.u32 %v2355_v54, %v2343_v12 }
 0x23a   :  { %v2074_v53 = vshrl.u32 %v4064_v29, 26  ;;  %v2360_v17 = vxor.u32 %v2356_v40, %v2344_v21  ;;  %v2365_v59 = vshll.u32 %v2357_v14, 15  ;;  %v2369_v41 = vshrl.u32 %v2357_v14, 17 }
 0x23b   :  { %v2361_v22 = vadd.s32 %v2357_v14, %v2341_v5  ;;  %v2362_v63 = vadd.s32 %v2358_v58, %v2342_v43  ;;  %v2366_v47 = vshll.u32 %v2358_v58, 15  ;;  %v2367_v1 = vshll.u32 %v2359_v34, 15 }
 0x23c   :  { %v2363_v9 = vadd.s32 %v2359_v34, %v2343_v12  ;;  %v2368_v15 = vshll.u32 %v2360_v17, 15  ;;  %v2370_v32 = vshrl.u32 %v2358_v58, 17  ;;  %v2371_v13 = vshrl.u32 %v2359_v34, 17 }
 0x23d   :  { %v2075_v4 = vshrl.u32 %v4071_v62, 26  ;;  %v2364_v8 = vadd.s32 %v2360_v17, %v2344_v21  ;;  %v2372_v50 = vshrl.u32 %v2360_v17, 17  ;;  %v2373_v6 = vor.u32 %v2369_v41, %v2365_v59 }
 0x23e   :  { %v2072_v38 = vshll.u32 %v4075_v25, 6  ;;  %v2076_v29 = vshrl.u32 %v4075_v25, 26  ;;  %v2374_v52 = vor.u32 %v2370_v32, %v2366_v47  ;;  %v2375_v20 = vor.u32 %v2371_v13, %v2367_v1 }
 0x23f   :  { %v2077_v36 = vor.u32 %v2073_v45, %v2069_v18  ;;  %v2085_v2 = vadd.s32 %v4080_v49, %v3418_v35  ;;  %v2376_v5 = vor.u32 %v2372_v50, %v2368_v15  ;;  %v2377_v43 = vxor.u32 %v2373_v6, %v2361_v22 }
 0x240   :  { %v2078_v31 = vor.u32 %v2074_v53, %v2070_v26  ;;  %v2086_v57 = vadd.s32 %v4085_v0, %v3418_v35  ;;  %v2378_v62 = vxor.u32 %v2374_v52, %v2362_v63  ;;  %v2379_v12 = vxor.u32 %v2375_v20, %v2363_v9 }
 0x241   :  { %v2079_v23 = vor.u32 %v2075_v4, %v2071_v28  ;;  %v2380_v39 = vxor.u32 %v2376_v5, %v2364_v8  ;;  %v2385_v16 = vshll.u32 %v2377_v43, 26  ;;  %v2389_v21 = vshrl.u32 %v2377_v43, 6 }
 0x242   :  { %v2381_v33 = vadd.s32 %v2377_v43, %v2361_v22  ;;  %v2382_v25 = vadd.s32 %v2378_v62, %v2362_v63  ;;  %v2386_v10 = vshll.u32 %v2378_v62, 26  ;;  %v2387_v7 = vshll.u32 %v2379_v12, 26 }
 0x243   :  { %v2383_v18 = vadd.s32 %v2379_v12, %v2363_v9  ;;  %v2388_v45 = vshll.u32 %v2380_v39, 26  ;;  %v2390_v54 = vshrl.u32 %v2378_v62, 6  ;;  %v2391_v40 = vshrl.u32 %v2379_v12, 6 }
 0x244   :  { %v2087_v26 = vadd.s32 %v4089_v48, %v3418_v35  ;;  %v2384_v14 = vadd.s32 %v2380_v39, %v2364_v8  ;;  %v2392_v58 = vshrl.u32 %v2380_v39, 6  ;;  %v2393_v34 = vor.u32 %v2389_v21, %v2385_v16 }
 0x245   :  { %v4106_v53 = vor.u32 %v2076_v29, %v2072_v38  ;;  %v4110_v28 = vadd.s32 %v4093_v37, %v3418_v35  ;;  %v2394_v17 = vor.u32 %v2390_v54, %v2386_v10  ;;  %v2395_v59 = vor.u32 %v2391_v40, %v2387_v7 }
 0x246   :  { %v2081_v41 = vxor.u32 %v2077_v36, %v4080_v49  ;;  %v2097_v22 = vshrl.u32 %v2085_v2, 8  ;;  %v2396_v63 = vor.u32 %v2392_v58, %v2388_v45  ;;  %v2397_v47 = vxor.u32 %v2393_v34, %v2381_v33  ;;  %v4519_v58 = vld [vmem:[#allocation12_spill] sm:$0xff] }
 0x247   :  { %v2082_v1 = vxor.u32 %v2078_v31, %v4085_v0  ;;  %v2098_v9 = vshrl.u32 %v2086_v57, 8  ;;  %v2398_v15 = vxor.u32 %v2394_v17, %v2382_v25  ;;  %v2399_v32 = vxor.u32 %v2395_v59, %v2383_v18  ;;  %v4520_v59 = vld [vmem:[#allocation13_spill] sm:$0xff] }
 0x248   :  { %v2083_v13 = vxor.u32 %v2079_v23, %v4089_v48  ;;  %v2400_v4 = vxor.u32 %v2396_v63, %v2384_v14  ;;  %v2405_v8 = vshll.u32 %v2397_v47, 6  ;;  %v2409_v50 = vshrl.u32 %v2397_v47, 26 }
 0x249   :  { %v2401_v6 = vadd.s32 %v2397_v47, %v2381_v33  ;;  %v2402_v38 = vadd.s32 %v2398_v15, %v2382_v25  ;;  %v2406_v29 = vshll.u32 %v2398_v15, 6  ;;  %v2407_v52 = vshll.u32 %v2399_v32, 6 }
 0x24a   :  { %v2403_v20 = vadd.s32 %v2399_v32, %v2383_v18  ;;  %v2408_v5 = vshll.u32 %v2400_v4, 6  ;;  %v2410_v49 = vshrl.u32 %v2398_v15, 26  ;;  %v2411_v36 = vshrl.u32 %v2399_v32, 26 }
 0x24b   :  { %v2099_v2 = vshrl.u32 %v2087_v26, 8  ;;  %v2404_v43 = vadd.s32 %v2400_v4, %v2384_v14  ;;  %v2412_v62 = vshrl.u32 %v2400_v4, 26  ;;  %v2413_v0 = vor.u32 %v2409_v50, %v2405_v8 }
 0x24c   :  { %v2084_v31 = vxor.u32 %v4106_v53, %v4093_v37  ;;  %v2100_v48 = vshrl.u32 %v4110_v28, 8  ;;  %v2414_v57 = vor.u32 %v2410_v49, %v2406_v29  ;;  %v2415_v12 = vor.u32 %v2411_v36, %v2407_v52  ;;  %v4522_v29 = vld [vmem:[#allocation15_spill] sm:$0xff] }
 0x24d   :  { %v2089_v23 = vadd.s32 %v2081_v41, %v4518_v30  ;;  %v2101_v39 = vcvt.s32.f32 %v2097_v22  ;;  %v2416_v16 = vor.u32 %v2412_v62, %v2408_v5  ;;  %v2417_v21 = vxor.u32 %v2413_v0, %v2401_v6 }
 0x24e   :  { %v4120_v33 = vadd.s32 %v2082_v1, %v4518_v30  ;;  %v2102_v25 = vcvt.s32.f32 %v2098_v9  ;;  %v2418_v10 = vxor.u32 %v2414_v57, %v2402_v38  ;;  %v2419_v7 = vxor.u32 %v2415_v12, %v2403_v20  ;;  %v4521_v1 = vld [vmem:[#allocation14_spill] sm:$0xff] }
 0x24f   :  { %v4123_v18 = vadd.s32 %v2083_v13, %v4518_v30  ;;  %v4125_v45 = vcvt.s32.f32 %v2099_v2  ;;  %v2420_v37 = vxor.u32 %v2416_v16, %v2404_v43  ;;  %v2425_v54 = vadd.s32 1013904242, %v2417_v21 }
 0x250   :  { %v2421_v40 = vadd.s32 %v2401_v6, %v4518_v30  ;;  %v2426_v26 = vadd.s32 1013904242, %v2418_v10  ;;  %v2427_v14 = vadd.s32 1013904242, %v2419_v7  ;;  %v2689_v34 = vadd.s32 1013904247, %v4519_v58 }
 0x251   :  { %v2422_v53 = vadd.s32 %v2402_v38, %v4518_v30  ;;  %v2428_v28 = vadd.s32 1013904242, %v2420_v37  ;;  %v2429_v17 = vadd.s32 3, %v2425_v54  ;;  %v2690_v41 = vadd.s32 1013904247, %v4520_v59 }
 0x252   :  { %v2423_v22 = vadd.s32 %v2403_v20, %v4518_v30  ;;  %v2430_v63 = vadd.s32 3, %v2426_v26  ;;  %v2431_v47 = vadd.s32 3, %v2427_v14  ;;  %v2691_v9 = vadd.s32 1013904247, %v4521_v1 }
 0x253   :  { %v2424_v15 = vadd.s32 %v2404_v43, %v4518_v30  ;;  %v2432_v32 = vadd.s32 3, %v2428_v28  ;;  %v2437_v13 = vshll.u32 %v2429_v17, 17  ;;  %v2441_v4 = vshrl.u32 %v2429_v17, 15 }
 0x254   :  { %v2433_v8 = vadd.s32 %v2429_v17, %v2421_v40  ;;  %v2438_v50 = vshll.u32 %v2430_v63, 17  ;;  %v2439_v6 = vshll.u32 %v2431_v47, 17  ;;  %v2692_v38 = vadd.s32 1013904247, %v4522_v29 }
 0x255   :  { %v2434_v52 = vadd.s32 %v2430_v63, %v2422_v53  ;;  %v2440_v5 = vshll.u32 %v2432_v32, 17  ;;  %v2442_v49 = vshrl.u32 %v2430_v63, 15  ;;  %v2443_v36 = vshrl.u32 %v2431_v47, 15 }
 0x256   :  { %v2444_v2 = vshrl.u32 %v2432_v32, 15  ;;  %v2445_v20 = vor.u32 %v2441_v4, %v2437_v13  ;;  %v2693_v62 = vxor.u32 3731810189, %v2689_v34  ;;  %v2694_v0 = vxor.u32 3731810189, %v2690_v41 }
 0x257   :  { %v2435_v57 = vadd.s32 %v2431_v47, %v2423_v22  ;;  %v2436_v12 = vadd.s32 %v2432_v32, %v2424_v15  ;;  %v2446_v16 = vor.u32 %v2442_v49, %v2438_v50  ;;  %v2447_v43 = vor.u32 %v2443_v36, %v2439_v6 }
 0x258   :  { %v2092_v21 = vadd.s32 %v2084_v31, %v4518_v30  ;;  %v2104_v10 = vcvt.s32.f32 %v2100_v48  ;;  %v2448_v7 = vor.u32 %v2444_v2, %v2440_v5  ;;  %v2449_v37 = vxor.u32 %v2445_v20, %v2433_v8 }
 0x259   :  { %v4136_v54 = vadd.s32 5, %v2089_v23  ;;  %v2450_v40 = vxor.u32 %v2446_v16, %v2434_v52  ;;  %v2695_v26 = vxor.u32 3731810189, %v2691_v9  ;;  %v2696_v14 = vxor.u32 3731810189, %v2692_v38 }
 0x25a   :  { %v2701_v58 = vshll.u32 %v2693_v62, 15  ;;  %v2702_v53 = vshll.u32 %v2694_v0, 15  ;;  %v2705_v28 = vshrl.u32 %v2693_v62, 17  ;;  %v2706_v17 = vshrl.u32 %v2694_v0, 17 }
 0x25b   :  { %v2105_v59 = vadd.f32 1.0, %v2101_v39  ;;  %v2106_v63 = vadd.f32 1.0, %v2102_v25  ;;  %v2451_v22 = vxor.u32 %v2447_v43, %v2435_v57  ;;  %v2452_v47 = vxor.u32 %v2448_v7, %v2436_v12 }
 0x25c   :  { %v2457_v1 = vshll.u32 %v2449_v37, 29  ;;  %v2458_v15 = vshll.u32 %v2450_v40, 29  ;;  %v2461_v32 = vshrl.u32 %v2449_v37, 3  ;;  %v2462_v31 = vshrl.u32 %v2450_v40, 3 }
 0x25d   :  { %v2703_v48 = vshll.u32 %v2695_v26, 15  ;;  %v2704_v13 = vshll.u32 %v2696_v14, 15  ;;  %v2707_v4 = vshrl.u32 %v2695_v26, 17  ;;  %v2708_v23 = vshrl.u32 %v2696_v14, 17 }
 0x25e   :  { %v2697_v50 = vadd.s32 %v2693_v62, %v2689_v34  ;;  %v2698_v6 = vadd.s32 %v2694_v0, %v2690_v41  ;;  %v2709_v29 = vor.u32 %v2705_v28, %v2701_v58  ;;  %v2710_v5 = vor.u32 %v2706_v17, %v2702_v53 }
 0x25f   :  { %v2459_v49 = vshll.u32 %v2451_v22, 29  ;;  %v2460_v36 = vshll.u32 %v2452_v47, 29  ;;  %v2463_v2 = vshrl.u32 %v2451_v22, 3  ;;  %v2464_v20 = vshrl.u32 %v2452_v47, 3 }
 0x260   :  { %v2453_v39 = vadd.s32 %v2449_v37, %v2433_v8  ;;  %v2454_v25 = vadd.s32 %v2450_v40, %v2434_v52  ;;  %v2465_v16 = vor.u32 %v2461_v32, %v2457_v1  ;;  %v2466_v43 = vor.u32 %v2462_v31, %v2458_v15 }
 0x261   :  { %v2699_v7 = vadd.s32 %v2695_v26, %v2691_v9  ;;  %v2700_v30 = vadd.s32 %v2696_v14, %v2692_v38  ;;  %v2711_v46 = vor.u32 %v2707_v4, %v2703_v48  ;;  %v2712_v24 = vor.u32 %v2708_v23, %v2704_v13 }
 0x262   :  { %v4139_v61 = vadd.s32 5, %v4120_v33  ;;  %v4142_v34 = vadd.s32 5, %v4123_v18  ;;  %v2713_v41 = vxor.u32 %v2709_v29, %v2697_v50  ;;  %v2714_v62 = vxor.u32 %v2710_v5, %v2698_v6 }
 0x263   :  { %v2455_v0 = vadd.s32 %v2451_v22, %v2435_v57  ;;  %v2456_v58 = vadd.s32 %v2452_v47, %v2436_v12  ;;  %v2467_v53 = vor.u32 %v2463_v2, %v2459_v49  ;;  %v2468_v28 = vor.u32 %v2464_v20, %v2460_v36 }
 0x264   :  { %v2107_v8 = vadd.f32 1.0, %v4125_v45  ;;  %v2108_v52 = vadd.f32 1.0, %v2104_v10  ;;  %v2469_v37 = vxor.u32 %v2465_v16, %v2453_v39  ;;  %v2470_v9 = vxor.u32 %v2466_v43, %v2454_v25 }
 0x265   :  { %v4145_v38 = vadd.s32 5, %v2092_v21  ;;  %v2109_v40 = vmul.f32 5.9604645e-08, %v2105_v59  ;;  %v2715_v26 = vxor.u32 %v2711_v46, %v2699_v7  ;;  %v2716_v33 = vxor.u32 %v2712_v24, %v2700_v30 }
 0x266   :  { %v2721_v14 = vshll.u32 %v2713_v41, 26  ;;  %v2722_v17 = vshll.u32 %v2714_v62, 26  ;;  %v2725_v18 = vshrl.u32 %v2713_v41, 6  ;;  %v2726_v1 = vshrl.u32 %v2714_v62, 6 }
 0x267   :  { %v2110_v15 = vmul.f32 5.9604645e-08, %v2106_v63  ;;  %v2113_v57 = vshrl.u32 %v4136_v54, 8  ;;  %v2471_v12 = vxor.u32 %v2467_v53, %v2455_v0  ;;  %v2472_v22 = vxor.u32 %v2468_v28, %v2456_v58 }
 0x268   :  { %v2477_v47 = vshll.u32 %v2469_v37, 16  ;;  %v2478_v32 = vshll.u32 %v2470_v9, 16  ;;  %v2481_v45 = vshrl.u32 %v2469_v37, 16  ;;  %v2482_v10 = vshrl.u32 %v2470_v9, 16 }
 0x269   :  { %v2723_v31 = vshll.u32 %v2715_v26, 26  ;;  %v2724_v48 = vshll.u32 %v2716_v33, 26  ;;  %v2727_v21 = vshrl.u32 %v2715_v26, 6  ;;  %v2728_v13 = vshrl.u32 %v2716_v33, 6 }
 0x26a   :  { %v2717_v59 = vadd.s32 %v2713_v41, %v2697_v50  ;;  %v2718_v46 = vadd.s32 %v2714_v62, %v2698_v6  ;;  %v2729_v24 = vor.u32 %v2725_v18, %v2721_v14  ;;  %v2730_v4 = vor.u32 %v2726_v1, %v2722_v17 }
 0x26b   :  { %v2479_v23 = vshll.u32 %v2471_v12, 16  ;;  %v2480_v29 = vshll.u32 %v2472_v22, 16  ;;  %v2483_v5 = vshrl.u32 %v2471_v12, 16  ;;  %v2484_v63 = vshrl.u32 %v2472_v22, 16 }
 0x26c   :  { %v2473_v49 = vadd.s32 %v2469_v37, %v2453_v39  ;;  %v2474_v54 = vadd.s32 %v2470_v9, %v2454_v25  ;;  %v2485_v36 = vor.u32 %v2481_v45, %v2477_v47  ;;  %v2486_v2 = vor.u32 %v2482_v10, %v2478_v32 }
 0x26d   :  { %v2719_v20 = vadd.s32 %v2715_v26, %v2699_v7  ;;  %v2720_v16 = vadd.s32 %v2716_v33, %v2700_v30  ;;  %v2731_v43 = vor.u32 %v2727_v21, %v2723_v31  ;;  %v2732_v53 = vor.u32 %v2728_v13, %v2724_v48 }
 0x26e   :  { %v2111_v28 = vmul.f32 5.9604645e-08, %v2107_v8  ;;  %v2112_v44 = vmul.f32 5.9604645e-08, %v2108_v52  ;;  %v2733_v19 = vxor.u32 %v2729_v24, %v2717_v59  ;;  %v2734_v11 = vxor.u32 %v2730_v4, %v2718_v46 }
 0x26f   :  { %v2475_v50 = vadd.s32 %v2471_v12, %v2455_v0  ;;  %v2476_v6 = vadd.s32 %v2472_v22, %v2456_v58  ;;  %v2487_v41 = vor.u32 %v2483_v5, %v2479_v23  ;;  %v2488_v62 = vor.u32 %v2484_v63, %v2480_v29 }
 0x270   :  { %v2114_v14 = vshrl.u32 %v4139_v61, 8  ;;  %v2115_v17 = vshrl.u32 %v4142_v34, 8  ;;  %v2489_v39 = vxor.u32 %v2485_v36, %v2473_v49  ;;  %v2490_v25 = vxor.u32 %v2486_v2, %v2474_v54 }
 0x271   :  { %v2116_v37 = vshrl.u32 %v4145_v38, 8  ;;  %v2117_v7 = vcvt.s32.f32 %v2113_v57  ;;  %v2735_v30 = vxor.u32 %v2731_v43, %v2719_v20  ;;  %v2736_v9 = vxor.u32 %v2732_v53, %v2720_v16 }
 0x272   :  { %v2741_v26 = vshll.u32 %v2733_v19, 6  ;;  %v2742_v8 = vshll.u32 %v2734_v11, 6  ;;  %v2745_v52 = vshrl.u32 %v2733_v19, 26  ;;  %v2746_v33 = vshrl.u32 %v2734_v11, 26 }
 0x273   :  { %v4152_v0 = vmul.f32 %v2109_v40, %v3979_v51  ;;  %v4155_v58 = vmul.f32 %v2110_v15, %v3990_v27  ;;  %v2491_v61 = vxor.u32 %v2487_v41, %v2475_v50  ;;  %v2492_v18 = vxor.u32 %v2488_v62, %v2476_v6 }
 0x274   :  { %v2497_v34 = vshll.u32 %v2489_v39, 24  ;;  %v2498_v1 = vshll.u32 %v2490_v25, 24  ;;  %v2501_v12 = vshrl.u32 %v2489_v39, 8  ;;  %v2502_v22 = vshrl.u32 %v2490_v25, 8 }
 0x275   :  { %v2743_v38 = vshll.u32 %v2735_v30, 6  ;;  %v2744_v57 = vshll.u32 %v2736_v9, 6  ;;  %v2747_v47 = vshrl.u32 %v2735_v30, 26  ;;  %v2748_v32 = vshrl.u32 %v2736_v9, 26 }
 0x276   :  { %v2737_v45 = vadd.s32 %v2733_v19, %v2717_v59  ;;  %v2738_v10 = vadd.s32 %v2734_v11, %v2718_v46  ;;  %v2749_v31 = vor.u32 %v2745_v52, %v2741_v26  ;;  %v2750_v48 = vor.u32 %v2746_v33, %v2742_v8 }
 0x277   :  { %v2499_v21 = vshll.u32 %v2491_v61, 24  ;;  %v2500_v51 = vshll.u32 %v2492_v18, 24  ;;  %v2503_v40 = vshrl.u32 %v2491_v61, 8  ;;  %v2504_v13 = vshrl.u32 %v2492_v18, 8 }
 0x278   :  { %v2493_v27 = vadd.s32 %v2489_v39, %v2473_v49  ;;  %v2494_v15 = vadd.s32 %v2490_v25, %v2474_v54  ;;  %v2505_v24 = vor.u32 %v2501_v12, %v2497_v34  ;;  %v2506_v4 = vor.u32 %v2502_v22, %v2498_v1 }
 0x279   :  { %v2739_v23 = vadd.s32 %v2735_v30, %v2719_v20  ;;  %v2740_v29 = vadd.s32 %v2736_v9, %v2720_v16  ;;  %v2751_v5 = vor.u32 %v2747_v47, %v2743_v38  ;;  %v2752_v63 = vor.u32 %v2748_v32, %v2744_v57 }
 0x27a   :  { %v2118_v36 = vcvt.s32.f32 %v2114_v14  ;;  %v2119_v2 = vcvt.s32.f32 %v2115_v17  ;;  %v2753_v43 = vxor.u32 %v2749_v31, %v2737_v45  ;;  %v2754_v53 = vxor.u32 %v2750_v48, %v2738_v10  ;;  %v4523_v31 = vld [vmem:[#allocation16_spill] sm:$0xff]  ;;  %v4524_v48 = vld [vmem:[#allocation17_spill] sm:$0xff] }
 0x27b   :  { %v2495_v19 = vadd.s32 %v2491_v61, %v2475_v50  ;;  %v2496_v11 = vadd.s32 %v2492_v18, %v2476_v6  ;;  %v2507_v59 = vor.u32 %v2503_v40, %v2499_v21  ;;  %v2508_v46 = vor.u32 %v2504_v13, %v2500_v51 }
 0x27c   :  { %v2120_v41 = vcvt.s32.f32 %v2116_v37  ;;  %v2121_v62 = vadd.f32 1.0, %v2117_v7  ;;  %v2509_v26 = vxor.u32 %v2505_v24, %v2493_v27  ;;  %v2510_v8 = vxor.u32 %v2506_v4, %v2494_v15 }
 0x27d   :  { %v4158_v49 = vmul.f32 %v2111_v28, %v3993_v56  ;;  %v4161_v54 = vmul.f32 %v2112_v44, %v3996_v60  ;;  %v2755_v20 = vxor.u32 %v2751_v5, %v2739_v23  ;;  %v2756_v16 = vxor.u32 %v2752_v63, %v2740_v29 }
 0x27e   :  { %v2122_v14 = vadd.f32 1.0, %v2118_v36  ;;  %v2123_v17 = vadd.f32 1.0, %v2119_v2  ;;  %vm2133_vm12 = vcmp.gt.f32.partialorder %v4152_v0, %v3502_v55  ;;  %vm2134_vm13 = vcmp.gt.f32.partialorder %v4155_v58, %v3510_v3 }
 0x27f   :  { %v2511_v50 = vxor.u32 %v2507_v59, %v2495_v19  ;;  %v2512_v6 = vxor.u32 %v2508_v46, %v2496_v11  ;;  %v2761_v39 = vadd.s32 %v2753_v43, %v3418_v35  ;;  %v2762_v56 = vadd.s32 %v2754_v53, %v3418_v35 }
 0x280   :  { %v2124_v28 = vadd.f32 1.0, %v2120_v41  ;;  %v2125_v25 = vmul.f32 5.9604645e-08, %v2121_v62  ;;  %v2517_v60 = vadd.s32 %v2509_v26, %v3418_v35  ;;  %v2518_v44 = vadd.s32 %v2510_v8, %v3418_v35 }
 0x281   :  { %v4172_v37 = vsel %vm2133_vm12, 1.0, %v4494_v42  ;;  %v4175_v7 = vsel %vm2134_vm13, 1.0, %v4494_v42  ;;  %v2763_v30 = vadd.s32 %v2755_v20, %v3418_v35  ;;  %v2764_v9 = vadd.s32 %v2756_v16, %v3418_v35 }
 0x282   :  { %v2126_v52 = vmul.f32 5.9604645e-08, %v2122_v14  ;;  %v2127_v33 = vmul.f32 5.9604645e-08, %v2123_v17  ;;  %v2757_v61 = vadd.s32 1013904242, %v2737_v45  ;;  %v2758_v18 = vadd.s32 1013904242, %v2738_v10 }
 0x283   :  { %v2519_v34 = vadd.s32 %v2511_v50, %v3418_v35  ;;  %v2520_v1 = vadd.s32 %v2512_v6, %v3418_v35  ;;  %v2765_v12 = vadd.s32 1, %v2761_v39  ;;  %v2766_v22 = vadd.s32 1, %v2762_v56 }
 0x284   :  { %v2128_v38 = vmul.f32 5.9604645e-08, %v2124_v28  ;;  %v4182_v57 = vmul.f32 %v4152_v0, %v2125_v25  ;;  %v2521_v47 = vadd.s32 4, %v2517_v60  ;;  %v2522_v32 = vadd.s32 4, %v2518_v44 }
 0x285   :  { %vm2135_vm14 = vcmp.gt.f32.partialorder %v4158_v49, %v4523_v31  ;;  %vm2136_vm15 = vcmp.gt.f32.partialorder %v4161_v54, %v4524_v48  ;;  %v2759_v45 = vadd.s32 1013904242, %v2739_v23  ;;  %v2760_v10 = vadd.s32 1013904242, %v2740_v29 }
 0x286   :  { %v2767_v21 = vadd.s32 1, %v2763_v30  ;;  %v2768_v51 = vadd.s32 1, %v2764_v9  ;;  %v2513_v40 = vadd.s32 1013904242, %v2493_v27  ;;  %v2514_v13 = vadd.s32 1013904242, %v2494_v15 }
 0x287   :  { %v4188_v24 = vadd.s32 %v2765_v12, %v2757_v61  ;;  %v4190_v4 = vadd.s32 %v2766_v22, %v2758_v18  ;;  %v2523_v0 = vadd.s32 4, %v2519_v34  ;;  %v2524_v5 = vadd.s32 4, %v2520_v1 }
 0x288   :  { %v2773_v63 = vshll.u32 %v2765_v12, 17  ;;  %v2774_v36 = vshll.u32 %v2766_v22, 17  ;;  %v2529_v2 = vshll.u32 %v2521_v47, 13  ;;  %v2530_v43 = vshll.u32 %v2522_v32, 13 }
 0x289   :  { %v2533_v53 = vshrl.u32 %v2521_v47, 19  ;;  %v2534_v59 = vshrl.u32 %v2522_v32, 19  ;;  %v2775_v46 = vshll.u32 %v2767_v21, 17  ;;  %v2777_v41 = vshrl.u32 %v2765_v12, 15 }
 0x28a   :  { %v2778_v23 = vshrl.u32 %v2766_v22, 15  ;;  %v2779_v29 = vshrl.u32 %v2767_v21, 15  ;;  %v2515_v62 = vadd.s32 1013904242, %v2495_v19  ;;  %v2516_v26 = vadd.s32 1013904242, %v2496_v11 }
 0x28b   :  { %v2776_v27 = vshll.u32 %v2768_v51, 17  ;;  %v2780_v15 = vshrl.u32 %v2768_v51, 15  ;;  %v2531_v8 = vshll.u32 %v2523_v0, 13  ;;  %v2532_v20 = vshll.u32 %v2524_v5, 13 }
 0x28c   :  { %v2535_v16 = vshrl.u32 %v2523_v0, 19  ;;  %v2536_v14 = vshrl.u32 %v2524_v5, 19  ;;  %v2525_v17 = vadd.s32 %v2521_v47, %v2513_v40  ;;  %v2526_v50 = vadd.s32 %v2522_v32, %v2514_v13 }
 0x28d   :  { %v2537_v6 = vor.u32 %v2533_v53, %v2529_v2  ;;  %v2538_v39 = vor.u32 %v2534_v59, %v2530_v43  ;;  %v2771_v56 = vadd.s32 %v2767_v21, %v2759_v45  ;;  %v2781_v28 = vor.u32 %v2777_v41, %v2773_v63 }
 0x28e   :  { %v2782_v25 = vor.u32 %v2778_v23, %v2774_v36  ;;  %v2783_v60 = vor.u32 %v2779_v29, %v2775_v46  ;;  %v4193_v44 = vmul.f32 %v4155_v58, %v2126_v52  ;;  %v4196_v19 = vmul.f32 %v4158_v49, %v2127_v33  ;;  %v4525_v33 = vld [vmem:[#allocation18_spill] sm:$0xff] }
 0x28f   :  { %v2772_v11 = vadd.s32 %v2768_v51, %v2760_v10  ;;  %v2784_v30 = vor.u32 %v2780_v15, %v2776_v27  ;;  %v2527_v9 = vadd.s32 %v2523_v0, %v2515_v62  ;;  %v2528_v61 = vadd.s32 %v2524_v5, %v2516_v26  ;;  %v4526_v10 = vld [vmem:[#allocation19_spill] sm:$0xff] }
 0x290   :  { %v2539_v18 = vor.u32 %v2535_v16, %v2531_v8  ;;  %v2540_v34 = vor.u32 %v2536_v14, %v2532_v20  ;;  %v3261_v1 = vsel %vm2135_vm14, 1.0, %v4494_v42  ;;  %v3262_v58 = vsel %vm2136_vm15, 1.0, %v4494_v42 }
 0x291   :  { %v2541_v52 = vxor.u32 %v2537_v6, %v2525_v17  ;;  %v2542_v12 = vxor.u32 %v2538_v39, %v2526_v50  ;;  %v4208_v22 = vadd.f32 %v4172_v37, %v4525_v33  ;;  %v2785_v47 = vxor.u32 %v2781_v28, %v4188_v24  ;;  %v4527_v33 = vld [vmem:[#allocation20_spill] sm:$0xff] }
 0x292   :  { %v2786_v32 = vxor.u32 %v2782_v25, %v4190_v4  ;;  %v2787_v45 = vxor.u32 %v2783_v60, %v2771_v56  ;;  %v4214_v49 = vadd.f32 %v4175_v7, %v4526_v10  ;;  %v4217_v21 = vmul.f32 %v4161_v54, %v2128_v38 }
 0x293   :  { %vm2153_vm0 = vcmp.gt.f32.partialorder %v4182_v57, %v3502_v55  ;;  %v2788_v51 = vxor.u32 %v2784_v30, %v2772_v11  ;;  %vm2154_vm1 = vcmp.gt.f32.partialorder %v4193_v44, %v3510_v3  ;;  %vm2155_vm2 = vcmp.gt.f32.partialorder %v4196_v19, %v4523_v31 }
 0x294   :  { %v2543_v37 = vxor.u32 %v2539_v18, %v2527_v9  ;;  %v2544_v40 = vxor.u32 %v2540_v34, %v2528_v61  ;;  %v2549_v13 = vshll.u32 %v2541_v52, 15  ;;  %v2550_v0 = vshll.u32 %v2542_v12, 15 }
 0x295   :  { %v2553_v5 = vshrl.u32 %v2541_v52, 17  ;;  %v2554_v7 = vshrl.u32 %v2542_v12, 17  ;;  %v2793_v63 = vshll.u32 %v2785_v47, 29  ;;  %v2794_v36 = vshll.u32 %v2786_v32, 29 }
 0x296   :  { %v2795_v54 = vshll.u32 %v2787_v45, 29  ;;  %v2797_v38 = vshrl.u32 %v2785_v47, 3  ;;  %v2796_v2 = vshll.u32 %v2788_v51, 29  ;;  %v2798_v43 = vshrl.u32 %v2786_v32, 3 }
 0x297   :  { %v2799_v53 = vshrl.u32 %v2787_v45, 3  ;;  %v2800_v59 = vshrl.u32 %v2788_v51, 3  ;;  %v2551_v46 = vshll.u32 %v2543_v37, 15  ;;  %v2552_v41 = vshll.u32 %v2544_v40, 15 }
 0x298   :  { %v2555_v23 = vshrl.u32 %v2543_v37, 17  ;;  %v2556_v29 = vshrl.u32 %v2544_v40, 17  ;;  %v2545_v62 = vadd.s32 %v2541_v52, %v2525_v17  ;;  %v2546_v26 = vadd.s32 %v2542_v12, %v2526_v50  ;;  %v4528_v50 = vld [vmem:[#allocation21_spill] sm:$0xff] }
 0x299   :  { %v2557_v27 = vor.u32 %v2553_v5, %v2549_v13  ;;  %v2558_v15 = vor.u32 %v2554_v7, %v2550_v0  ;;  %v2789_v8 = vadd.s32 %v2785_v47, %v4188_v24  ;;  %v2790_v20 = vadd.s32 %v2786_v32, %v4190_v4 }
 0x29a   :  { %v2791_v16 = vadd.s32 %v2787_v45, %v2771_v56  ;;  %v2801_v14 = vor.u32 %v2797_v38, %v2793_v63  ;;  %v2792_v6 = vadd.s32 %v2788_v51, %v2772_v11  ;;  %v2802_v39 = vor.u32 %v2798_v43, %v2794_v36 }
 0x29b   :  { %v2803_v28 = vor.u32 %v2799_v53, %v2795_v54  ;;  %v2804_v25 = vor.u32 %v2800_v59, %v2796_v2  ;;  %v2547_v60 = vadd.s32 %v2543_v37, %v2527_v9  ;;  %v2548_v30 = vadd.s32 %v2544_v40, %v2528_v61 }
 0x29c   :  { %v2559_v18 = vor.u32 %v2555_v23, %v2551_v46  ;;  %v2560_v34 = vor.u32 %v2556_v29, %v2552_v41  ;;  %v4228_v10 = vadd.f32 %v3261_v1, %v4527_v33  ;;  %vm2156_vm3 = vcmp.gt.f32.partialorder %v4217_v21, %v4524_v48 }
 0x29d   :  { %v2561_v17 = vxor.u32 %v2557_v27, %v2545_v62  ;;  %v2562_v24 = vxor.u32 %v2558_v15, %v2546_v26  ;;  %v4233_v4 = vadd.f32 %v3262_v58, %v4528_v50  ;;  %v3263_v56 = vsel %vm2153_vm0, 1.0, %v4494_v42 }
 0x29e   :  { %v3264_v11 = vsel %vm2154_vm1, 1.0, %v4494_v42  ;;  %v2805_v9 = vxor.u32 %v2801_v14, %v2789_v8  ;;  %v3265_v61 = vsel %vm2155_vm2, 1.0, %v4494_v42  ;;  %v2806_v1 = vxor.u32 %v2802_v39, %v2790_v20 }
 0x29f   :  { %v2807_v52 = vxor.u32 %v2803_v28, %v2791_v16  ;;  %v2808_v58 = vxor.u32 %v2804_v25, %v2792_v6  ;;  %v3266_v12 = vsel %vm2156_vm3, 1.0, %v4494_v42  ;;  %v2563_v47 = vxor.u32 %v2559_v18, %v2547_v60 }
 0x2a0   :  { %v2564_v32 = vxor.u32 %v2560_v34, %v2548_v30  ;;  %v4248_v45 = vadd.s32 %v2561_v17, %v2545_v62  ;;  %v4250_v51 = vadd.s32 %v2562_v24, %v2546_v26  ;;  %v2569_v37 = vshll.u32 %v2561_v17, 26 }
 0x2a1   :  { %v2570_v40 = vshll.u32 %v2562_v24, 26  ;;  %v2573_v13 = vshrl.u32 %v2561_v17, 6  ;;  %v2809_v0 = vadd.s32 %v2805_v9, %v2789_v8  ;;  %v2810_v5 = vadd.s32 %v2806_v1, %v2790_v20 }
 0x2a2   :  { %v2811_v7 = vadd.s32 %v2807_v52, %v2791_v16  ;;  %v2813_v63 = vshll.u32 %v2805_v9, 16  ;;  %v2814_v36 = vshll.u32 %v2806_v1, 16  ;;  %v2815_v54 = vshll.u32 %v2807_v52, 16 }
 0x2a3   :  { %v2816_v38 = vshll.u32 %v2808_v58, 16  ;;  %v2817_v2 = vshrl.u32 %v2805_v9, 16  ;;  %v2812_v43 = vadd.s32 %v2808_v58, %v2792_v6  ;;  %v2818_v53 = vshrl.u32 %v2806_v1, 16 }
 0x2a4   :  { %v2819_v59 = vshrl.u32 %v2807_v52, 16  ;;  %v2820_v46 = vshrl.u32 %v2808_v58, 16  ;;  %v2571_v41 = vshll.u32 %v2563_v47, 26  ;;  %v2574_v23 = vshrl.u32 %v2562_v24, 6 }
 0x2a5   :  { %v2575_v29 = vshrl.u32 %v2563_v47, 6  ;;  %v2821_v62 = vor.u32 %v2817_v2, %v2813_v63  ;;  %v4252_v26 = vadd.s32 %v2563_v47, %v2547_v60  ;;  %v2822_v27 = vor.u32 %v2818_v53, %v2814_v36 }
 0x2a6   :  { %v2823_v15 = vor.u32 %v2819_v59, %v2815_v54  ;;  %v2824_v8 = vor.u32 %v2820_v46, %v2816_v38  ;;  %v4254_v20 = vadd.s32 %v2564_v32, %v2548_v30  ;;  %v2572_v16 = vshll.u32 %v2564_v32, 26 }
 0x2a7   :  { %v2576_v14 = vshrl.u32 %v2564_v32, 6  ;;  %v2825_v39 = vxor.u32 %v2821_v62, %v2809_v0  ;;  %v2577_v28 = vor.u32 %v2573_v13, %v2569_v37  ;;  %v2826_v25 = vxor.u32 %v2822_v27, %v2810_v5 }
 0x2a8   :  { %v2827_v6 = vxor.u32 %v2823_v15, %v2811_v7  ;;  %v2828_v18 = vxor.u32 %v2824_v8, %v2812_v43  ;;  %v2578_v34 = vor.u32 %v2574_v23, %v2570_v40  ;;  %v2579_v33 = vor.u32 %v2575_v29, %v2571_v41 }
 0x2a9   :  { %v2833_v17 = vshll.u32 %v2825_v39, 24  ;;  %v2837_v24 = vshrl.u32 %v2825_v39, 8  ;;  %v2829_v50 = vadd.s32 %v2825_v39, %v2809_v0  ;;  %v2830_v9 = vadd.s32 %v2826_v25, %v2810_v5 }
 0x2aa   :  { %v2831_v60 = vadd.s32 %v2827_v6, %v2811_v7  ;;  %v2834_v1 = vshll.u32 %v2826_v25, 24  ;;  %v2835_v52 = vshll.u32 %v2827_v6, 24  ;;  %v2836_v58 = vshll.u32 %v2828_v18, 24 }
 0x2ab   :  { %v2838_v47 = vshrl.u32 %v2826_v25, 8  ;;  %v2839_v30 = vshrl.u32 %v2827_v6, 8  ;;  %v2580_v63 = vor.u32 %v2576_v14, %v2572_v16  ;;  %v2832_v36 = vadd.s32 %v2828_v18, %v2812_v43 }
 0x2ac   :  { %v2840_v32 = vshrl.u32 %v2828_v18, 8  ;;  %v2841_v54 = vor.u32 %v2837_v24, %v2833_v17  ;;  %v4257_v37 = vadd.f32 %v3263_v56, %v4208_v22  ;;  %v4260_v40 = vadd.f32 %v3264_v11, %v4214_v49 }
 0x2ad   :  { %v2842_v13 = vor.u32 %v2838_v47, %v2834_v1  ;;  %v2843_v38 = vor.u32 %v2839_v30, %v2835_v52  ;;  %v4263_v0 = vadd.f32 %v3265_v61, %v4228_v10  ;;  %v4266_v5 = vadd.f32 %v3266_v12, %v4233_v4  ;;  %v4529_v61 = vld [vmem:[#allocation11_spill] sm:$0xff] }
 0x2ae   :  { %v2844_v7 = vor.u32 %v2840_v32, %v2836_v58  ;;  %v2845_v2 = vxor.u32 %v2841_v54, %v2829_v50  ;;  %v4269_v43 = vxor.u32 %v2577_v28, %v4248_v45  ;;  %v4272_v53 = vxor.u32 %v2578_v34, %v4250_v51 }
 0x2af   :  { %v2846_v22 = vxor.u32 %v2842_v13, %v2830_v9  ;;  %v2847_v56 = vxor.u32 %v2843_v38, %v2831_v60  ;;  %v4275_v49 = vxor.u32 %v2579_v33, %v4252_v26  ;;  %v4278_v11 = vxor.u32 %v2580_v63, %v4254_v20 }
 0x2b0   :  { %v2848_v10 = vxor.u32 %v2844_v7, %v2832_v36  ;;  %v2853_v4 = vadd.s32 %v2845_v2, %v4529_v61  ;;  %v2849_v12 = vadd.s32 %v2829_v50, %v3418_v35  ;;  %v2850_v59 = vadd.s32 %v2830_v9, %v3418_v35 }
 0x2b1   :  { %v2854_v46 = vadd.s32 %v2846_v22, %v4529_v61  ;;  %v2855_v41 = vadd.s32 %v2847_v56, %v4529_v61  ;;  %v4287_v23 = vadd.s32 %v4269_v43, %v4248_v45  ;;  %v2851_v29 = vadd.s32 %v2831_v60, %v3418_v35 }
 0x2b2   :  { %v2856_v62 = vadd.s32 %v2848_v10, %v4529_v61  ;;  %v2857_v27 = vadd.s32 2, %v2853_v4  ;;  %v2589_v15 = vshll.u32 %v4269_v43, 6  ;;  %v2852_v8 = vadd.s32 %v2832_v36, %v3418_v35 }
 0x2b3   :  { %v2858_v16 = vadd.s32 2, %v2854_v46  ;;  %v2859_v14 = vadd.s32 2, %v2855_v41  ;;  %v2593_v39 = vshrl.u32 %v4269_v43, 26  ;;  %v4296_v60 = vadd.s32 %v4272_v53, %v4250_v51 }
 0x2b4   :  { %v2860_v28 = vadd.s32 2, %v2856_v62  ;;  %v2865_v25 = vshll.u32 %v2857_v27, 13  ;;  %v2869_v6 = vshrl.u32 %v2857_v27, 19  ;;  %v2861_v18 = vadd.s32 %v2857_v27, %v2849_v12 }
 0x2b5   :  { %v2862_v34 = vadd.s32 %v2858_v16, %v2850_v59  ;;  %v2866_v45 = vshll.u32 %v2858_v16, 13  ;;  %v2867_v33 = vshll.u32 %v2859_v14, 13  ;;  %v2863_v17 = vadd.s32 %v2859_v14, %v2851_v29 }
 0x2b6   :  { %v2868_v24 = vshll.u32 %v2860_v28, 13  ;;  %v2870_v50 = vshrl.u32 %v2858_v16, 19  ;;  %v2871_v9 = vshrl.u32 %v2859_v14, 19  ;;  %v2864_v1 = vadd.s32 %v2860_v28, %v2852_v8 }
 0x2b7   :  { %v2872_v52 = vshrl.u32 %v2860_v28, 19  ;;  %v2873_v58 = vor.u32 %v2869_v6, %v2865_v25  ;;  %v4300_v47 = vadd.s32 %v4275_v49, %v4252_v26  ;;  %v2590_v30 = vshll.u32 %v4272_v53, 6 }
 0x2b8   :  { %v2874_v63 = vor.u32 %v2870_v50, %v2866_v45  ;;  %v2875_v36 = vor.u32 %v2871_v9, %v2867_v33  ;;  %v4305_v32 = vadd.s32 %v4278_v11, %v4254_v20  ;;  %v2591_v54 = vshll.u32 %v4275_v49, 6 }
 0x2b9   :  { %v2876_v13 = vor.u32 %v2872_v52, %v2868_v24  ;;  %v2877_v51 = vxor.u32 %v2873_v58, %v2861_v18  ;;  %v2592_v38 = vshll.u32 %v4278_v11, 6  ;;  %v2594_v7 = vshrl.u32 %v4272_v53, 26 }
 0x2ba   :  { %v2878_v2 = vxor.u32 %v2874_v63, %v2862_v34  ;;  %v2879_v43 = vxor.u32 %v2875_v36, %v2863_v17  ;;  %v2595_v26 = vshrl.u32 %v4275_v49, 26  ;;  %v2596_v27 = vshrl.u32 %v4278_v11, 26 }
 0x2bb   :  { %v2880_v22 = vxor.u32 %v2876_v13, %v2864_v1  ;;  %v2885_v56 = vshll.u32 %v2877_v51, 15  ;;  %v2889_v10 = vshrl.u32 %v2877_v51, 17  ;;  %v2881_v4 = vadd.s32 %v2877_v51, %v2861_v18 }
 0x2bc   :  { %v2882_v12 = vadd.s32 %v2878_v2, %v2862_v34  ;;  %v2886_v59 = vshll.u32 %v2878_v2, 15  ;;  %v2887_v20 = vshll.u32 %v2879_v43, 15  ;;  %v2883_v46 = vadd.s32 %v2879_v43, %v2863_v17 }
 0x2bd   :  { %v2888_v41 = vshll.u32 %v2880_v22, 15  ;;  %v2890_v29 = vshrl.u32 %v2878_v2, 17  ;;  %v2891_v62 = vshrl.u32 %v2879_v43, 17  ;;  %v2884_v8 = vadd.s32 %v2880_v22, %v2864_v1 }
 0x2be   :  { %v2892_v16 = vshrl.u32 %v2880_v22, 17  ;;  %v2893_v53 = vor.u32 %v2889_v10, %v2885_v56  ;;  %v2597_v14 = vor.u32 %v2593_v39, %v2589_v15  ;;  %v2605_v49 = vadd.s32 %v4287_v23, %v3418_v35 }
 0x2bf   :  { %v2894_v28 = vor.u32 %v2890_v29, %v2886_v59  ;;  %v2895_v25 = vor.u32 %v2891_v62, %v2887_v20  ;;  %v2598_v6 = vor.u32 %v2594_v7, %v2590_v30  ;;  %v2606_v18 = vadd.s32 %v4296_v60, %v3418_v35 }
 0x2c0   :  { %v2896_v34 = vor.u32 %v2892_v16, %v2888_v41  ;;  %v2897_v45 = vxor.u32 %v2893_v53, %v2881_v4  ;;  %v2599_v33 = vor.u32 %v2595_v26, %v2591_v54  ;;  %v2607_v17 = vadd.s32 %v4300_v47, %v3418_v35 }
 0x2c1   :  { %v2898_v11 = vxor.u32 %v2894_v28, %v2882_v12  ;;  %v2899_v24 = vxor.u32 %v2895_v25, %v2883_v46  ;;  %v2608_v15 = vadd.s32 %v4305_v32, %v3418_v35  ;;  %v2600_v54 = vor.u32 %v2596_v27, %v2592_v38 }
 0x2c2   :  { %v2900_v39 = vxor.u32 %v2896_v34, %v2884_v8  ;;  %v2905_v50 = vshll.u32 %v2897_v45, 26  ;;  %v2909_v9 = vshrl.u32 %v2897_v45, 6  ;;  %v2901_v1 = vadd.s32 %v2897_v45, %v2881_v4 }
 0x2c3   :  { %v2902_v52 = vadd.s32 %v2898_v11, %v2882_v12  ;;  %v2906_v58 = vshll.u32 %v2898_v11, 26  ;;  %v2907_v30 = vshll.u32 %v2899_v24, 26  ;;  %v2903_v63 = vadd.s32 %v2899_v24, %v2883_v46 }
 0x2c4   :  { %v2908_v36 = vshll.u32 %v2900_v39, 26  ;;  %v2910_v13 = vshrl.u32 %v2898_v11, 6  ;;  %v2911_v51 = vshrl.u32 %v2899_v24, 6  ;;  %v2904_v7 = vadd.s32 %v2900_v39, %v2884_v8 }
 0x2c5   :  { %v2912_v2 = vshrl.u32 %v2900_v39, 6  ;;  %v2913_v43 = vor.u32 %v2909_v9, %v2905_v50  ;;  %v2601_v26 = vxor.u32 %v2597_v14, %v4287_v23  ;;  %v2617_v22 = vshrl.u32 %v2605_v49, 8 }
 0x2c6   :  { %v2914_v56 = vor.u32 %v2910_v13, %v2906_v58  ;;  %v2915_v10 = vor.u32 %v2911_v51, %v2907_v30  ;;  %v2602_v59 = vxor.u32 %v2598_v6, %v4296_v60  ;;  %v2618_v20 = vshrl.u32 %v2606_v18, 8 }
 0x2c7   :  { %v2916_v4 = vor.u32 %v2912_v2, %v2908_v36  ;;  %v2917_v12 = vxor.u32 %v2913_v43, %v2901_v1  ;;  %v2603_v41 = vxor.u32 %v2599_v33, %v4300_v47  ;;  %v2619_v46 = vshrl.u32 %v2607_v17, 8 }
 0x2c8   :  { %v2918_v29 = vxor.u32 %v2914_v56, %v2902_v52  ;;  %v2919_v62 = vxor.u32 %v2915_v10, %v2903_v63  ;;  %v2620_v16 = vshrl.u32 %v2608_v15, 8  ;;  %v2604_v6 = vxor.u32 %v2600_v54, %v4305_v32 }
 0x2c9   :  { %v2920_v38 = vxor.u32 %v2916_v4, %v2904_v7  ;;  %v2925_v27 = vshll.u32 %v2917_v12, 6  ;;  %v2929_v8 = vshrl.u32 %v2917_v12, 26  ;;  %v2921_v53 = vadd.s32 %v2917_v12, %v2901_v1 }
 0x2ca   :  { %v2922_v28 = vadd.s32 %v2918_v29, %v2902_v52  ;;  %v2926_v23 = vshll.u32 %v2918_v29, 6  ;;  %v2927_v14 = vshll.u32 %v2919_v62, 6  ;;  %v2923_v49 = vadd.s32 %v2919_v62, %v2903_v63 }
 0x2cb   :  { %v2928_v25 = vshll.u32 %v2920_v38, 6  ;;  %v2930_v34 = vshrl.u32 %v2918_v29, 26  ;;  %v2931_v60 = vshrl.u32 %v2919_v62, 26  ;;  %v2924_v18 = vadd.s32 %v2920_v38, %v2904_v7 }
 0x2cc   :  { %v2932_v45 = vshrl.u32 %v2920_v38, 26  ;;  %v2933_v47 = vor.u32 %v2929_v8, %v2925_v27  ;;  %v2609_v33 = vadd.s32 %v2601_v26, %v4529_v61  ;;  %v2621_v17 = vcvt.s32.f32 %v2617_v22 }
 0x2cd   :  { %v2934_v11 = vor.u32 %v2930_v34, %v2926_v23  ;;  %v2935_v24 = vor.u32 %v2931_v60, %v2927_v14  ;;  %v2610_v15 = vadd.s32 %v2602_v59, %v4529_v61  ;;  %v2622_v39 = vcvt.s32.f32 %v2618_v20 }
 0x2ce   :  { %v2936_v50 = vor.u32 %v2932_v45, %v2928_v25  ;;  %v2937_v9 = vxor.u32 %v2933_v47, %v2921_v53  ;;  %v2611_v1 = vadd.s32 %v2603_v41, %v4529_v61  ;;  %v2623_v52 = vcvt.s32.f32 %v2619_v46 }
 0x2cf   :  { %v2938_v58 = vxor.u32 %v2934_v11, %v2922_v28  ;;  %v2939_v30 = vxor.u32 %v2935_v24, %v2923_v49  ;;  %v2612_v32 = vadd.s32 %v2604_v6, %v4529_v61  ;;  %v2624_v63 = vcvt.s32.f32 %v2620_v16 }
 0x2d0   :  { %v2940_v36 = vxor.u32 %v2936_v50, %v2924_v18  ;;  %v2945_v13 = vadd.s32 1013904242, %v2937_v9  ;;  %v2941_v51 = vadd.s32 %v2921_v53, %v4529_v61  ;;  %v2942_v54 = vadd.s32 %v2922_v28, %v4529_v61 }
 0x2d1   :  { %v2946_v7 = vadd.s32 1013904242, %v2938_v58  ;;  %v2947_v2 = vadd.s32 1013904242, %v2939_v30  ;;  %v2613_v43 = vadd.s32 5, %v2609_v33  ;;  %v2943_v26 = vadd.s32 %v2923_v49, %v4529_v61 }
 0x2d2   :  { %v2948_v22 = vadd.s32 1013904242, %v2940_v36  ;;  %v2949_v56 = vadd.s32 3, %v2945_v13  ;;  %v2625_v10 = vadd.f32 1.0, %v2621_v17  ;;  %v2944_v59 = vadd.s32 %v2924_v18, %v4529_v61 }
 0x2d3   :  { %v2950_v20 = vadd.s32 3, %v2946_v7  ;;  %v2951_v4 = vadd.s32 3, %v2947_v2  ;;  %v2626_v12 = vadd.f32 1.0, %v2622_v39  ;;  %v2614_v14 = vadd.s32 5, %v2610_v15 }
 0x2d4   :  { %v2952_v41 = vadd.s32 3, %v2948_v22  ;;  %v2957_v46 = vshll.u32 %v2949_v56, 17  ;;  %v2961_v29 = vshrl.u32 %v2949_v56, 15  ;;  %v2953_v62 = vadd.s32 %v2949_v56, %v2941_v51 }
 0x2d5   :  { %v2954_v16 = vadd.s32 %v2950_v20, %v2942_v54  ;;  %v2958_v38 = vshll.u32 %v2950_v20, 17  ;;  %v2959_v27 = vshll.u32 %v2951_v4, 17  ;;  %v2955_v8 = vadd.s32 %v2951_v4, %v2943_v26 }
 0x2d6   :  { %v2960_v53 = vshll.u32 %v2952_v41, 17  ;;  %v2962_v28 = vshrl.u32 %v2950_v20, 15  ;;  %v2963_v23 = vshrl.u32 %v2951_v4, 15  ;;  %v2956_v49 = vadd.s32 %v2952_v41, %v2944_v59 }
 0x2d7   :  { %v2964_v25 = vshrl.u32 %v2952_v41, 15  ;;  %v2965_v34 = vor.u32 %v2961_v29, %v2957_v46  ;;  %v2615_v60 = vadd.s32 5, %v2611_v1  ;;  %v2627_v6 = vadd.f32 1.0, %v2623_v52 }
 0x2d8   :  { %v2966_v18 = vor.u32 %v2962_v28, %v2958_v38  ;;  %v2967_v45 = vor.u32 %v2963_v23, %v2959_v27  ;;  %v2616_v47 = vadd.s32 5, %v2612_v32  ;;  %v2628_v33 = vadd.f32 1.0, %v2624_v63 }
 0x2d9   :  { %v2968_v17 = vor.u32 %v2964_v25, %v2960_v53  ;;  %v2969_v11 = vxor.u32 %v2965_v34, %v2953_v62  ;;  %v2629_v24 = vmul.f32 5.9604645e-08, %v2625_v10  ;;  %v2630_v39 = vmul.f32 5.9604645e-08, %v2626_v12 }
 0x2da   :  { %v2970_v50 = vxor.u32 %v2966_v18, %v2954_v16  ;;  %v2971_v9 = vxor.u32 %v2967_v45, %v2955_v8  ;;  %v2633_v58 = vshrl.u32 %v2613_v43, 8  ;;  %v2631_v32 = vmul.f32 5.9604645e-08, %v2627_v6 }
 0x2db   :  { %v2972_v30 = vxor.u32 %v2968_v17, %v2956_v49  ;;  %v2977_v36 = vshll.u32 %v2969_v11, 29  ;;  %v2981_v13 = vshrl.u32 %v2969_v11, 3  ;;  %v2973_v15 = vadd.s32 %v2969_v11, %v2953_v62 }
 0x2dc   :  { %v2974_v51 = vadd.s32 %v2970_v50, %v2954_v16  ;;  %v2978_v54 = vshll.u32 %v2970_v50, 29  ;;  %v2979_v7 = vshll.u32 %v2971_v9, 29  ;;  %v2975_v1 = vadd.s32 %v2971_v9, %v2955_v8 }
 0x2dd   :  { %v2980_v52 = vshll.u32 %v2972_v30, 29  ;;  %v2982_v2 = vshrl.u32 %v2970_v50, 3  ;;  %v2983_v26 = vshrl.u32 %v2971_v9, 3  ;;  %v2976_v63 = vadd.s32 %v2972_v30, %v2956_v49 }
 0x2de   :  { %v2984_v22 = vshrl.u32 %v2972_v30, 3  ;;  %v2985_v56 = vor.u32 %v2981_v13, %v2977_v36  ;;  %v2632_v10 = vmul.f32 5.9604645e-08, %v2628_v33  ;;  %v2634_v59 = vshrl.u32 %v2614_v14, 8 }
 0x2df   :  { %v2986_v20 = vor.u32 %v2982_v2, %v2978_v54  ;;  %v2987_v4 = vor.u32 %v2983_v26, %v2979_v7  ;;  %v2635_v43 = vshrl.u32 %v2615_v60, 8  ;;  %v2636_v12 = vshrl.u32 %v2616_v47, 8 }
 0x2e0   :  { %v2988_v41 = vor.u32 %v2984_v22, %v2980_v52  ;;  %v2989_v46 = vxor.u32 %v2985_v56, %v2973_v15  ;;  %v2637_v29 = vcvt.s32.f32 %v2633_v58  ;;  %v4333_v62 = vmul.f32 %v2629_v24, %v4182_v57 }
 0x2e1   :  { %v2990_v16 = vxor.u32 %v2986_v20, %v2974_v51  ;;  %v2991_v38 = vxor.u32 %v2987_v4, %v2975_v1  ;;  %v4336_v27 = vmul.f32 %v2630_v39, %v4193_v44  ;;  %v2638_v45 = vcvt.s32.f32 %v2634_v59 }
 0x2e2   :  { %v2992_v8 = vxor.u32 %v2988_v41, %v2976_v63  ;;  %v2997_v53 = vshll.u32 %v2989_v46, 16  ;;  %v3001_v28 = vshrl.u32 %v2989_v46, 16  ;;  %v2993_v23 = vadd.s32 %v2989_v46, %v2973_v15 }
 0x2e3   :  { %v2994_v14 = vadd.s32 %v2990_v16, %v2974_v51  ;;  %v2998_v49 = vshll.u32 %v2990_v16, 16  ;;  %v2999_v25 = vshll.u32 %v2991_v38, 16  ;;  %v2995_v34 = vadd.s32 %v2991_v38, %v2975_v1 }
 0x2e4   :  { %v3000_v60 = vshll.u32 %v2992_v8, 16  ;;  %v3002_v6 = vshrl.u32 %v2990_v16, 16  ;;  %v3003_v18 = vshrl.u32 %v2991_v38, 16  ;;  %v2996_v47 = vadd.s32 %v2992_v8, %v2976_v63 }
 0x2e5   :  { %v3004_v57 = vshrl.u32 %v2992_v8, 16  ;;  %v3005_v33 = vor.u32 %v3001_v28, %v2997_v53  ;;  %v2639_v17 = vcvt.s32.f32 %v2635_v43  ;;  %v4339_v11 = vmul.f32 %v2631_v32, %v4196_v19 }
 0x2e6   :  { %v3006_v44 = vor.u32 %v3002_v6, %v2998_v49  ;;  %v3007_v24 = vor.u32 %v3003_v18, %v2999_v25  ;;  %v2640_v39 = vcvt.s32.f32 %v2636_v12  ;;  %v4342_v50 = vmul.f32 %v2632_v10, %v4217_v21 }
 0x2e7   :  { %v3008_v9 = vor.u32 %v3004_v57, %v3000_v60  ;;  %v3009_v58 = vxor.u32 %v3005_v33, %v2993_v23  ;;  %v2641_v30 = vadd.f32 1.0, %v2637_v29  ;;  %vm2653_vm4 = vcmp.gt.f32.partialorder %v4333_v62, %v3502_v55 }
 0x2e8   :  { %v3010_v36 = vxor.u32 %v3006_v44, %v2994_v14  ;;  %v3011_v13 = vxor.u32 %v3007_v24, %v2995_v34  ;;  %vm2654_vm5 = vcmp.gt.f32.partialorder %v4336_v27, %v3510_v3  ;;  %v2642_v63 = vadd.f32 1.0, %v2638_v45 }
 0x2e9   :  { %v3012_v15 = vxor.u32 %v3008_v9, %v2996_v47  ;;  %v3017_v19 = vshll.u32 %v3009_v58, 24  ;;  %v3021_v51 = vshrl.u32 %v3009_v58, 8  ;;  %v3013_v54 = vadd.s32 %v3009_v58, %v2993_v23 }
 0x2ea   :  { %v3014_v7 = vadd.s32 %v3010_v36, %v2994_v14  ;;  %v3018_v1 = vshll.u32 %v3010_v36, 24  ;;  %v3019_v52 = vshll.u32 %v3011_v13, 24  ;;  %v3015_v21 = vadd.s32 %v3011_v13, %v2995_v34 }
 0x2eb   :  { %v3020_v2 = vshll.u32 %v3012_v15, 24  ;;  %v3022_v26 = vshrl.u32 %v3010_v36, 8  ;;  %v3023_v32 = vshrl.u32 %v3011_v13, 8  ;;  %v3016_v22 = vadd.s32 %v3012_v15, %v2996_v47 }
 0x2ec   :  { %v3024_v56 = vshrl.u32 %v3012_v15, 8  ;;  %v3025_v10 = vor.u32 %v3021_v51, %v3017_v19  ;;  %v2643_v59 = vadd.f32 1.0, %v2639_v17  ;;  %vm2655_vm6 = vcmp.gt.f32.partialorder %v4339_v11, %v4523_v31 }
 0x2ed   :  { %v3026_v20 = vor.u32 %v3022_v26, %v3018_v1  ;;  %v3027_v4 = vor.u32 %v3023_v32, %v3019_v52  ;;  %v2644_v43 = vadd.f32 1.0, %v2640_v39  ;;  %vm2656_vm7 = vcmp.gt.f32.partialorder %v4342_v50, %v4524_v48 }
 0x2ee   :  { %v3028_v12 = vor.u32 %v3024_v56, %v3020_v2  ;;  %v3029_v41 = vxor.u32 %v3025_v10, %v3013_v54  ;;  %v2645_v46 = vmul.f32 5.9604645e-08, %v2641_v30  ;;  %v3267_v29 = vsel %vm2653_vm4, 1.0, %v4494_v42 }
 0x2ef   :  { %v3030_v16 = vxor.u32 %v3026_v20, %v3014_v7  ;;  %v3031_v38 = vxor.u32 %v3027_v4, %v3015_v21  ;;  %v2646_v8 = vmul.f32 5.9604645e-08, %v2642_v63  ;;  %v3268_v53 = vsel %vm2654_vm5, 1.0, %v4494_v42 }
 0x2f0   :  { %v3032_v28 = vxor.u32 %v3028_v12, %v3016_v22  ;;  %v3037_v23 = vadd.s32 %v3029_v41, %v3418_v35  ;;  %v3033_v14 = vadd.s32 1013904242, %v3013_v54  ;;  %v3034_v49 = vadd.s32 1013904242, %v3014_v7 }
 0x2f1   :  { %v3038_v25 = vadd.s32 %v3030_v16, %v3418_v35  ;;  %v3039_v34 = vadd.s32 %v3031_v38, %v3418_v35  ;;  %v2647_v60 = vmul.f32 5.9604645e-08, %v2643_v59  ;;  %v3035_v6 = vadd.s32 1013904242, %v3015_v21 }
 0x2f2   :  { %v3040_v18 = vadd.s32 %v3032_v28, %v3418_v35  ;;  %v3041_v45 = vadd.s32 4, %v3037_v23  ;;  %v3269_v47 = vsel %vm2655_vm6, 1.0, %v4494_v42  ;;  %v3036_v57 = vadd.s32 1013904242, %v3016_v22 }
 0x2f3   :  { %v3042_v33 = vadd.s32 4, %v3038_v25  ;;  %v3043_v17 = vadd.s32 4, %v3039_v34  ;;  %v2648_v44 = vmul.f32 5.9604645e-08, %v2644_v43  ;;  %v4369_v7 = vmul.f32 %v4333_v62, %v2645_v46 }
 0x2f4   :  { %v3044_v24 = vadd.s32 4, %v3040_v18  ;;  %v3049_v39 = vshll.u32 %v3041_v45, 13  ;;  %v3053_v9 = vshrl.u32 %v3041_v45, 19  ;;  %v3045_v58 = vadd.s32 %v3041_v45, %v3033_v14 }
 0x2f5   :  { %v3046_v30 = vadd.s32 %v3042_v33, %v3034_v49  ;;  %v3050_v36 = vshll.u32 %v3042_v33, 13  ;;  %v3051_v13 = vshll.u32 %v3043_v17, 13  ;;  %v3047_v15 = vadd.s32 %v3043_v17, %v3035_v6 }
 0x2f6   :  { %v3052_v19 = vshll.u32 %v3044_v24, 13  ;;  %v3054_v51 = vshrl.u32 %v3042_v33, 19  ;;  %v3055_v54 = vshrl.u32 %v3043_v17, 19  ;;  %v3048_v1 = vadd.s32 %v3044_v24, %v3036_v57 }
 0x2f7   :  { %v3056_v52 = vshrl.u32 %v3044_v24, 19  ;;  %v3057_v21 = vor.u32 %v3053_v9, %v3049_v39  ;;  %v3270_v2 = vsel %vm2656_vm7, 1.0, %v4494_v42  ;;  %v2665_v26 = vadd.f32 %v3267_v29, %v4257_v37 }
 0x2f8   :  { %v3058_v32 = vor.u32 %v3054_v51, %v3050_v36  ;;  %v3059_v63 = vor.u32 %v3055_v54, %v3051_v13  ;;  %v2666_v22 = vadd.f32 %v3268_v53, %v4260_v40  ;;  %v4378_v56 = vmul.f32 %v4336_v27, %v2646_v8 }
 0x2f9   :  { %v3060_v10 = vor.u32 %v3056_v52, %v3052_v19  ;;  %v3061_v62 = vxor.u32 %v3057_v21, %v3045_v58  ;;  %v4381_v59 = vmul.f32 %v4339_v11, %v2647_v60  ;;  %v4384_v20 = vmul.f32 %v4342_v50, %v2648_v44 }
 0x2fa   :  { %v3062_v4 = vxor.u32 %v3058_v32, %v3046_v30  ;;  %v3063_v43 = vxor.u32 %v3059_v63, %v3047_v15  ;;  %vm2673_vm8 = vcmp.gt.f32.partialorder %v4369_v7, %v3502_v55  ;;  %vm2674_vm9 = vcmp.gt.f32.partialorder %v4378_v56, %v3510_v3 }
 0x2fb   :  { %v3064_v37 = vxor.u32 %v3060_v10, %v3048_v1  ;;  %v3069_v12 = vshll.u32 %v3061_v62, 15  ;;  %v3073_v41 = vshrl.u32 %v3061_v62, 17  ;;  %v3065_v40 = vadd.s32 %v3061_v62, %v3045_v58 }
 0x2fc   :  { %v3066_v46 = vadd.s32 %v3062_v4, %v3046_v30  ;;  %v3070_v27 = vshll.u32 %v3062_v4, 15  ;;  %v3071_v29 = vshll.u32 %v3063_v43, 15  ;;  %v3067_v16 = vadd.s32 %v3063_v43, %v3047_v15 }
 0x2fd   :  { %v3072_v38 = vshll.u32 %v3064_v37, 15  ;;  %v3074_v8 = vshrl.u32 %v3062_v4, 17  ;;  %v3075_v11 = vshrl.u32 %v3063_v43, 17  ;;  %v3068_v50 = vadd.s32 %v3064_v37, %v3048_v1 }
 0x2fe   :  { %v3076_v53 = vshrl.u32 %v3064_v37, 17  ;;  %v3077_v28 = vor.u32 %v3073_v41, %v3069_v12  ;;  %v2667_v23 = vadd.f32 %v3269_v47, %v4263_v0  ;;  %vm2675_vm10 = vcmp.gt.f32.partialorder %v4381_v59, %v4523_v31 }
 0x2ff   :  { %v3078_v14 = vor.u32 %v3074_v8, %v3070_v27  ;;  %v3079_v49 = vor.u32 %v3075_v11, %v3071_v29  ;;  %v2668_v25 = vadd.f32 %v3270_v2, %v4266_v5  ;;  %vm2676_vm11 = vcmp.gt.f32.partialorder %v4384_v20, %v4524_v48 }
 0x300   :  { %v3080_v34 = vor.u32 %v3076_v53, %v3072_v38  ;;  %v3081_v60 = vxor.u32 %v3077_v28, %v3065_v40  ;;  %v3271_v6 = vsel %vm2673_vm8, 1.0, %v4494_v42  ;;  %v3272_v18 = vsel %vm2674_vm9, 1.0, %v4494_v42 }
 0x301   :  { %v3082_v0 = vxor.u32 %v3078_v14, %v3066_v46  ;;  %v3083_v45 = vxor.u32 %v3079_v49, %v3067_v16  ;;  %v3273_v47 = vsel %vm2675_vm10, 1.0, %v4494_v42  ;;  %v3274_v13 = vsel %vm2676_vm11, 1.0, %v4494_v42 }
 0x302   :  { %v3084_v57 = vxor.u32 %v3080_v34, %v3068_v50  ;;  %v3089_v33 = vshll.u32 %v3081_v60, 26  ;;  %v3093_v17 = vshrl.u32 %v3081_v60, 6  ;;  %v3085_v5 = vadd.s32 %v3081_v60, %v3065_v40 }
 0x303   :  { %v3086_v44 = vadd.s32 %v3082_v0, %v3066_v46  ;;  %v3090_v24 = vshll.u32 %v3082_v0, 26  ;;  %v3091_v39 = vshll.u32 %v3083_v45, 26  ;;  %v3087_v9 = vadd.s32 %v3083_v45, %v3067_v16 }
 0x304   :  { %v3092_v58 = vshll.u32 %v3084_v57, 26  ;;  %v3094_v30 = vshrl.u32 %v3082_v0, 6  ;;  %v3095_v36 = vshrl.u32 %v3083_v45, 6  ;;  %v3088_v15 = vadd.s32 %v3084_v57, %v3068_v50 }
 0x305   :  { %v3096_v19 = vshrl.u32 %v3084_v57, 6  ;;  %v3097_v51 = vor.u32 %v3093_v17, %v3089_v33  ;;  %v4406_v52 = vadd.f32 %v3271_v6, %v2665_v26  ;;  %v4408_v21 = vadd.f32 %v3272_v18, %v2666_v22 }
 0x306   :  { %v3098_v54 = vor.u32 %v3094_v30, %v3090_v24  ;;  %v3099_v1 = vor.u32 %v3095_v36, %v3091_v39  ;;  %v4410_v63 = vadd.f32 %v3273_v47, %v2667_v23  ;;  %v4412_v10 = vadd.f32 %v3274_v13, %v2668_v25 }
 0x307   :  { %v3100_v2 = vor.u32 %v3096_v19, %v3092_v58  ;;  %v3101_v32 = vxor.u32 %v3097_v51, %v3085_v5 }
 0x308   :  { %v3102_v62 = vxor.u32 %v3098_v54, %v3086_v44  ;;  %v3103_v4 = vxor.u32 %v3099_v1, %v3087_v9 }
 0x309   :  { %v3104_v43 = vxor.u32 %v3100_v2, %v3088_v15  ;;  %v3105_v37 = vadd.s32 %v3101_v32, %v3085_v5  ;;  %v3109_v12 = vshll.u32 %v3101_v32, 6  ;;  %v3113_v41 = vshrl.u32 %v3101_v32, 26 }
 0x30a   :  { %v3106_v40 = vadd.s32 %v3102_v62, %v3086_v44  ;;  %v3107_v46 = vadd.s32 %v3103_v4, %v3087_v9  ;;  %v3110_v27 = vshll.u32 %v3102_v62, 6  ;;  %v3111_v29 = vshll.u32 %v3103_v4, 6 }
 0x30b   :  { %v3108_v26 = vadd.s32 %v3104_v43, %v3088_v15  ;;  %v3112_v16 = vshll.u32 %v3104_v43, 6  ;;  %v3114_v22 = vshrl.u32 %v3102_v62, 26  ;;  %v3115_v38 = vshrl.u32 %v3103_v4, 26 }
 0x30c   :  { %v3116_v8 = vshrl.u32 %v3104_v43, 26  ;;  %v3117_v11 = vor.u32 %v3113_v41, %v3109_v12  ;;  %v3125_v50 = vadd.s32 %v3105_v37, %v3418_v35  ;;  %v3126_v53 = vadd.s32 %v3106_v40, %v3418_v35 }
 0x30d   :  { %v3118_v28 = vor.u32 %v3114_v22, %v3110_v27  ;;  %v3119_v23 = vor.u32 %v3115_v38, %v3111_v29  ;;  %v3127_v14 = vadd.s32 %v3107_v46, %v3418_v35  ;;  %v3128_v49 = vadd.s32 %v3108_v26, %v3418_v35 }
 0x30e   :  { %v3120_v25 = vor.u32 %v3116_v8, %v3112_v16  ;;  %v3121_v34 = vxor.u32 %v3117_v11, %v3105_v37  ;;  %v3137_v60 = vshrl.u32 %v3125_v50, 8  ;;  %v3138_v6 = vshrl.u32 %v3126_v53, 8 }
 0x30f   :  { %v3122_v18 = vxor.u32 %v3118_v28, %v3106_v40  ;;  %v3123_v0 = vxor.u32 %v3119_v23, %v3107_v46  ;;  %v3139_v45 = vshrl.u32 %v3127_v14, 8  ;;  %v3140_v47 = vshrl.u32 %v3128_v49, 8 }
 0x310   :  { %v3124_v57 = vxor.u32 %v3120_v25, %v3108_v26  ;;  %v3129_v33 = vadd.s32 %v3121_v34, %v4529_v61  ;;  %v3141_v17 = vcvt.s32.f32 %v3137_v60  ;;  %v3142_v5 = vcvt.s32.f32 %v3138_v6 }
 0x311   :  { %v3130_v44 = vadd.s32 %v3122_v18, %v4529_v61  ;;  %v3131_v24 = vadd.s32 %v3123_v0, %v4529_v61  ;;  %v3143_v39 = vcvt.s32.f32 %v3139_v45  ;;  %v3144_v9 = vcvt.s32.f32 %v3140_v47 }
 0x312   :  { %v3132_v35 = vadd.s32 %v3124_v57, %v4529_v61  ;;  %v3133_v58 = vadd.s32 5, %v3129_v33  ;;  %v3145_v30 = vadd.f32 1.0, %v3141_v17  ;;  %v3146_v36 = vadd.f32 1.0, %v3142_v5  ;;  %v4530_v17 = vld [vmem:[#allocation10_spill] sm:$0xff] }
 0x313   :  { %v3134_v13 = vadd.s32 5, %v3130_v44  ;;  %v3135_v15 = vadd.s32 5, %v3131_v24  ;;  %v3147_v19 = vadd.f32 1.0, %v3143_v39  ;;  %v3148_v51 = vadd.f32 1.0, %v3144_v9 }
 0x314   :  { %v3136_v54 = vadd.s32 5, %v3132_v35  ;;  %v3149_v1 = vmul.f32 5.9604645e-08, %v3145_v30  ;;  %v3150_v2 = vmul.f32 5.9604645e-08, %v3146_v36  ;;  %v3153_v32 = vshrl.u32 %v3133_v58, 8 }
 0x315   :  { %v3151_v62 = vmul.f32 5.9604645e-08, %v3147_v19  ;;  %v3152_v4 = vmul.f32 5.9604645e-08, %v3148_v51  ;;  %v3154_v43 = vshrl.u32 %v3134_v13, 8  ;;  %v3155_v37 = vshrl.u32 %v3135_v15, 8 }
 0x316   :  { %v3156_v12 = vshrl.u32 %v3136_v54, 8  ;;  %v3157_v41 = vcvt.s32.f32 %v3153_v32  ;;  %v3169_v40 = vmul.f32 %v3149_v1, %v4369_v7  ;;  %v3170_v61 = vmul.f32 %v3150_v2, %v4378_v56 }
 0x317   :  { %v3158_v46 = vcvt.s32.f32 %v3154_v43  ;;  %v3159_v27 = vcvt.s32.f32 %v3155_v37  ;;  %v3171_v29 = vmul.f32 %v3151_v62, %v4381_v59  ;;  %v3172_v26 = vmul.f32 %v3152_v4, %v4384_v20 }
 0x318   :  { %v3160_v16 = vcvt.s32.f32 %v3156_v12  ;;  %v3161_v22 = vadd.f32 1.0, %v3157_v41  ;;  %vm3173_vm12 = vcmp.gt.f32.partialorder %v3169_v40, %v3502_v55  ;;  %vm3174_vm13 = vcmp.gt.f32.partialorder %v3170_v61, %v3510_v3 }
 0x319   :  { %v3162_v38 = vadd.f32 1.0, %v3158_v46  ;;  %v3163_v8 = vadd.f32 1.0, %v3159_v27  ;;  %vm3175_vm14 = vcmp.gt.f32.partialorder %v3171_v29, %v4523_v31  ;;  %vm3176_vm15 = vcmp.gt.f32.partialorder %v3172_v26, %v4524_v48 }
 0x31a   :  { %v3164_v7 = vadd.f32 1.0, %v3160_v16  ;;  %v3165_v56 = vmul.f32 5.9604645e-08, %v3161_v22  ;;  %v3275_v11 = vsel %vm3173_vm12, 1.0, %v4494_v42  ;;  %v3276_v59 = vsel %vm3174_vm13, 1.0, %v4494_v42 }
 0x31b   :  { %v3166_v50 = vmul.f32 5.9604645e-08, %v3162_v38  ;;  %v3167_v20 = vmul.f32 5.9604645e-08, %v3163_v8  ;;  %v3277_v53 = vsel %vm3175_vm14, 1.0, %v4494_v42  ;;  %v3278_v28 = vsel %vm3176_vm15, 1.0, %v4494_v42 }
 0x31c   :  { %v3168_v23 = vmul.f32 5.9604645e-08, %v3164_v7  ;;  %v3185_v14 = vadd.f32 %v3275_v11, %v4406_v52  ;;  %v3186_v49 = vadd.f32 %v3276_v59, %v4408_v21  ;;  %v3187_v25 = vadd.f32 %v3277_v53, %v4410_v63 }
 0x31d   :  { %v3189_v34 = vmul.f32 %v3169_v40, %v3165_v56  ;;  %v3190_v60 = vmul.f32 %v3170_v61, %v3166_v50  ;;  %v3191_v6 = vmul.f32 %v3171_v29, %v3167_v20  ;;  %v3188_v18 = vadd.f32 %v3278_v28, %v4412_v10 }
 0x31e   :  { %v3192_v0 = vmul.f32 %v3172_v26, %v3168_v23 }
 0x31f   :  { %vm3193_vm0 = vcmp.gt.f32.partialorder %v3189_v34, %v3502_v55  ;;  %vm3194_vm1 = vcmp.gt.f32.partialorder %v3190_v60, %v3510_v3  ;;  %vm3195_vm2 = vcmp.gt.f32.partialorder %v3191_v6, %v4523_v31 }
 0x320   :  { %vm3196_vm3 = vcmp.gt.f32.partialorder %v3192_v0, %v4524_v48  ;;  %v3279_v52 = vsel %vm3193_vm0, 1.0, %v4494_v42  ;;  %v3280_v21 = vsel %vm3194_vm1, 1.0, %v4494_v42  ;;  %v3281_v63 = vsel %vm3195_vm2, 1.0, %v4494_v42 }
 0x321   :  { %v3282_v45 = vsel %vm3196_vm3, 1.0, %v4494_v42  ;;  %v3205_v47 = vadd.f32 %v3279_v52, %v3185_v14  ;;  %v3206_v57 = vadd.f32 %v3280_v21, %v3186_v49  ;;  %v3207_v10 = vadd.f32 %v3281_v63, %v3187_v25 }
 0x322   :  { %v3208_v33 = vadd.f32 %v3282_v45, %v3188_v18 }
 0x323   :  { %v3210_v55 = vmul.f32 %v3205_v47, %v4530_v17  ;;  %v3211_v3 = vmul.f32 %v3206_v57, %v4530_v17  ;;  %v3212_v31 = vmul.f32 %v3207_v10, %v4530_v17 }
 0x324   :  { %v3213_v48 = vmul.f32 %v3208_v33, %v4530_v17 }
 0x325   :  { %3214 = vst [vmem:[#allocation7] sm:$0xff] %v3210_v55 }
 0x326   :  { %3215 = vst [vmem:[#allocation7 + $0x8] sm:$0xff] %v3211_v3 }
 0x327   :  { %3216 = vst [vmem:[#allocation7 + $0x10] sm:$0xff] %v3212_v31 }
 0x328   :  { %3217 = vst [vmem:[#allocation7 + $0x18] sm:$0xff] %v3213_v48 }
 0x329   :  { %3228 = dma.vmem_to_hbm [thread:$0]  %s3224_s24, 512, %s3226_s27, [#allocation6]  }
 0x32a   :  { %3348 = dma.done.wait [#allocation6], 512  }
 0x32b   :  { %3349 = vsyncadd [#allocation6], 4294966784 }
 0x32c   :  { %3233 = vsyncpa [#allocation5], 1 }
 0x32d   :  { %3234 = vsyncpa [#allocation6], 1 }

</bundles_post_ra>
